<compile_context>
chip_gen: v6e
topology: v6e:2x2x1
jax: 0.10.0
libtpu: 0.0.40
codegen_flags: <defaults>
</compile_context>

<pallas_src>
import functools

import jax
import jax.numpy as jnp
from jax.experimental import pallas as pl
from jax.experimental.pallas import tpu as pltpu


# ------------------------------ fused kernel --------------------------------

def _down_block_kernel(xph_ref, w1_ref, b1_ref, w2_ref, b2_ref, w3_ref, b3_ref,
                       out_ref, patch_ref, l0p_ref,
                       d00_ref, d01_ref, d10_ref, d11_ref):
    """Whole DownBlock for one batch element (K=4, stride=2, pad=1).

    xph_ref : (4, OH+1, OW+1, C)  stride-2 phase planes of zero-padded input
    w1_ref  : (K*K*C, C)          conv1 weight as a single matrix
    b1_ref  : (1, C)
    w2_ref  : (9*C, 4*C)          deconv weight: 9 shifted windows -> 4 phases
    b2_ref  : (1, 4*C)            deconv bias tiled over the 4 phases
    w3_ref  : (K*K*C, C)          conv3 weight
    b3_ref  : (1, C)
    out_ref : (M, C)              l1 + l0 (exact-size HBM store, M = OH*OW)
    patch_ref: (M, K*K*C)         shared im2col patch scratch
    l0p_ref : (OH+2, OW+2, C)     zero-padded l0 (scratch)
    d*_ref  : (OH+1, OW+1, C)     phase planes of padded (h0 - x) (scratch)
    """
    K = 4
    _, PH, PW, C = xph_ref.shape
    OH, OW = PH - 1, PW - 1
    M = OH * OW
    f32 = jnp.float32

    dplanes = {(0, 0): d00_ref, (0, 1): d01_ref,
               (1, 0): d10_ref, (1, 1): d11_ref}

    # ---- l0 = down_conv1(x): build (M, K*K*C) patch, ONE matmul --------------
    for ki in range(K):
        for kj in range(K):
            t = ki * K + kj
            win = xph_ref[(ki & 1) * 2 + (kj & 1),
                          ki // 2:ki // 2 + OH,
                          kj // 2:kj // 2 + OW, :]
            patch_ref[:, t * C:(t + 1) * C] = win.reshape(M, C)
    l0 = jnp.dot(patch_ref[...], w1_ref[...],
                 preferred_element_type=f32) + b1_ref[...]          # (M, C)

    # Zero-padded l0 scratch: write only the 1-wide border + the interior
    # (border re-zeroed every step -> correct when batch is core-parallel).
    zrow = jnp.zeros((1, OW + 2, C), f32)
    zcol = jnp.zeros((OH + 2, 1, C), f32)
    l0p_ref[0:1, :, :] = zrow
    l0p_ref[OH + 1:OH + 2, :, :] = zrow
    l0p_ref[:, 0:1, :] = zcol
    l0p_ref[:, OW + 1:OW + 2, :] = zcol
    l0p_ref[1:OH + 1, 1:OW + 1, :] = l0.reshape(OH, OW, C)

    # ---- h0 = down_conv2(l0): sub-pixel deconv, 9 windows, ONE matmul --------
    # hall[:, (2q+r)*C:(2q+r+1)*C] = output phase (q, r) of the transposed conv.
    for dy in range(3):
        for dx in range(3):
            g = dy * 3 + dx
            win = l0p_ref[dy:dy + OH, dx:dx + OW, :]
            patch_ref[:, g * C:(g + 1) * C] = win.reshape(M, C)
    hall = jnp.dot(patch_ref[:, :9 * C], w2_ref[...],
                   preferred_element_type=f32) + b2_ref[...]        # (M, 4*C)

    # ---- (h0 - x) phase planes: stored once, only the 1-wide border zeroed ---
    for pi in range(2):
        for pj in range(2):
            q, r = 1 - pi, 1 - pj
            dp = dplanes[(pi, pj)]
            # Uncovered border row/col corresponds to the zero padding of both
            # h0 and x, so it is exactly zero.
            row_z = OH if q == 0 else 0
            col_z = OW if r == 0 else 0
            dp[row_z:row_z + 1, :, :] = jnp.zeros((1, OW + 1, C), f32)
            dp[:, col_z:col_z + 1, :] = jnp.zeros((OH + 1, 1, C), f32)
            ph = hall[:, (q * 2 + r) * C:(q * 2 + r + 1) * C]
            xwin = xph_ref[pi * 2 + pj, q:q + OH, r:r + OW, :].reshape(M, C)
            dp[q:q + OH, r:r + OW, :] = (ph - xwin).reshape(OH, OW, C)

    # ---- l1 = down_conv3(h0 - x); fused residual out = l1 + l0 ---------------
    for ki in range(K):
        for kj in range(K):
            t = ki * K + kj
            win = dplanes[(ki & 1, kj & 1)][ki // 2:ki // 2 + OH,
                                            kj // 2:kj // 2 + OW, :]
            patch_ref[:, t * C:(t + 1) * C] = win.reshape(M, C)
    l1 = jnp.dot(patch_ref[...], w3_ref[...],
                 preferred_element_type=f32) + b3_ref[...]          # (M, C)

    # Re-read l0 from scratch (instead of holding it live in vregs).
    l0_back = l0p_ref[1:OH + 1, 1:OW + 1, :].reshape(M, C)
    out_ref[...] = l1 + l0_back


# ------------------------------ JAX wrapper ---------------------------------

def _prep_conv_weight(w):
    # PyTorch Conv2d weight (Cout, Cin, K, K) -> (K*K*Cin, Cout),
    # rows ordered (ki, kj, ci) to match the kernel's patch column layout.
    cout, cin, kh, kw = w.shape
    return jnp.transpose(w, (2, 3, 1, 0)).reshape(kh * kw * cin, cout).astype(
        jnp.float32)


def _prep_deconv_weight_subpixel(w):
    # PyTorch ConvTranspose2d weight (Cin, Cout, K, K) -> (9*Cin, 4*Cout).
    # Row block g = dy*3+dx corresponds to the l0p window shifted by (dy, dx);
    # column block p = 2*q+r is output phase (q, r) of the stride-2 deconv.
    cin, cout, K, _ = w.shape
    W2 = jnp.zeros((9 * cin, 4 * cout), jnp.float32)
    for dy in range(3):
        for dx in range(3):
            for q in range(2):
                for r in range(2):
                    a, b = dy - q, dx - r
                    if 0 <= a <= 1 and 0 <= b <= 1:
                        ki, kj = 3 - 2 * a - q, 3 - 2 * b - r
                        W2 = W2.at[(dy * 3 + dx) * cin:(dy * 3 + dx + 1) * cin,
                                   (q * 2 + r) * cout:(q * 2 + r + 1) * cout
                                   ].set(w[:, :, ki, kj].astype(jnp.float32))
    return W2


@functools.partial(jax.jit, static_argnames=("stride", "padding"))
def down_block_forward(x, params, *, stride=2, padding=1):
    """DownBlock forward.  x: (N, C, H, W) NCHW -> (N, C, H//2, W//2)."""
    N, C, H, W = x.shape
    K = params["w1"].shape[2]
    if (K, stride, padding) != (4, 2, 1) or H % 2 or W % 2:
        # TODO(synk): generalize the phase decomposition beyond K=4, s=2, p=1.
        raise NotImplementedError("fused kernel specialized to K=4, stride=2, pad=1")
    OH, OW = H // 2, W // 2
    M = OH * OW
    KKC = K * K * C

    # NHWC + zero pad + split into the 4 stride-2 phase planes (pure layout
    # permutation; no KH*KW im2col blow-up hits HBM).
    # TODO(synk): fold this pad/transpose/phase-split into the kernel via
    # strided in-kernel reads to avoid the extra HBM pass over the input.
    xp = jnp.pad(jnp.transpose(x, (0, 2, 3, 1)).astype(jnp.float32),
                 ((0, 0), (1, 1), (1, 1), (0, 0)))
    planes = jnp.stack([xp[:, pi::2, pj::2, :]
                        for pi in range(2) for pj in range(2)], axis=1)
    planes = planes.reshape(N * 4, OH + 1, OW + 1, C)

    w1 = _prep_conv_weight(params["w1"])
    w2a = _prep_deconv_weight_subpixel(params["w2"])
    w3 = _prep_conv_weight(params["w3"])
    b1 = params["b1"].reshape(1, C).astype(jnp.float32)
    b2t = jnp.tile(params["b2"].astype(jnp.float32), 4).reshape(1, 4 * C)
    b3 = params["b3"].reshape(1, C).astype(jnp.float32)

    def full_spec(shape):
        return pl.BlockSpec(shape, lambda *_: (0,) * len(shape))

    grid_spec = pltpu.PrefetchScalarGridSpec(
        num_scalar_prefetch=0,
        grid=(N,),
        in_specs=[
            pl.BlockSpec((4, OH + 1, OW + 1, C), lambda n: (n, 0, 0, 0)),
            full_spec(w1.shape), full_spec(b1.shape),
            full_spec(w2a.shape), full_spec(b2t.shape),
            full_spec(w3.shape), full_spec(b3.shape),
        ],
        out_specs=pl.BlockSpec((M, C), lambda n: (n, 0)),
        scratch_shapes=[
            pltpu.VMEM((M, KKC), jnp.float32),              # shared im2col patch
            pltpu.VMEM((OH + 2, OW + 2, C), jnp.float32),   # zero-padded l0
            pltpu.VMEM((OH + 1, OW + 1, C), jnp.float32),   # (h0 - x) plane 00
            pltpu.VMEM((OH + 1, OW + 1, C), jnp.float32),   # (h0 - x) plane 01
            pltpu.VMEM((OH + 1, OW + 1, C), jnp.float32),   # (h0 - x) plane 10
            pltpu.VMEM((OH + 1, OW + 1, C), jnp.float32),   # (h0 - x) plane 11
        ],
    )

    # Useful work only (no padded lanes): 2 strided convs + the 4-phase deconv.
    flops = 2 * N * M * (2 * KKC * C + (9 * C) * (4 * C))
    bytes_accessed = 4 * (planes.size + w1.size + w2a.size + w3.size
                          + b1.size + b2t.size + b3.size + N * M * C)

    out2d = pl.pallas_call(
        _down_block_kernel,
        out_shape=jax.ShapeDtypeStruct((N * M, C), jnp.float32),
        grid_spec=grid_spec,
        compiler_params=pltpu.CompilerParams(
            dimension_semantics=("parallel",),
            vmem_limit_bytes=32 * 1024 * 1024),
        cost_estimate=pl.CostEstimate(flops=flops, transcendentals=0,
                                      bytes_accessed=bytes_accessed),
    )(planes, w1, b1, w2a, b2t, w3, b3)

    out = out2d.reshape(N, OH, OW, C)
    return jnp.transpose(out, (0, 3, 1, 2))


# ------------------------------- Reference ----------------------------------

def _ref_conv(x, w, b, stride, padding):
    y = jax.lax.conv_general_dilated(
        x, w, window_strides=(stride, stride),
        padding=[(padding, padding), (padding, padding)],
        dimension_numbers=("NCHW", "OIHW", "NCHW"))
    return y + b[None, :, None, None]


def _ref_deconv(x, w, b, stride, padding):
    K = w.shape[2]
    w_conv = jnp.flip(w, axis=(2, 3)).transpose(1, 0, 2, 3)
    y = jax.lax.conv_general_dilated(
        x, w_conv, window_strides=(1, 1),
        padding=[(K - 1 - padding, K - 1 - padding)] * 2,
        lhs_dilation=(stride, stride),
        dimension_numbers=("NCHW", "OIHW", "NCHW"))
    return y + b[None, :, None, None]


def down_block_reference(x, params, stride, padding):
    l0 = _ref_conv(x, params["w1"], params["b1"], stride, padding)
    h0 = _ref_deconv(l0, params["w2"], params["b2"], stride, padding)
    l1 = _ref_conv(h0 - x, params["w3"], params["b3"], stride, padding)
    return l1 + l0


# ---------------------------------- Main -------------------------------------

if __name__ == "__main__":
    # DownBlock(num_channels=4, kernel_size=4, stride=2, padding=1,
    #           bias=True, activation=None, norm=None)
    num_channels, kernel_size, stride, padding = 4, 4, 2, 1
    N, H, W = 2, 16, 16

    key = jax.random.PRNGKey(0)
    ks = jax.random.split(key, 7)
    x = jax.random.normal(ks[0], (N, num_channels, H, W), jnp.float32)

    C, K = num_channels, kernel_size
    params = {
        # ConvBlock 1: Conv2d weight (Cout, Cin, K, K)
        "w1": 0.1 * jax.random.normal(ks[1], (C, C, K, K), jnp.float32),
        "b1": 0.1 * jax.random.normal(ks[2], (C,), jnp.float32),
        # DeconvBlock: ConvTranspose2d weight (Cin, Cout, K, K)
        "w2": 0.1 * jax.random.normal(ks[3], (C, C, K, K), jnp.float32),
        "b2": 0.1 * jax.random.normal(ks[4], (C,), jnp.float32),
        # ConvBlock 3
        "w3": 0.1 * jax.random.normal(ks[5], (C, C, K, K), jnp.float32),
        "b3": 0.1 * jax.random.normal(ks[6], (C,), jnp.float32),
    }

    out = down_block_forward(x, params, stride=stride, padding=padding)
    out = jax.block_until_ready(out)

    ref = jax.block_until_ready(down_block_reference(x, params, stride, padding))

    assert out.shape == (N, C, H // stride, W // stride), out.shape
    assert jnp.allclose(out, ref, atol=1e-4, rtol=1e-4), float(
        jnp.max(jnp.abs(out - ref)))

    print("KERNEL_OK")
</pallas_src>

<mosaic_0001>
module attributes {stable_mosaic.version = 11 : i64} {
  func.func @_down_block_kernel(%arg0: i32, %arg1: memref<4x9x9x4xf32, #tpu.memory_space<vmem>>, %arg2: memref<64x4xf32, #tpu.memory_space<vmem>>, %arg3: memref<1x4xf32, #tpu.memory_space<vmem>>, %arg4: memref<36x16xf32, #tpu.memory_space<vmem>>, %arg5: memref<1x16xf32, #tpu.memory_space<vmem>>, %arg6: memref<64x4xf32, #tpu.memory_space<vmem>>, %arg7: memref<1x4xf32, #tpu.memory_space<vmem>>, %arg8: memref<64x4xf32, #tpu.memory_space<vmem>>, %arg9: memref<64x64xf32, #tpu.memory_space<vmem>>, %arg10: memref<10x10x4xf32, #tpu.memory_space<vmem>>, %arg11: memref<9x9x4xf32, #tpu.memory_space<vmem>>, %arg12: memref<9x9x4xf32, #tpu.memory_space<vmem>>, %arg13: memref<9x9x4xf32, #tpu.memory_space<vmem>>, %arg14: memref<9x9x4xf32, #tpu.memory_space<vmem>>) attributes {dimension_semantics = [#tpu.dimension_semantics<parallel>], iteration_bounds = array<i64: 2>, scalar_prefetch = 0 : i64, scratch_operands = 6 : i64, tpu.core_type = #tpu.core_type<tc>, window_params = [{transform_indices = @transform_0, window_bounds = array<i64: 4, 9, 9, 4>}, {pipeline_mode = #tpu.pipeline_mode<synchronous>, transform_indices = @transform_1, window_bounds = array<i64: 64, 4>}, {pipeline_mode = #tpu.pipeline_mode<synchronous>, transform_indices = @transform_2, window_bounds = array<i64: 1, 4>}, {pipeline_mode = #tpu.pipeline_mode<synchronous>, transform_indices = @transform_3, window_bounds = array<i64: 36, 16>}, {pipeline_mode = #tpu.pipeline_mode<synchronous>, transform_indices = @transform_4, window_bounds = array<i64: 1, 16>}, {pipeline_mode = #tpu.pipeline_mode<synchronous>, transform_indices = @transform_5, window_bounds = array<i64: 64, 4>}, {pipeline_mode = #tpu.pipeline_mode<synchronous>, transform_indices = @transform_6, window_bounds = array<i64: 1, 4>}, {transform_indices = @transform_7, window_bounds = array<i64: 64, 4>}]} {
    %c0 = arith.constant 0 : index
    %c0_0 = arith.constant 0 : index
    %c0_1 = arith.constant 0 : index
    %c0_2 = arith.constant 0 : index
    %0 = vector.load %arg1[%c0, %c0_0, %c0_1, %c0_2] : memref<4x9x9x4xf32, #tpu.memory_space<vmem>>, vector<1x8x8x4xf32>
    %1 = vector.shape_cast %0 : vector<1x8x8x4xf32> to vector<8x8x4xf32>
    %2 = vector.shape_cast %1 : vector<8x8x4xf32> to vector<64x4xf32>
    %c0_3 = arith.constant 0 : index
    %c0_4 = arith.constant 0 : index
    %3 = vector.load %arg9[%c0_3, %c0_4] : memref<64x64xf32, #tpu.memory_space<vmem>>, vector<64x4xf32>
    tpu.vector_store %arg9[%c0_3, %c0_4], %2 {strides = array<i32>} : memref<64x64xf32, #tpu.memory_space<vmem>>, vector<64x4xf32>,
    %c1 = arith.constant 1 : index
    %c0_5 = arith.constant 0 : index
    %c0_6 = arith.constant 0 : index
    %c0_7 = arith.constant 0 : index
    %4 = vector.load %arg1[%c1, %c0_5, %c0_6, %c0_7] : memref<4x9x9x4xf32, #tpu.memory_space<vmem>>, vector<1x8x8x4xf32>
    %5 = vector.shape_cast %4 : vector<1x8x8x4xf32> to vector<8x8x4xf32>
    %6 = vector.shape_cast %5 : vector<8x8x4xf32> to vector<64x4xf32>
    %c0_8 = arith.constant 0 : index
    %c4 = arith.constant 4 : index
    %7 = vector.load %arg9[%c0_8, %c4] : memref<64x64xf32, #tpu.memory_space<vmem>>, vector<64x4xf32>
    tpu.vector_store %arg9[%c0_8, %c4], %6 {strides = array<i32>} : memref<64x64xf32, #tpu.memory_space<vmem>>, vector<64x4xf32>,
    %c0_9 = arith.constant 0 : index
    %c0_10 = arith.constant 0 : index
    %c1_11 = arith.constant 1 : index
    %c0_12 = arith.constant 0 : index
    %8 = vector.load %arg1[%c0_9, %c0_10, %c1_11, %c0_12] : memref<4x9x9x4xf32, #tpu.memory_space<vmem>>, vector<1x8x8x4xf32>
    %9 = vector.shape_cast %8 : vector<1x8x8x4xf32> to vector<8x8x4xf32>
    %10 = vector.shape_cast %9 : vector<8x8x4xf32> to vector<64x4xf32>
    %c0_13 = arith.constant 0 : index
    %c8 = arith.constant 8 : index
    %11 = vector.load %arg9[%c0_13, %c8] : memref<64x64xf32, #tpu.memory_space<vmem>>, vector<64x4xf32>
    tpu.vector_store %arg9[%c0_13, %c8], %10 {strides = array<i32>} : memref<64x64xf32, #tpu.memory_space<vmem>>, vector<64x4xf32>,
    %c1_14 = arith.constant 1 : index
    %c0_15 = arith.constant 0 : index
    %c1_16 = arith.constant 1 : index
    %c0_17 = arith.constant 0 : index
    %12 = vector.load %arg1[%c1_14, %c0_15, %c1_16, %c0_17] : memref<4x9x9x4xf32, #tpu.memory_space<vmem>>, vector<1x8x8x4xf32>
    %13 = vector.shape_cast %12 : vector<1x8x8x4xf32> to vector<8x8x4xf32>
    %14 = vector.shape_cast %13 : vector<8x8x4xf32> to vector<64x4xf32>
    %c0_18 = arith.constant 0 : index
    %c12 = arith.constant 12 : index
    %15 = vector.load %arg9[%c0_18, %c12] : memref<64x64xf32, #tpu.memory_space<vmem>>, vector<64x4xf32>
    tpu.vector_store %arg9[%c0_18, %c12], %14 {strides = array<i32>} : memref<64x64xf32, #tpu.memory_space<vmem>>, vector<64x4xf32>,
    %c2 = arith.constant 2 : index
    %c0_19 = arith.constant 0 : index
    %c0_20 = arith.constant 0 : index
    %c0_21 = arith.constant 0 : index
    %16 = vector.load %arg1[%c2, %c0_19, %c0_20, %c0_21] : memref<4x9x9x4xf32, #tpu.memory_space<vmem>>, vector<1x8x8x4xf32>
    %17 = vector.shape_cast %16 : vector<1x8x8x4xf32> to vector<8x8x4xf32>
    %18 = vector.shape_cast %17 : vector<8x8x4xf32> to vector<64x4xf32>
    %c0_22 = arith.constant 0 : index
    %c16 = arith.constant 16 : index
    %19 = vector.load %arg9[%c0_22, %c16] : memref<64x64xf32, #tpu.memory_space<vmem>>, vector<64x4xf32>
    tpu.vector_store %arg9[%c0_22, %c16], %18 {strides = array<i32>} : memref<64x64xf32, #tpu.memory_space<vmem>>, vector<64x4xf32>,
    %c3 = arith.constant 3 : index
    %c0_23 = arith.constant 0 : index
    %c0_24 = arith.constant 0 : index
    %c0_25 = arith.constant 0 : index
    %20 = vector.load %arg1[%c3, %c0_23, %c0_24, %c0_25] : memref<4x9x9x4xf32, #tpu.memory_space<vmem>>, vector<1x8x8x4xf32>
    %21 = vector.shape_cast %20 : vector<1x8x8x4xf32> to vector<8x8x4xf32>
    %22 = vector.shape_cast %21 : vector<8x8x4xf32> to vector<64x4xf32>
    %c0_26 = arith.constant 0 : index
    %c20 = arith.constant 20 : index
    %23 = vector.load %arg9[%c0_26, %c20] : memref<64x64xf32, #tpu.memory_space<vmem>>, vector<64x4xf32>
    tpu.vector_store %arg9[%c0_26, %c20], %22 {strides = array<i32>} : memref<64x64xf32, #tpu.memory_space<vmem>>, vector<64x4xf32>,
    %c2_27 = arith.constant 2 : index
    %c0_28 = arith.constant 0 : index
    %c1_29 = arith.constant 1 : index
    %c0_30 = arith.constant 0 : index
    %24 = vector.load %arg1[%c2_27, %c0_28, %c1_29, %c0_30] : memref<4x9x9x4xf32, #tpu.memory_space<vmem>>, vector<1x8x8x4xf32>
    %25 = vector.shape_cast %24 : vector<1x8x8x4xf32> to vector<8x8x4xf32>
    %26 = vector.shape_cast %25 : vector<8x8x4xf32> to vector<64x4xf32>
    %c0_31 = arith.constant 0 : index
    %c24 = arith.constant 24 : index
    %27 = vector.load %arg9[%c0_31, %c24] : memref<64x64xf32, #tpu.memory_space<vmem>>, vector<64x4xf32>
    tpu.vector_store %arg9[%c0_31, %c24], %26 {strides = array<i32>} : memref<64x64xf32, #tpu.memory_space<vmem>>, vector<64x4xf32>,
    %c3_32 = arith.constant 3 : index
    %c0_33 = arith.constant 0 : index
    %c1_34 = arith.constant 1 : index
    %c0_35 = arith.constant 0 : index
    %28 = vector.load %arg1[%c3_32, %c0_33, %c1_34, %c0_35] : memref<4x9x9x4xf32, #tpu.memory_space<vmem>>, vector<1x8x8x4xf32>
    %29 = vector.shape_cast %28 : vector<1x8x8x4xf32> to vector<8x8x4xf32>
    %30 = vector.shape_cast %29 : vector<8x8x4xf32> to vector<64x4xf32>
    %c0_36 = arith.constant 0 : index
    %c28 = arith.constant 28 : index
    %31 = vector.load %arg9[%c0_36, %c28] : memref<64x64xf32, #tpu.memory_space<vmem>>, vector<64x4xf32>
    tpu.vector_store %arg9[%c0_36, %c28], %30 {strides = array<i32>} : memref<64x64xf32, #tpu.memory_space<vmem>>, vector<64x4xf32>,
    %c0_37 = arith.constant 0 : index
    %c1_38 = arith.constant 1 : index
    %c0_39 = arith.constant 0 : index
    %c0_40 = arith.constant 0 : index
    %32 = vector.load %arg1[%c0_37, %c1_38, %c0_39, %c0_40] : memref<4x9x9x4xf32, #tpu.memory_space<vmem>>, vector<1x8x8x4xf32>
    %33 = vector.shape_cast %32 : vector<1x8x8x4xf32> to vector<8x8x4xf32>
    %34 = vector.shape_cast %33 : vector<8x8x4xf32> to vector<64x4xf32>
    %c0_41 = arith.constant 0 : index
    %c32 = arith.constant 32 : index
    %35 = vector.load %arg9[%c0_41, %c32] : memref<64x64xf32, #tpu.memory_space<vmem>>, vector<64x4xf32>
    tpu.vector_store %arg9[%c0_41, %c32], %34 {strides = array<i32>} : memref<64x64xf32, #tpu.memory_space<vmem>>, vector<64x4xf32>,
    %c1_42 = arith.constant 1 : index
    %c1_43 = arith.constant 1 : index
    %c0_44 = arith.constant 0 : index
    %c0_45 = arith.constant 0 : index
    %36 = vector.load %arg1[%c1_42, %c1_43, %c0_44, %c0_45] : memref<4x9x9x4xf32, #tpu.memory_space<vmem>>, vector<1x8x8x4xf32>
    %37 = vector.shape_cast %36 : vector<1x8x8x4xf32> to vector<8x8x4xf32>
    %38 = vector.shape_cast %37 : vector<8x8x4xf32> to vector<64x4xf32>
    %c0_46 = arith.constant 0 : index
    %c36 = arith.constant 36 : index
    %39 = vector.load %arg9[%c0_46, %c36] : memref<64x64xf32, #tpu.memory_space<vmem>>, vector<64x4xf32>
    tpu.vector_store %arg9[%c0_46, %c36], %38 {strides = array<i32>} : memref<64x64xf32, #tpu.memory_space<vmem>>, vector<64x4xf32>,
    %c0_47 = arith.constant 0 : index
    %c1_48 = arith.constant 1 : index
    %c1_49 = arith.constant 1 : index
    %c0_50 = arith.constant 0 : index
    %40 = vector.load %arg1[%c0_47, %c1_48, %c1_49, %c0_50] : memref<4x9x9x4xf32, #tpu.memory_space<vmem>>, vector<1x8x8x4xf32>
    %41 = vector.shape_cast %40 : vector<1x8x8x4xf32> to vector<8x8x4xf32>
    %42 = vector.shape_cast %41 : vector<8x8x4xf32> to vector<64x4xf32>
    %c0_51 = arith.constant 0 : index
    %c40 = arith.constant 40 : index
    %43 = vector.load %arg9[%c0_51, %c40] : memref<64x64xf32, #tpu.memory_space<vmem>>, vector<64x4xf32>
    tpu.vector_store %arg9[%c0_51, %c40], %42 {strides = array<i32>} : memref<64x64xf32, #tpu.memory_space<vmem>>, vector<64x4xf32>,
    %c1_52 = arith.constant 1 : index
    %c1_53 = arith.constant 1 : index
    %c1_54 = arith.constant 1 : index
    %c0_55 = arith.constant 0 : index
    %44 = vector.load %arg1[%c1_52, %c1_53, %c1_54, %c0_55] : memref<4x9x9x4xf32, #tpu.memory_space<vmem>>, vector<1x8x8x4xf32>
    %45 = vector.shape_cast %44 : vector<1x8x8x4xf32> to vector<8x8x4xf32>
    %46 = vector.shape_cast %45 : vector<8x8x4xf32> to vector<64x4xf32>
    %c0_56 = arith.constant 0 : index
    %c44 = arith.constant 44 : index
    %47 = vector.load %arg9[%c0_56, %c44] : memref<64x64xf32, #tpu.memory_space<vmem>>, vector<64x4xf32>
    tpu.vector_store %arg9[%c0_56, %c44], %46 {strides = array<i32>} : memref<64x64xf32, #tpu.memory_space<vmem>>, vector<64x4xf32>,
    %c2_57 = arith.constant 2 : index
    %c1_58 = arith.constant 1 : index
    %c0_59 = arith.constant 0 : index
    %c0_60 = arith.constant 0 : index
    %48 = vector.load %arg1[%c2_57, %c1_58, %c0_59, %c0_60] : memref<4x9x9x4xf32, #tpu.memory_space<vmem>>, vector<1x8x8x4xf32>
    %49 = vector.shape_cast %48 : vector<1x8x8x4xf32> to vector<8x8x4xf32>
    %50 = vector.shape_cast %49 : vector<8x8x4xf32> to vector<64x4xf32>
    %c0_61 = arith.constant 0 : index
    %c48 = arith.constant 48 : index
    %51 = vector.load %arg9[%c0_61, %c48] : memref<64x64xf32, #tpu.memory_space<vmem>>, vector<64x4xf32>
    tpu.vector_store %arg9[%c0_61, %c48], %50 {strides = array<i32>} : memref<64x64xf32, #tpu.memory_space<vmem>>, vector<64x4xf32>,
    %c3_62 = arith.constant 3 : index
    %c1_63 = arith.constant 1 : index
    %c0_64 = arith.constant 0 : index
    %c0_65 = arith.constant 0 : index
    %52 = vector.load %arg1[%c3_62, %c1_63, %c0_64, %c0_65] : memref<4x9x9x4xf32, #tpu.memory_space<vmem>>, vector<1x8x8x4xf32>
    %53 = vector.shape_cast %52 : vector<1x8x8x4xf32> to vector<8x8x4xf32>
    %54 = vector.shape_cast %53 : vector<8x8x4xf32> to vector<64x4xf32>
    %c0_66 = arith.constant 0 : index
    %c52 = arith.constant 52 : index
    %55 = vector.load %arg9[%c0_66, %c52] : memref<64x64xf32, #tpu.memory_space<vmem>>, vector<64x4xf32>
    tpu.vector_store %arg9[%c0_66, %c52], %54 {strides = array<i32>} : memref<64x64xf32, #tpu.memory_space<vmem>>, vector<64x4xf32>,
    %c2_67 = arith.constant 2 : index
    %c1_68 = arith.constant 1 : index
    %c1_69 = arith.constant 1 : index
    %c0_70 = arith.constant 0 : index
    %56 = vector.load %arg1[%c2_67, %c1_68, %c1_69, %c0_70] : memref<4x9x9x4xf32, #tpu.memory_space<vmem>>, vector<1x8x8x4xf32>
    %57 = vector.shape_cast %56 : vector<1x8x8x4xf32> to vector<8x8x4xf32>
    %58 = vector.shape_cast %57 : vector<8x8x4xf32> to vector<64x4xf32>
    %c0_71 = arith.constant 0 : index
    %c56 = arith.constant 56 : index
    %59 = vector.load %arg9[%c0_71, %c56] : memref<64x64xf32, #tpu.memory_space<vmem>>, vector<64x4xf32>
    tpu.vector_store %arg9[%c0_71, %c56], %58 {strides = array<i32>} : memref<64x64xf32, #tpu.memory_space<vmem>>, vector<64x4xf32>,
    %c3_72 = arith.constant 3 : index
    %c1_73 = arith.constant 1 : index
    %c1_74 = arith.constant 1 : index
    %c0_75 = arith.constant 0 : index
    %60 = vector.load %arg1[%c3_72, %c1_73, %c1_74, %c0_75] : memref<4x9x9x4xf32, #tpu.memory_space<vmem>>, vector<1x8x8x4xf32>
    %61 = vector.shape_cast %60 : vector<1x8x8x4xf32> to vector<8x8x4xf32>
    %62 = vector.shape_cast %61 : vector<8x8x4xf32> to vector<64x4xf32>
    %c0_76 = arith.constant 0 : index
    %c60 = arith.constant 60 : index
    %63 = vector.load %arg9[%c0_76, %c60] : memref<64x64xf32, #tpu.memory_space<vmem>>, vector<64x4xf32>
    tpu.vector_store %arg9[%c0_76, %c60], %62 {strides = array<i32>} : memref<64x64xf32, #tpu.memory_space<vmem>>, vector<64x4xf32>,
    %c0_77 = arith.constant 0 : index
    %c0_78 = arith.constant 0 : index
    %64 = vector.load %arg9[%c0_77, %c0_78] : memref<64x64xf32, #tpu.memory_space<vmem>>, vector<64x64xf32>
    %c0_79 = arith.constant 0 : index
    %c0_80 = arith.constant 0 : index
    %65 = vector.load %arg2[%c0_79, %c0_80] : memref<64x4xf32, #tpu.memory_space<vmem>>, vector<64x4xf32>
    %cst = arith.constant dense<0.000000e+00> : vector<64x4xf32>
    %66 = tpu.matmul %64, %65, %cst {dimension_numbers = #tpu.dot_dimension_numbers<[1], [0], [0], [1], [0, 0, 1, 1], [], []>} : vector<64x64xf32>, vector<64x4xf32>, vector<64x4xf32> -> vector<64x4xf32>
    %c0_81 = arith.constant 0 : index
    %c0_82 = arith.constant 0 : index
    %67 = vector.load %arg3[%c0_81, %c0_82] : memref<1x4xf32, #tpu.memory_space<vmem>>, vector<1x4xf32>
    %68 = vector.broadcast %67 : vector<1x4xf32> to vector<64x4xf32>
    %69 = arith.addf %66, %68 : vector<64x4xf32>
    %cst_83 = arith.constant 0.000000e+00 : f32
    %70 = vector.broadcast %cst_83 : f32 to vector<1x10x4xf32>
    %cst_84 = arith.constant 0.000000e+00 : f32
    %71 = vector.broadcast %cst_84 : f32 to vector<10x1x4xf32>
    %c0_85 = arith.constant 0 : index
    %c0_86 = arith.constant 0 : index
    %c0_87 = arith.constant 0 : index
    %72 = vector.load %arg10[%c0_85, %c0_86, %c0_87] : memref<10x10x4xf32, #tpu.memory_space<vmem>>, vector<1x10x4xf32>
    tpu.vector_store %arg10[%c0_85, %c0_86, %c0_87], %70 {strides = array<i32>} : memref<10x10x4xf32, #tpu.memory_space<vmem>>, vector<1x10x4xf32>,
    %c9 = arith.constant 9 : index
    %c0_88 = arith.constant 0 : index
    %c0_89 = arith.constant 0 : index
    %73 = vector.load %arg10[%c9, %c0_88, %c0_89] : memref<10x10x4xf32, #tpu.memory_space<vmem>>, vector<1x10x4xf32>
    tpu.vector_store %arg10[%c9, %c0_88, %c0_89], %70 {strides = array<i32>} : memref<10x10x4xf32, #tpu.memory_space<vmem>>, vector<1x10x4xf32>,
    %c0_90 = arith.constant 0 : index
    %c0_91 = arith.constant 0 : index
    %c0_92 = arith.constant 0 : index
    %74 = vector.load %arg10[%c0_90, %c0_91, %c0_92] : memref<10x10x4xf32, #tpu.memory_space<vmem>>, vector<10x1x4xf32>
    tpu.vector_store %arg10[%c0_90, %c0_91, %c0_92], %71 {strides = array<i32>} : memref<10x10x4xf32, #tpu.memory_space<vmem>>, vector<10x1x4xf32>,
    %c0_93 = arith.constant 0 : index
    %c9_94 = arith.constant 9 : index
    %c0_95 = arith.constant 0 : index
    %75 = vector.load %arg10[%c0_93, %c9_94, %c0_95] : memref<10x10x4xf32, #tpu.memory_space<vmem>>, vector<10x1x4xf32>
    tpu.vector_store %arg10[%c0_93, %c9_94, %c0_95], %71 {strides = array<i32>} : memref<10x10x4xf32, #tpu.memory_space<vmem>>, vector<10x1x4xf32>,
    %76 = vector.shape_cast %69 : vector<64x4xf32> to vector<8x8x4xf32>
    %c1_96 = arith.constant 1 : index
    %c1_97 = arith.constant 1 : index
    %c0_98 = arith.constant 0 : index
    %77 = vector.load %arg10[%c1_96, %c1_97, %c0_98] : memref<10x10x4xf32, #tpu.memory_space<vmem>>, vector<8x8x4xf32>
    tpu.vector_store %arg10[%c1_96, %c1_97, %c0_98], %76 {strides = array<i32>} : memref<10x10x4xf32, #tpu.memory_space<vmem>>, vector<8x8x4xf32>,
    %c0_99 = arith.constant 0 : index
    %c0_100 = arith.constant 0 : index
    %c0_101 = arith.constant 0 : index
    %78 = vector.load %arg10[%c0_99, %c0_100, %c0_101] : memref<10x10x4xf32, #tpu.memory_space<vmem>>, vector<8x8x4xf32>
    %79 = vector.shape_cast %78 : vector<8x8x4xf32> to vector<64x4xf32>
    %c0_102 = arith.constant 0 : index
    %c0_103 = arith.constant 0 : index
    %80 = vector.load %arg9[%c0_102, %c0_103] : memref<64x64xf32, #tpu.memory_space<vmem>>, vector<64x4xf32>
    tpu.vector_store %arg9[%c0_102, %c0_103], %79 {strides = array<i32>} : memref<64x64xf32, #tpu.memory_space<vmem>>, vector<64x4xf32>,
    %c0_104 = arith.constant 0 : index
    %c1_105 = arith.constant 1 : index
    %c0_106 = arith.constant 0 : index
    %81 = vector.load %arg10[%c0_104, %c1_105, %c0_106] : memref<10x10x4xf32, #tpu.memory_space<vmem>>, vector<8x8x4xf32>
    %82 = vector.shape_cast %81 : vector<8x8x4xf32> to vector<64x4xf32>
    %c0_107 = arith.constant 0 : index
    %c4_108 = arith.constant 4 : index
    %83 = vector.load %arg9[%c0_107, %c4_108] : memref<64x64xf32, #tpu.memory_space<vmem>>, vector<64x4xf32>
    tpu.vector_store %arg9[%c0_107, %c4_108], %82 {strides = array<i32>} : memref<64x64xf32, #tpu.memory_space<vmem>>, vector<64x4xf32>,
    %c0_109 = arith.constant 0 : index
    %c2_110 = arith.constant 2 : index
    %c0_111 = arith.constant 0 : index
    %84 = vector.load %arg10[%c0_109, %c2_110, %c0_111] : memref<10x10x4xf32, #tpu.memory_space<vmem>>, vector<8x8x4xf32>
    %85 = vector.shape_cast %84 : vector<8x8x4xf32> to vector<64x4xf32>
    %c0_112 = arith.constant 0 : index
    %c8_113 = arith.constant 8 : index
    %86 = vector.load %arg9[%c0_112, %c8_113] : memref<64x64xf32, #tpu.memory_space<vmem>>, vector<64x4xf32>
    tpu.vector_store %arg9[%c0_112, %c8_113], %85 {strides = array<i32>} : memref<64x64xf32, #tpu.memory_space<vmem>>, vector<64x4xf32>,
    %c1_114 = arith.constant 1 : index
    %c0_115 = arith.constant 0 : index
    %c0_116 = arith.constant 0 : index
    %87 = vector.load %arg10[%c1_114, %c0_115, %c0_116] : memref<10x10x4xf32, #tpu.memory_space<vmem>>, vector<8x8x4xf32>
    %88 = vector.shape_cast %87 : vector<8x8x4xf32> to vector<64x4xf32>
    %c0_117 = arith.constant 0 : index
    %c12_118 = arith.constant 12 : index
    %89 = vector.load %arg9[%c0_117, %c12_118] : memref<64x64xf32, #tpu.memory_space<vmem>>, vector<64x4xf32>
    tpu.vector_store %arg9[%c0_117, %c12_118], %88 {strides = array<i32>} : memref<64x64xf32, #tpu.memory_space<vmem>>, vector<64x4xf32>,
    %c1_119 = arith.constant 1 : index
    %c1_120 = arith.constant 1 : index
    %c0_121 = arith.constant 0 : index
    %90 = vector.load %arg10[%c1_119, %c1_120, %c0_121] : memref<10x10x4xf32, #tpu.memory_space<vmem>>, vector<8x8x4xf32>
    %91 = vector.shape_cast %90 : vector<8x8x4xf32> to vector<64x4xf32>
    %c0_122 = arith.constant 0 : index
    %c16_123 = arith.constant 16 : index
    %92 = vector.load %arg9[%c0_122, %c16_123] : memref<64x64xf32, #tpu.memory_space<vmem>>, vector<64x4xf32>
    tpu.vector_store %arg9[%c0_122, %c16_123], %91 {strides = array<i32>} : memref<64x64xf32, #tpu.memory_space<vmem>>, vector<64x4xf32>,
    %c1_124 = arith.constant 1 : index
    %c2_125 = arith.constant 2 : index
    %c0_126 = arith.constant 0 : index
    %93 = vector.load %arg10[%c1_124, %c2_125, %c0_126] : memref<10x10x4xf32, #tpu.memory_space<vmem>>, vector<8x8x4xf32>
    %94 = vector.shape_cast %93 : vector<8x8x4xf32> to vector<64x4xf32>
    %c0_127 = arith.constant 0 : index
    %c20_128 = arith.constant 20 : index
    %95 = vector.load %arg9[%c0_127, %c20_128] : memref<64x64xf32, #tpu.memory_space<vmem>>, vector<64x4xf32>
    tpu.vector_store %arg9[%c0_127, %c20_128], %94 {strides = array<i32>} : memref<64x64xf32, #tpu.memory_space<vmem>>, vector<64x4xf32>,
    %c2_129 = arith.constant 2 : index
    %c0_130 = arith.constant 0 : index
    %c0_131 = arith.constant 0 : index
    %96 = vector.load %arg10[%c2_129, %c0_130, %c0_131] : memref<10x10x4xf32, #tpu.memory_space<vmem>>, vector<8x8x4xf32>
    %97 = vector.shape_cast %96 : vector<8x8x4xf32> to vector<64x4xf32>
    %c0_132 = arith.constant 0 : index
    %c24_133 = arith.constant 24 : index
    %98 = vector.load %arg9[%c0_132, %c24_133] : memref<64x64xf32, #tpu.memory_space<vmem>>, vector<64x4xf32>
    tpu.vector_store %arg9[%c0_132, %c24_133], %97 {strides = array<i32>} : memref<64x64xf32, #tpu.memory_space<vmem>>, vector<64x4xf32>,
    %c2_134 = arith.constant 2 : index
    %c1_135 = arith.constant 1 : index
    %c0_136 = arith.constant 0 : index
    %99 = vector.load %arg10[%c2_134, %c1_135, %c0_136] : memref<10x10x4xf32, #tpu.memory_space<vmem>>, vector<8x8x4xf32>
    %100 = vector.shape_cast %99 : vector<8x8x4xf32> to vector<64x4xf32>
    %c0_137 = arith.constant 0 : index
    %c28_138 = arith.constant 28 : index
    %101 = vector.load %arg9[%c0_137, %c28_138] : memref<64x64xf32, #tpu.memory_space<vmem>>, vector<64x4xf32>
    tpu.vector_store %arg9[%c0_137, %c28_138], %100 {strides = array<i32>} : memref<64x64xf32, #tpu.memory_space<vmem>>, vector<64x4xf32>,
    %c2_139 = arith.constant 2 : index
    %c2_140 = arith.constant 2 : index
    %c0_141 = arith.constant 0 : index
    %102 = vector.load %arg10[%c2_139, %c2_140, %c0_141] : memref<10x10x4xf32, #tpu.memory_space<vmem>>, vector<8x8x4xf32>
    %103 = vector.shape_cast %102 : vector<8x8x4xf32> to vector<64x4xf32>
    %c0_142 = arith.constant 0 : index
    %c32_143 = arith.constant 32 : index
    %104 = vector.load %arg9[%c0_142, %c32_143] : memref<64x64xf32, #tpu.memory_space<vmem>>, vector<64x4xf32>
    tpu.vector_store %arg9[%c0_142, %c32_143], %103 {strides = array<i32>} : memref<64x64xf32, #tpu.memory_space<vmem>>, vector<64x4xf32>,
    %c0_144 = arith.constant 0 : index
    %c0_145 = arith.constant 0 : index
    %105 = vector.load %arg9[%c0_144, %c0_145] : memref<64x64xf32, #tpu.memory_space<vmem>>, vector<64x36xf32>
    %c0_146 = arith.constant 0 : index
    %c0_147 = arith.constant 0 : index
    %106 = vector.load %arg4[%c0_146, %c0_147] : memref<36x16xf32, #tpu.memory_space<vmem>>, vector<36x16xf32>
    %cst_148 = arith.constant dense<0.000000e+00> : vector<64x16xf32>
    %107 = tpu.matmul %105, %106, %cst_148 {dimension_numbers = #tpu.dot_dimension_numbers<[1], [0], [0], [1], [0, 0, 1, 1], [], []>} : vector<64x36xf32>, vector<36x16xf32>, vector<64x16xf32> -> vector<64x16xf32>
    %c0_149 = arith.constant 0 : index
    %c0_150 = arith.constant 0 : index
    %108 = vector.load %arg5[%c0_149, %c0_150] : memref<1x16xf32, #tpu.memory_space<vmem>>, vector<1x16xf32>
    %109 = vector.broadcast %108 : vector<1x16xf32> to vector<64x16xf32>
    %110 = arith.addf %107, %109 : vector<64x16xf32>
    %cst_151 = arith.constant 0.000000e+00 : f32
    %111 = vector.broadcast %cst_151 : f32 to vector<1x9x4xf32>
    %c0_152 = arith.constant 0 : index
    %c0_153 = arith.constant 0 : index
    %c0_154 = arith.constant 0 : index
    %112 = vector.load %arg11[%c0_152, %c0_153, %c0_154] : memref<9x9x4xf32, #tpu.memory_space<vmem>>, vector<1x9x4xf32>
    tpu.vector_store %arg11[%c0_152, %c0_153, %c0_154], %111 {strides = array<i32>} : memref<9x9x4xf32, #tpu.memory_space<vmem>>, vector<1x9x4xf32>,
    %cst_155 = arith.constant 0.000000e+00 : f32
    %113 = vector.broadcast %cst_155 : f32 to vector<9x1x4xf32>
    %c0_156 = arith.constant 0 : index
    %c0_157 = arith.constant 0 : index
    %c0_158 = arith.constant 0 : index
    %114 = vector.load %arg11[%c0_156, %c0_157, %c0_158] : memref<9x9x4xf32, #tpu.memory_space<vmem>>, vector<9x1x4xf32>
    tpu.vector_store %arg11[%c0_156, %c0_157, %c0_158], %113 {strides = array<i32>} : memref<9x9x4xf32, #tpu.memory_space<vmem>>, vector<9x1x4xf32>,
    %115 = vector.extract_strided_slice %110 {offsets = [0, 12], sizes = [64, 4], strides = [1, 1]} : vector<64x16xf32> to vector<64x4xf32>
    %c0_159 = arith.constant 0 : index
    %c1_160 = arith.constant 1 : index
    %c1_161 = arith.constant 1 : index
    %c0_162 = arith.constant 0 : index
    %116 = vector.load %arg1[%c0_159, %c1_160, %c1_161, %c0_162] : memref<4x9x9x4xf32, #tpu.memory_space<vmem>>, vector<1x8x8x4xf32>
    %117 = vector.shape_cast %116 : vector<1x8x8x4xf32> to vector<8x8x4xf32>
    %118 = vector.shape_cast %117 : vector<8x8x4xf32> to vector<64x4xf32>
    %119 = arith.subf %115, %118 : vector<64x4xf32>
    %120 = vector.shape_cast %119 : vector<64x4xf32> to vector<8x8x4xf32>
    %c1_163 = arith.constant 1 : index
    %c1_164 = arith.constant 1 : index
    %c0_165 = arith.constant 0 : index
    %121 = vector.load %arg11[%c1_163, %c1_164, %c0_165] : memref<9x9x4xf32, #tpu.memory_space<vmem>>, vector<8x8x4xf32>
    tpu.vector_store %arg11[%c1_163, %c1_164, %c0_165], %120 {strides = array<i32>} : memref<9x9x4xf32, #tpu.memory_space<vmem>>, vector<8x8x4xf32>,
    %cst_166 = arith.constant 0.000000e+00 : f32
    %122 = vector.broadcast %cst_166 : f32 to vector<1x9x4xf32>
    %c0_167 = arith.constant 0 : index
    %c0_168 = arith.constant 0 : index
    %c0_169 = arith.constant 0 : index
    %123 = vector.load %arg12[%c0_167, %c0_168, %c0_169] : memref<9x9x4xf32, #tpu.memory_space<vmem>>, vector<1x9x4xf32>
    tpu.vector_store %arg12[%c0_167, %c0_168, %c0_169], %122 {strides = array<i32>} : memref<9x9x4xf32, #tpu.memory_space<vmem>>, vector<1x9x4xf32>,
    %cst_170 = arith.constant 0.000000e+00 : f32
    %124 = vector.broadcast %cst_170 : f32 to vector<9x1x4xf32>
    %c0_171 = arith.constant 0 : index
    %c8_172 = arith.constant 8 : index
    %c0_173 = arith.constant 0 : index
    %125 = vector.load %arg12[%c0_171, %c8_172, %c0_173] : memref<9x9x4xf32, #tpu.memory_space<vmem>>, vector<9x1x4xf32>
    tpu.vector_store %arg12[%c0_171, %c8_172, %c0_173], %124 {strides = array<i32>} : memref<9x9x4xf32, #tpu.memory_space<vmem>>, vector<9x1x4xf32>,
    %126 = vector.extract_strided_slice %110 {offsets = [0, 8], sizes = [64, 4], strides = [1, 1]} : vector<64x16xf32> to vector<64x4xf32>
    %c1_174 = arith.constant 1 : index
    %c1_175 = arith.constant 1 : index
    %c0_176 = arith.constant 0 : index
    %c0_177 = arith.constant 0 : index
    %127 = vector.load %arg1[%c1_174, %c1_175, %c0_176, %c0_177] : memref<4x9x9x4xf32, #tpu.memory_space<vmem>>, vector<1x8x8x4xf32>
    %128 = vector.shape_cast %127 : vector<1x8x8x4xf32> to vector<8x8x4xf32>
    %129 = vector.shape_cast %128 : vector<8x8x4xf32> to vector<64x4xf32>
    %130 = arith.subf %126, %129 : vector<64x4xf32>
    %131 = vector.shape_cast %130 : vector<64x4xf32> to vector<8x8x4xf32>
    %c1_178 = arith.constant 1 : index
    %c0_179 = arith.constant 0 : index
    %c0_180 = arith.constant 0 : index
    %132 = vector.load %arg12[%c1_178, %c0_179, %c0_180] : memref<9x9x4xf32, #tpu.memory_space<vmem>>, vector<8x8x4xf32>
    tpu.vector_store %arg12[%c1_178, %c0_179, %c0_180], %131 {strides = array<i32>} : memref<9x9x4xf32, #tpu.memory_space<vmem>>, vector<8x8x4xf32>,
    %cst_181 = arith.constant 0.000000e+00 : f32
    %133 = vector.broadcast %cst_181 : f32 to vector<1x9x4xf32>
    %c8_182 = arith.constant 8 : index
    %c0_183 = arith.constant 0 : index
    %c0_184 = arith.constant 0 : index
    %134 = vector.load %arg13[%c8_182, %c0_183, %c0_184] : memref<9x9x4xf32, #tpu.memory_space<vmem>>, vector<1x9x4xf32>
    tpu.vector_store %arg13[%c8_182, %c0_183, %c0_184], %133 {strides = array<i32>} : memref<9x9x4xf32, #tpu.memory_space<vmem>>, vector<1x9x4xf32>,
    %cst_185 = arith.constant 0.000000e+00 : f32
    %135 = vector.broadcast %cst_185 : f32 to vector<9x1x4xf32>
    %c0_186 = arith.constant 0 : index
    %c0_187 = arith.constant 0 : index
    %c0_188 = arith.constant 0 : index
    %136 = vector.load %arg13[%c0_186, %c0_187, %c0_188] : memref<9x9x4xf32, #tpu.memory_space<vmem>>, vector<9x1x4xf32>
    tpu.vector_store %arg13[%c0_186, %c0_187, %c0_188], %135 {strides = array<i32>} : memref<9x9x4xf32, #tpu.memory_space<vmem>>, vector<9x1x4xf32>,
    %137 = vector.extract_strided_slice %110 {offsets = [0, 4], sizes = [64, 4], strides = [1, 1]} : vector<64x16xf32> to vector<64x4xf32>
    %c2_189 = arith.constant 2 : index
    %c0_190 = arith.constant 0 : index
    %c1_191 = arith.constant 1 : index
    %c0_192 = arith.constant 0 : index
    %138 = vector.load %arg1[%c2_189, %c0_190, %c1_191, %c0_192] : memref<4x9x9x4xf32, #tpu.memory_space<vmem>>, vector<1x8x8x4xf32>
    %139 = vector.shape_cast %138 : vector<1x8x8x4xf32> to vector<8x8x4xf32>
    %140 = vector.shape_cast %139 : vector<8x8x4xf32> to vector<64x4xf32>
    %141 = arith.subf %137, %140 : vector<64x4xf32>
    %142 = vector.shape_cast %141 : vector<64x4xf32> to vector<8x8x4xf32>
    %c0_193 = arith.constant 0 : index
    %c1_194 = arith.constant 1 : index
    %c0_195 = arith.constant 0 : index
    %143 = vector.load %arg13[%c0_193, %c1_194, %c0_195] : memref<9x9x4xf32, #tpu.memory_space<vmem>>, vector<8x8x4xf32>
    tpu.vector_store %arg13[%c0_193, %c1_194, %c0_195], %142 {strides = array<i32>} : memref<9x9x4xf32, #tpu.memory_space<vmem>>, vector<8x8x4xf32>,
    %cst_196 = arith.constant 0.000000e+00 : f32
    %144 = vector.broadcast %cst_196 : f32 to vector<1x9x4xf32>
    %c8_197 = arith.constant 8 : index
    %c0_198 = arith.constant 0 : index
    %c0_199 = arith.constant 0 : index
    %145 = vector.load %arg14[%c8_197, %c0_198, %c0_199] : memref<9x9x4xf32, #tpu.memory_space<vmem>>, vector<1x9x4xf32>
    tpu.vector_store %arg14[%c8_197, %c0_198, %c0_199], %144 {strides = array<i32>} : memref<9x9x4xf32, #tpu.memory_space<vmem>>, vector<1x9x4xf32>,
    %cst_200 = arith.constant 0.000000e+00 : f32
    %146 = vector.broadcast %cst_200 : f32 to vector<9x1x4xf32>
    %c0_201 = arith.constant 0 : index
    %c8_202 = arith.constant 8 : index
    %c0_203 = arith.constant 0 : index
    %147 = vector.load %arg14[%c0_201, %c8_202, %c0_203] : memref<9x9x4xf32, #tpu.memory_space<vmem>>, vector<9x1x4xf32>
    tpu.vector_store %arg14[%c0_201, %c8_202, %c0_203], %146 {strides = array<i32>} : memref<9x9x4xf32, #tpu.memory_space<vmem>>, vector<9x1x4xf32>,
    %148 = vector.extract_strided_slice %110 {offsets = [0, 0], sizes = [64, 4], strides = [1, 1]} : vector<64x16xf32> to vector<64x4xf32>
    %c3_204 = arith.constant 3 : index
    %c0_205 = arith.constant 0 : index
    %c0_206 = arith.constant 0 : index
    %c0_207 = arith.constant 0 : index
    %149 = vector.load %arg1[%c3_204, %c0_205, %c0_206, %c0_207] : memref<4x9x9x4xf32, #tpu.memory_space<vmem>>, vector<1x8x8x4xf32>
    %150 = vector.shape_cast %149 : vector<1x8x8x4xf32> to vector<8x8x4xf32>
    %151 = vector.shape_cast %150 : vector<8x8x4xf32> to vector<64x4xf32>
    %152 = arith.subf %148, %151 : vector<64x4xf32>
    %153 = vector.shape_cast %152 : vector<64x4xf32> to vector<8x8x4xf32>
    %c0_208 = arith.constant 0 : index
    %c0_209 = arith.constant 0 : index
    %c0_210 = arith.constant 0 : index
    %154 = vector.load %arg14[%c0_208, %c0_209, %c0_210] : memref<9x9x4xf32, #tpu.memory_space<vmem>>, vector<8x8x4xf32>
    tpu.vector_store %arg14[%c0_208, %c0_209, %c0_210], %153 {strides = array<i32>} : memref<9x9x4xf32, #tpu.memory_space<vmem>>, vector<8x8x4xf32>,
    %c0_211 = arith.constant 0 : index
    %c0_212 = arith.constant 0 : index
    %c0_213 = arith.constant 0 : index
    %155 = vector.load %arg11[%c0_211, %c0_212, %c0_213] : memref<9x9x4xf32, #tpu.memory_space<vmem>>, vector<8x8x4xf32>
    %156 = vector.shape_cast %155 : vector<8x8x4xf32> to vector<64x4xf32>
    %c0_214 = arith.constant 0 : index
    %c0_215 = arith.constant 0 : index
    %157 = vector.load %arg9[%c0_214, %c0_215] : memref<64x64xf32, #tpu.memory_space<vmem>>, vector<64x4xf32>
    tpu.vector_store %arg9[%c0_214, %c0_215], %156 {strides = array<i32>} : memref<64x64xf32, #tpu.memory_space<vmem>>, vector<64x4xf32>,
    %c0_216 = arith.constant 0 : index
    %c0_217 = arith.constant 0 : index
    %c0_218 = arith.constant 0 : index
    %158 = vector.load %arg12[%c0_216, %c0_217, %c0_218] : memref<9x9x4xf32, #tpu.memory_space<vmem>>, vector<8x8x4xf32>
    %159 = vector.shape_cast %158 : vector<8x8x4xf32> to vector<64x4xf32>
    %c0_219 = arith.constant 0 : index
    %c4_220 = arith.constant 4 : index
    %160 = vector.load %arg9[%c0_219, %c4_220] : memref<64x64xf32, #tpu.memory_space<vmem>>, vector<64x4xf32>
    tpu.vector_store %arg9[%c0_219, %c4_220], %159 {strides = array<i32>} : memref<64x64xf32, #tpu.memory_space<vmem>>, vector<64x4xf32>,
    %c0_221 = arith.constant 0 : index
    %c1_222 = arith.constant 1 : index
    %c0_223 = arith.constant 0 : index
    %161 = vector.load %arg11[%c0_221, %c1_222, %c0_223] : memref<9x9x4xf32, #tpu.memory_space<vmem>>, vector<8x8x4xf32>
    %162 = vector.shape_cast %161 : vector<8x8x4xf32> to vector<64x4xf32>
    %c0_224 = arith.constant 0 : index
    %c8_225 = arith.constant 8 : index
    %163 = vector.load %arg9[%c0_224, %c8_225] : memref<64x64xf32, #tpu.memory_space<vmem>>, vector<64x4xf32>
    tpu.vector_store %arg9[%c0_224, %c8_225], %162 {strides = array<i32>} : memref<64x64xf32, #tpu.memory_space<vmem>>, vector<64x4xf32>,
    %c0_226 = arith.constant 0 : index
    %c1_227 = arith.constant 1 : index
    %c0_228 = arith.constant 0 : index
    %164 = vector.load %arg12[%c0_226, %c1_227, %c0_228] : memref<9x9x4xf32, #tpu.memory_space<vmem>>, vector<8x8x4xf32>
    %165 = vector.shape_cast %164 : vector<8x8x4xf32> to vector<64x4xf32>
    %c0_229 = arith.constant 0 : index
    %c12_230 = arith.constant 12 : index
    %166 = vector.load %arg9[%c0_229, %c12_230] : memref<64x64xf32, #tpu.memory_space<vmem>>, vector<64x4xf32>
    tpu.vector_store %arg9[%c0_229, %c12_230], %165 {strides = array<i32>} : memref<64x64xf32, #tpu.memory_space<vmem>>, vector<64x4xf32>,
    %c0_231 = arith.constant 0 : index
    %c0_232 = arith.constant 0 : index
    %c0_233 = arith.constant 0 : index
    %167 = vector.load %arg13[%c0_231, %c0_232, %c0_233] : memref<9x9x4xf32, #tpu.memory_space<vmem>>, vector<8x8x4xf32>
    %168 = vector.shape_cast %167 : vector<8x8x4xf32> to vector<64x4xf32>
    %c0_234 = arith.constant 0 : index
    %c16_235 = arith.constant 16 : index
    %169 = vector.load %arg9[%c0_234, %c16_235] : memref<64x64xf32, #tpu.memory_space<vmem>>, vector<64x4xf32>
    tpu.vector_store %arg9[%c0_234, %c16_235], %168 {strides = array<i32>} : memref<64x64xf32, #tpu.memory_space<vmem>>, vector<64x4xf32>,
    %c0_236 = arith.constant 0 : index
    %c0_237 = arith.constant 0 : index
    %c0_238 = arith.constant 0 : index
    %170 = vector.load %arg14[%c0_236, %c0_237, %c0_238] : memref<9x9x4xf32, #tpu.memory_space<vmem>>, vector<8x8x4xf32>
    %171 = vector.shape_cast %170 : vector<8x8x4xf32> to vector<64x4xf32>
    %c0_239 = arith.constant 0 : index
    %c20_240 = arith.constant 20 : index
    %172 = vector.load %arg9[%c0_239, %c20_240] : memref<64x64xf32, #tpu.memory_space<vmem>>, vector<64x4xf32>
    tpu.vector_store %arg9[%c0_239, %c20_240], %171 {strides = array<i32>} : memref<64x64xf32, #tpu.memory_space<vmem>>, vector<64x4xf32>,
    %c0_241 = arith.constant 0 : index
    %c1_242 = arith.constant 1 : index
    %c0_243 = arith.constant 0 : index
    %173 = vector.load %arg13[%c0_241, %c1_242, %c0_243] : memref<9x9x4xf32, #tpu.memory_space<vmem>>, vector<8x8x4xf32>
    %174 = vector.shape_cast %173 : vector<8x8x4xf32> to vector<64x4xf32>
    %c0_244 = arith.constant 0 : index
    %c24_245 = arith.constant 24 : index
    %175 = vector.load %arg9[%c0_244, %c24_245] : memref<64x64xf32, #tpu.memory_space<vmem>>, vector<64x4xf32>
    tpu.vector_store %arg9[%c0_244, %c24_245], %174 {strides = array<i32>} : memref<64x64xf32, #tpu.memory_space<vmem>>, vector<64x4xf32>,
    %c0_246 = arith.constant 0 : index
    %c1_247 = arith.constant 1 : index
    %c0_248 = arith.constant 0 : index
    %176 = vector.load %arg14[%c0_246, %c1_247, %c0_248] : memref<9x9x4xf32, #tpu.memory_space<vmem>>, vector<8x8x4xf32>
    %177 = vector.shape_cast %176 : vector<8x8x4xf32> to vector<64x4xf32>
    %c0_249 = arith.constant 0 : index
    %c28_250 = arith.constant 28 : index
    %178 = vector.load %arg9[%c0_249, %c28_250] : memref<64x64xf32, #tpu.memory_space<vmem>>, vector<64x4xf32>
    tpu.vector_store %arg9[%c0_249, %c28_250], %177 {strides = array<i32>} : memref<64x64xf32, #tpu.memory_space<vmem>>, vector<64x4xf32>,
    %c1_251 = arith.constant 1 : index
    %c0_252 = arith.constant 0 : index
    %c0_253 = arith.constant 0 : index
    %179 = vector.load %arg11[%c1_251, %c0_252, %c0_253] : memref<9x9x4xf32, #tpu.memory_space<vmem>>, vector<8x8x4xf32>
    %180 = vector.shape_cast %179 : vector<8x8x4xf32> to vector<64x4xf32>
    %c0_254 = arith.constant 0 : index
    %c32_255 = arith.constant 32 : index
    %181 = vector.load %arg9[%c0_254, %c32_255] : memref<64x64xf32, #tpu.memory_space<vmem>>, vector<64x4xf32>
    tpu.vector_store %arg9[%c0_254, %c32_255], %180 {strides = array<i32>} : memref<64x64xf32, #tpu.memory_space<vmem>>, vector<64x4xf32>,
    %c1_256 = arith.constant 1 : index
    %c0_257 = arith.constant 0 : index
    %c0_258 = arith.constant 0 : index
    %182 = vector.load %arg12[%c1_256, %c0_257, %c0_258] : memref<9x9x4xf32, #tpu.memory_space<vmem>>, vector<8x8x4xf32>
    %183 = vector.shape_cast %182 : vector<8x8x4xf32> to vector<64x4xf32>
    %c0_259 = arith.constant 0 : index
    %c36_260 = arith.constant 36 : index
    %184 = vector.load %arg9[%c0_259, %c36_260] : memref<64x64xf32, #tpu.memory_space<vmem>>, vector<64x4xf32>
    tpu.vector_store %arg9[%c0_259, %c36_260], %183 {strides = array<i32>} : memref<64x64xf32, #tpu.memory_space<vmem>>, vector<64x4xf32>,
    %c1_261 = arith.constant 1 : index
    %c1_262 = arith.constant 1 : index
    %c0_263 = arith.constant 0 : index
    %185 = vector.load %arg11[%c1_261, %c1_262, %c0_263] : memref<9x9x4xf32, #tpu.memory_space<vmem>>, vector<8x8x4xf32>
    %186 = vector.shape_cast %185 : vector<8x8x4xf32> to vector<64x4xf32>
    %c0_264 = arith.constant 0 : index
    %c40_265 = arith.constant 40 : index
    %187 = vector.load %arg9[%c0_264, %c40_265] : memref<64x64xf32, #tpu.memory_space<vmem>>, vector<64x4xf32>
    tpu.vector_store %arg9[%c0_264, %c40_265], %186 {strides = array<i32>} : memref<64x64xf32, #tpu.memory_space<vmem>>, vector<64x4xf32>,
    %c1_266 = arith.constant 1 : index
    %c1_267 = arith.constant 1 : index
    %c0_268 = arith.constant 0 : index
    %188 = vector.load %arg12[%c1_266, %c1_267, %c0_268] : memref<9x9x4xf32, #tpu.memory_space<vmem>>, vector<8x8x4xf32>
    %189 = vector.shape_cast %188 : vector<8x8x4xf32> to vector<64x4xf32>
    %c0_269 = arith.constant 0 : index
    %c44_270 = arith.constant 44 : index
    %190 = vector.load %arg9[%c0_269, %c44_270] : memref<64x64xf32, #tpu.memory_space<vmem>>, vector<64x4xf32>
    tpu.vector_store %arg9[%c0_269, %c44_270], %189 {strides = array<i32>} : memref<64x64xf32, #tpu.memory_space<vmem>>, vector<64x4xf32>,
    %c1_271 = arith.constant 1 : index
    %c0_272 = arith.constant 0 : index
    %c0_273 = arith.constant 0 : index
    %191 = vector.load %arg13[%c1_271, %c0_272, %c0_273] : memref<9x9x4xf32, #tpu.memory_space<vmem>>, vector<8x8x4xf32>
    %192 = vector.shape_cast %191 : vector<8x8x4xf32> to vector<64x4xf32>
    %c0_274 = arith.constant 0 : index
    %c48_275 = arith.constant 48 : index
    %193 = vector.load %arg9[%c0_274, %c48_275] : memref<64x64xf32, #tpu.memory_space<vmem>>, vector<64x4xf32>
    tpu.vector_store %arg9[%c0_274, %c48_275], %192 {strides = array<i32>} : memref<64x64xf32, #tpu.memory_space<vmem>>, vector<64x4xf32>,
    %c1_276 = arith.constant 1 : index
    %c0_277 = arith.constant 0 : index
    %c0_278 = arith.constant 0 : index
    %194 = vector.load %arg14[%c1_276, %c0_277, %c0_278] : memref<9x9x4xf32, #tpu.memory_space<vmem>>, vector<8x8x4xf32>
    %195 = vector.shape_cast %194 : vector<8x8x4xf32> to vector<64x4xf32>
    %c0_279 = arith.constant 0 : index
    %c52_280 = arith.constant 52 : index
    %196 = vector.load %arg9[%c0_279, %c52_280] : memref<64x64xf32, #tpu.memory_space<vmem>>, vector<64x4xf32>
    tpu.vector_store %arg9[%c0_279, %c52_280], %195 {strides = array<i32>} : memref<64x64xf32, #tpu.memory_space<vmem>>, vector<64x4xf32>,
    %c1_281 = arith.constant 1 : index
    %c1_282 = arith.constant 1 : index
    %c0_283 = arith.constant 0 : index
    %197 = vector.load %arg13[%c1_281, %c1_282, %c0_283] : memref<9x9x4xf32, #tpu.memory_space<vmem>>, vector<8x8x4xf32>
    %198 = vector.shape_cast %197 : vector<8x8x4xf32> to vector<64x4xf32>
    %c0_284 = arith.constant 0 : index
    %c56_285 = arith.constant 56 : index
    %199 = vector.load %arg9[%c0_284, %c56_285] : memref<64x64xf32, #tpu.memory_space<vmem>>, vector<64x4xf32>
    tpu.vector_store %arg9[%c0_284, %c56_285], %198 {strides = array<i32>} : memref<64x64xf32, #tpu.memory_space<vmem>>, vector<64x4xf32>,
    %c1_286 = arith.constant 1 : index
    %c1_287 = arith.constant 1 : index
    %c0_288 = arith.constant 0 : index
    %200 = vector.load %arg14[%c1_286, %c1_287, %c0_288] : memref<9x9x4xf32, #tpu.memory_space<vmem>>, vector<8x8x4xf32>
    %201 = vector.shape_cast %200 : vector<8x8x4xf32> to vector<64x4xf32>
    %c0_289 = arith.constant 0 : index
    %c60_290 = arith.constant 60 : index
    %202 = vector.load %arg9[%c0_289, %c60_290] : memref<64x64xf32, #tpu.memory_space<vmem>>, vector<64x4xf32>
    tpu.vector_store %arg9[%c0_289, %c60_290], %201 {strides = array<i32>} : memref<64x64xf32, #tpu.memory_space<vmem>>, vector<64x4xf32>,
    %c0_291 = arith.constant 0 : index
    %c0_292 = arith.constant 0 : index
    %203 = vector.load %arg9[%c0_291, %c0_292] : memref<64x64xf32, #tpu.memory_space<vmem>>, vector<64x64xf32>
    %c0_293 = arith.constant 0 : index
    %c0_294 = arith.constant 0 : index
    %204 = vector.load %arg6[%c0_293, %c0_294] : memref<64x4xf32, #tpu.memory_space<vmem>>, vector<64x4xf32>
    %cst_295 = arith.constant dense<0.000000e+00> : vector<64x4xf32>
    %205 = tpu.matmul %203, %204, %cst_295 {dimension_numbers = #tpu.dot_dimension_numbers<[1], [0], [0], [1], [0, 0, 1, 1], [], []>} : vector<64x64xf32>, vector<64x4xf32>, vector<64x4xf32> -> vector<64x4xf32>
    %c0_296 = arith.constant 0 : index
    %c0_297 = arith.constant 0 : index
    %206 = vector.load %arg7[%c0_296, %c0_297] : memref<1x4xf32, #tpu.memory_space<vmem>>, vector<1x4xf32>
    %207 = vector.broadcast %206 : vector<1x4xf32> to vector<64x4xf32>
    %208 = arith.addf %205, %207 : vector<64x4xf32>
    %c1_298 = arith.constant 1 : index
    %c1_299 = arith.constant 1 : index
    %c0_300 = arith.constant 0 : index
    %209 = vector.load %arg10[%c1_298, %c1_299, %c0_300] : memref<10x10x4xf32, #tpu.memory_space<vmem>>, vector<8x8x4xf32>
    %210 = vector.shape_cast %209 : vector<8x8x4xf32> to vector<64x4xf32>
    %211 = arith.addf %208, %210 : vector<64x4xf32>
    %c0_301 = arith.constant 0 : index
    %c0_302 = arith.constant 0 : index
    %212 = vector.load %arg8[%c0_301, %c0_302] : memref<64x4xf32, #tpu.memory_space<vmem>>, vector<64x4xf32>
    tpu.vector_store %arg8[%c0_301, %c0_302], %211 {strides = array<i32>} : memref<64x4xf32, #tpu.memory_space<vmem>>, vector<64x4xf32>,
    return
  }
  func.func @transform_0(%arg0: i32) -> (i32, i32, i32, i32) {
    %c0_i32 = arith.constant 0 : i32
    %c0_i32_0 = arith.constant 0 : i32
    %c0_i32_1 = arith.constant 0 : i32
    %c0_i32_2 = arith.constant 0 : i32
    return %arg0, %c0_i32, %c0_i32_0, %c0_i32_1 : i32, i32, i32, i32
  }
  func.func @transform_1(%arg0: i32) -> (i32, i32) {
    %c0_i32 = arith.constant 0 : i32
    %c0_i32_0 = arith.constant 0 : i32
    %c0_i32_1 = arith.constant 0 : i32
    return %c0_i32, %c0_i32_0 : i32, i32
  }
  func.func @transform_2(%arg0: i32) -> (i32, i32) {
    %c0_i32 = arith.constant 0 : i32
    %c0_i32_0 = arith.constant 0 : i32
    %c0_i32_1 = arith.constant 0 : i32
    return %c0_i32, %c0_i32_0 : i32, i32
  }
  func.func @transform_3(%arg0: i32) -> (i32, i32) {
    %c0_i32 = arith.constant 0 : i32
    %c0_i32_0 = arith.constant 0 : i32
    %c0_i32_1 = arith.constant 0 : i32
    return %c0_i32, %c0_i32_0 : i32, i32
  }
  func.func @transform_4(%arg0: i32) -> (i32, i32) {
    %c0_i32 = arith.constant 0 : i32
    %c0_i32_0 = arith.constant 0 : i32
    %c0_i32_1 = arith.constant 0 : i32
    return %c0_i32, %c0_i32_0 : i32, i32
  }
  func.func @transform_5(%arg0: i32) -> (i32, i32) {
    %c0_i32 = arith.constant 0 : i32
    %c0_i32_0 = arith.constant 0 : i32
    %c0_i32_1 = arith.constant 0 : i32
    return %c0_i32, %c0_i32_0 : i32, i32
  }
  func.func @transform_6(%arg0: i32) -> (i32, i32) {
    %c0_i32 = arith.constant 0 : i32
    %c0_i32_0 = arith.constant 0 : i32
    %c0_i32_1 = arith.constant 0 : i32
    return %c0_i32, %c0_i32_0 : i32, i32
  }
  func.func @transform_7(%arg0: i32) -> (i32, i32) {
    %c0_i32 = arith.constant 0 : i32
    %c0_i32_0 = arith.constant 0 : i32
    return %arg0, %c0_i32 : i32, i32
  }
}

</mosaic_0001>

<bundles_post_ra>
// kernel: tile.8
= control target key start
LH: loop header
LB: loop body
LE: loop exit
PB: predicated region body
PF: predicated region fallthrough
CT: control target
= control target key end

     0   :  { %s22_s0 = inlined_call_operand.vmem [shape: f32[4], index: 0, kind: input, shape index: {}]   ;;  %s23_s1 = inlined_call_operand.vmem [shape: f32[4,4], index: 1, kind: output, shape index: {}]  }
   0x1   :  { %v4_v0 = vld [vmem:[%s22_s0] ss:$0 sm:$0xff] }
   0x2   :  { %5 = vst [vmem:[%s23_s1] sm:$0xf] %v4_v0 }

// kernel: tile.9
= control target key start
LH: loop header
LB: loop body
LE: loop exit
PB: predicated region body
PF: predicated region fallthrough
CT: control target
= control target key end

     0   :  { %vm8_vm0 = vcmask 31744   ;;  %s40_s8 = smov 4   ;;  %s41_s9 = smov 8   ;;  %vm14_vm1 = vcmask 130144   ;;  %vm20_vm2 = vcmask 97344   ;;  %vm26_vm3 = vcmask 64544   ;;  %s58_s0 = inlined_call_operand.vmem [shape: f32[4,4], index: 0, kind: input, shape index: {}]   ;;  %s59_s1 = inlined_call_operand.vmem [shape: f32[1,16], index: 1, kind: output, shape index: {}]  }
   0x1   :  { %v5_v0 = vld [vmem:[%s58_s0] sm:$0xf]  ;;  %s39_s0 = smov 12  }
   0x2   :  { %6 = vst [vmem:[#allocation1] sm:$0xf] %v5_v0 }
   0x9   :  { %v11_v1 = vld [vmem:[#allocation1 + $0x3] sm:$0x1]   ;;  %v23_v2 = vld [vmem:[#allocation1 + $0x1] sm:$0x1]   ;;  %v7_v3 = vld [vmem:[#allocation1] sm:$0x1]  }
   0xa   :  { %12 = vrot.lane.b32.xlu0 %v11_v1, %s39_s0  ;;  %24 = vrot.lane.b32.xlu1 %v23_v2, %s40_s8  ;;  %v17_v4 = vld [vmem:[#allocation1 + $0x2] sm:$0x1]   ;;  %9 = vst.msk [vmem:[#allocation0] sm:$0x1] %vm8_vm0, %v7_v3  }
   0xe   :  { %18 = vrot.lane.b32.xlu0 %v17_v4, %s41_s9 }
  0x7c   :  { %v13_v5 = vpop.permute.xlu0 %12   ;;  %v25_v6 = vpop.permute.xlu1 %24  }
  0x7d   :  { %15 = vst.msk [vmem:[#allocation0] sm:$0x1] %vm14_vm1, %v13_v5  }
  0x80   :  { %v19_v7 = vpop.permute.xlu0 %18  }
  0x81   :  { %21 = vst.msk [vmem:[#allocation0] sm:$0x1] %vm20_vm2, %v19_v7  }
  0x82   :  { %27 = vst.msk [vmem:[#allocation0] sm:$0x1] %vm26_vm3, %v25_v6  }
  0x89   :  { %v32_v8 = vld [vmem:[#allocation0] sm:$0x1] }
  0x8a   :  { %35 = vst [vmem:[%s59_s1] sm:$0x1] %v32_v8 }

// kernel: down_block_forward.1
= control target key start
LH: loop header
LB: loop body
LE: loop exit
PB: predicated region body
PF: predicated region fallthrough
CT: control target
= control target key end

     0   :  { %s3511_s24 = smov 0   ;;  %s4965_s0 = inlined_call_operand.vmem [shape: f32[8,9,9,4], index: 0, kind: input, shape index: {}]   ;;  %s4966_s1 = inlined_call_operand.vmem [shape: f32[64,4], index: 1, kind: input, shape index: {}]   ;;  %s4967_s2 = inlined_call_operand.vmem [shape: f32[1,4], index: 2, kind: input, shape index: {}]   ;;  %s4968_s3 = inlined_call_operand.vmem [shape: f32[36,16], index: 3, kind: input, shape index: {}]   ;;  %s4969_s4 = inlined_call_operand.vmem [shape: f32[1,16], index: 4, kind: input, shape index: {}]   ;;  %s4970_s5 = inlined_call_operand.vmem [shape: f32[64,4], index: 5, kind: input, shape index: {}]   ;;  %s4971_s6 = inlined_call_operand.vmem [shape: f32[1,4], index: 6, kind: input, shape index: {}]   ;;  %s4972_s7 = inlined_call_operand.vmem [shape: f32[128,4], index: 7, kind: output, shape index: {}]  }
   0x1 LB: > { %s4976_s25 = sadd.s32 4294967295, %s3450_s24   ;;  %p3098_p0 = scmp.ge.s32.totalorder %s3450_s24, 1  ;;  %s3450_s24 = sphi %s3511_s24, %s17_s24  }
   0x2   : > { %p239_p1 = scmp.lt.s32.totalorder %s3450_s24, 3 }
   0x4   : > { %p240_p2 = pnand %p3098_p0, %p239_p1 }
   0x5   : > { %s3099_s26 = sshll.u32 (!%p240_p2), %s4976_s25, 2  ;;  %s3452_s8 = smov (!%p240_p2), 8  }
   0x6   : > { %243 = sbr.rel (%p240_p2) target bundleno = 1543 (0x607), region = 48  ;;  %p273_p3 = scmp.lt.s32.totalorder (!%p240_p2), %s3099_s26, 7 }
   0x7   : > { %s3453_s9 = smov (!%p240_p2), 4   ;;  %s3454_s10 = smov (!%p240_p2), 12  }
   0x8   : > { %s3455_s11 = smov (!%p240_p2), 16   ;;  %s3456_s12 = smov (!%p240_p2), 20  }
   0x9   : > { %s3457_s13 = smov (!%p240_p2), 24   ;;  %s3458_s14 = smov (!%p240_p2), 28  }
   0xa   : > { %s3459_s15 = smov (!%p240_p2), 32   ;;  %s3460_s16 = smov (!%p240_p2), 36  }
   0xb   : > { %s5030_s26 = smov (!%p273_p3, %s3099_s26), 7  ;;  %vm293_vm0 = vcmask 31744   ;;  %s3461_s17 = smov 40   ;;  %vm343_vm1 = vcmask 64544   ;;  %vm4973_vm2 = vcmask 97344   ;;  %vm441_vm3 = vcmask 130144  }
   0xc   : > { %s3416_s27 = smul.u32 144, %s5030_s26  ;;  %s3462_s18 = smov 44   ;;  %vm491_vm4 = vcmask 162944   ;;  %v1059_v62 = vld [vmem:[%s4966_s1 + $0x38] sm:$0xff]  ;;  %v1058_v63 = vld [vmem:[%s4966_s1 + $0x30] sm:$0xff]  ;;  %vm541_vm5 = vcmask 195744  }
   0xd   : > { %s3463_s19 = smov 48   ;;  %s3464_s20 = smov 52   ;;  %3322 = vmatprep.subr.mxu0 %v1059_v62  ;;  %vm590_vm6 = vcmask 228544   ;;  %vm639_vm7 = vcmask 261344   ;;  %vm4974_vm8 = vcmask 294144   ;;  %vm739_vm9 = vcmask 326944  }
   0xe   : > { %s3524_s30 = scalar_lea.vmem %s4965_s0, %s3416_s27  ;;  %s3465_s21 = smov 56   ;;  %3323 = vmatpush3.msra.mxu0 %v1059_v62  ;;  %vm4975_vm10 = vcmask 359744   ;;  %vm837_vm11 = vcmask 392544   ;;  %vm887_vm12 = vcmask 425344   ;;  %vm937_vm13 = vcmask 458144  }
   0xf   : > { %v352_v0 = vld [vmem:[%s3524_s30 + $0x1] sm:$0xff]  ;;  %v3103_v1 = vld [vmem:[%s3524_s30 + $0x90] sm:$0xff]  ;;  %3324 = vmatprep.subr.mxu0 %v1058_v63  ;;  %s3466_s22 = smov 60   ;;  %vm986_vm14 = vcmask 490944   ;;  %vm4978_vm15 = vcmask 523744   ;;  %s3468_s27 = smov 116  }
  0x10   : > { %368 = vrot.lane.b32.xlu1 %v352_v0, %s3452_s8  ;;  %319 = vrot.lane.b32.xlu0 %v3103_v1, %s3453_s9  ;;  %v3531_v2 = vld [vmem:[%s3524_s30 + $0x11] sm:$0xff]  ;;  %v3534_v3 = vld [vmem:[%s3524_s30 + $0xa0] sm:$0xff]  ;;  %s3469_s28 = smov 120   ;;  %s3470_s29 = smov 124  }
  0x11   : > { %v3541_v4 = vld [vmem:[%s3524_s30 + $0xa1] sm:$0xff]  ;;  %v3111_v5 = vld [vmem:[%s3524_s30 + $0x91] sm:$0xff]  ;;  %3325 = vmatpush3.msra.mxu0 %v1058_v63 }
  0x12   : > { %v3151_v6 = vld [vmem:[%s3524_s30 + $0x10] sm:$0xff]  ;;  %v3152_v7 = vld [vmem:[%s3524_s30 + $0x20] sm:$0xff] }
  0x13   : > { %295 = vst.msk [vmem:[#allocation2 + $0x8] sm:$0xff] %vm293_vm0, %v3151_v6  ;;  %296 = vst.msk [vmem:[#allocation2 + $0x10] sm:$0xff] %vm293_vm0, %v3152_v7  ;;  %v3105_v8 = vld [vmem:[%s3524_s30 + $0xb0] sm:$0xff]  ;;  %v3119_v9 = vld [vmem:[%s3524_s30 + $0x120] sm:$0xff] }
  0x14   : > { %370 = vrot.lane.b32.xlu1 %v3531_v2, %s3452_s8  ;;  %321 = vrot.lane.b32.xlu0 %v3534_v3, %s3453_s9  ;;  %v3556_v10 = vld [vmem:[%s3524_s30 + $0x30] sm:$0xff]  ;;  %v3565_v13 = vld [vmem:[%s3524_s30 + $0x40] sm:$0xff] }
  0x15   : > { %v3127_v11 = vld [vmem:[%s3524_s30 + $0x1b0] sm:$0xff]  ;;  %297 = vst.msk [vmem:[#allocation2 + $0x18] sm:$0xff] %vm293_vm0, %v3556_v10  ;;  %v285_v14 = vld [vmem:[%s3524_s30] sm:$0xff]  ;;  %298 = vst.msk [vmem:[#allocation2 + $0x20] sm:$0xff] %vm293_vm0, %v3565_v13 }
  0x16   : > { %v3560_v12 = vld [vmem:[%s3524_s30 + $0x130] sm:$0xff]  ;;  %294 = vst.msk [vmem:[#allocation2] sm:$0xff] %vm293_vm0, %v285_v14  ;;  %v354_v15 = vld [vmem:[%s3524_s30 + $0x21] sm:$0xff] }
  0x17   : > { %v3576_v16 = vld [vmem:[%s3524_s30 + $0xc0] sm:$0xff]  ;;  %v3579_v17 = vld [vmem:[%s3524_s30 + $0x50] sm:$0xff] }
  0x18   : > { %419 = vrot.lane.b32.xlu1 %v3541_v4, %s3454_s10  ;;  %417 = vrot.lane.b32.xlu0 %v3111_v5, %s3454_s10  ;;  %299 = vst.msk [vmem:[#allocation2 + $0x28] sm:$0xff] %vm293_vm0, %v3579_v17  ;;  %v3135_v18 = vld [vmem:[%s3524_s30 + $0x121] sm:$0xff]  ;;  %v3113_v21 = vld [vmem:[%s3524_s30 + $0xb1] sm:$0xff] }
  0x19   : > { %v3588_v19 = vld [vmem:[%s3524_s30 + $0x1c0] sm:$0xff]  ;;  %v3600_v22 = vld [vmem:[%s3524_s30 + $0x31] sm:$0xff] }
  0x1a   : > { %v3591_v20 = vld [vmem:[%s3524_s30 + $0x60] sm:$0xff]  ;;  %v3143_v23 = vld [vmem:[%s3524_s30 + $0x1b1] sm:$0xff] }
  0x1b   : > { %300 = vst.msk [vmem:[#allocation2 + $0x30] sm:$0xff] %vm293_vm0, %v3591_v20  ;;  %v3607_v24 = vld [vmem:[%s3524_s30 + $0x131] sm:$0xff]  ;;  %v3121_v25 = vld [vmem:[%s3524_s30 + $0x140] sm:$0xff] }
  0x1c   : > { %323 = vrot.lane.b32.xlu1 %v3105_v8, %s3453_s9  ;;  %467 = vrot.lane.b32.xlu0 %v3119_v9, %s3455_s11  ;;  %v3614_v26 = vld [vmem:[%s3524_s30 + $0xc1] sm:$0xff]  ;;  %v3626_v28 = vld [vmem:[%s3524_s30 + $0x150] sm:$0xff] }
  0x1d   : > { %v3620_v27 = vld [vmem:[%s3524_s30 + $0x1c1] sm:$0xff]  ;;  %v3107_v29 = vld [vmem:[%s3524_s30 + $0xd0] sm:$0xff] }
  0x1e   : > { %v3633_v30 = vld [vmem:[%s3524_s30 + $0x1d0] sm:$0xff]  ;;  %v3639_v31 = vld [vmem:[%s3524_s30 + $0xe0] sm:$0xff] }
  0x1f   : > { %v3646_v32 = vld [vmem:[%s3524_s30 + $0x1e0] sm:$0xff]  ;;  %v3659_v35 = vld [vmem:[%s3524_s30 + $0x70] sm:$0xff] }
  0x20   : > { %517 = vrot.lane.b32.xlu1 %v3127_v11, %s3456_s12  ;;  %469 = vrot.lane.b32.xlu0 %v3560_v12, %s3455_s11  ;;  %v3649_v33 = vld [vmem:[%s3524_s30 + $0x41] sm:$0xff]  ;;  %301 = vst.msk [vmem:[#allocation2 + $0x38] sm:$0xff] %vm293_vm0, %v3659_v35  ;;  %v3667_v36 = vld [vmem:[%s3524_s30 + $0x51] sm:$0xff] }
  0x21   : > { %v3656_v34 = vld [vmem:[%s3524_s30 + $0x141] sm:$0xff]  ;;  %v3674_v37 = vld [vmem:[%s3524_s30 + $0x151] sm:$0xff] }
  0x22   : > { %v3677_v38 = vld [vmem:[%s3524_s30 + $0xd1] sm:$0xff]  ;;  %v3690_v40 = vld [vmem:[%s3524_s30 + $0xe1] sm:$0xff] }
  0x23   : > { %v3684_v39 = vld [vmem:[%s3524_s30 + $0x1d1] sm:$0xff]  ;;  %v3697_v41 = vld [vmem:[%s3524_s30 + $0x1e1] sm:$0xff] }
  0x24   : > { %372 = vrot.lane.b32.xlu1 %v354_v15, %s3452_s8  ;;  %325 = vrot.lane.b32.xlu0 %v3576_v16, %s3453_s9  ;;  %v3700_v42 = vld [vmem:[%s3524_s30 + $0x160] sm:$0xff]  ;;  %v3710_v43 = vld [vmem:[%s3524_s30 + $0xf0] sm:$0xff] }
  0x25   : > { %v3717_v44 = vld [vmem:[%s3524_s30 + $0x1f0] sm:$0xff]  ;;  %v3734_v46 = vld [vmem:[%s3524_s30 + $0x61] sm:$0xff] }
  0x26   : > { %v3720_v45 = vld [vmem:[%s3524_s30 + $0x170] sm:$0xff]  ;;  %v3737_v47 = vld [vmem:[%s3524_s30 + $0x100] sm:$0xff] }
  0x27   : > { %v3744_v48 = vld [vmem:[%s3524_s30 + $0x161] sm:$0xff]  ;;  %v3763_v52 = vld [vmem:[%s3524_s30 + $0xf1] sm:$0xff] }
  0x28   : > { %566 = vrot.lane.b32.xlu1 %v3135_v18, %s3457_s13  ;;  %519 = vrot.lane.b32.xlu0 %v3588_v19, %s3456_s12  ;;  %v3747_v49 = vld [vmem:[%s3524_s30 + $0x200] sm:$0xff]  ;;  %v3766_v53 = vld [vmem:[%s3524_s30 + $0x71] sm:$0xff] }
  0x29   : > { %v3775_v56 = vld [vmem:[%s3524_s30 + $0x1f1] sm:$0xff]  ;;  %v3814_v5 = vld [vmem:[%s3524_s30 + $0x101] sm:$0xff] }
  0x2a   : > { %v3778_v57 = vld [vmem:[%s3524_s30 + $0x171] sm:$0xff]  ;;  %v3826_v9 = vld [vmem:[%s3524_s30 + $0x201] sm:$0xff] }
  0x2c   : > { %421 = vrot.lane.b32.xlu1 %v3113_v21, %s3454_s10  ;;  %374 = vrot.lane.b32.xlu0 %v3600_v22, %s3452_s8 }
  0x30   : > { %615 = vrot.lane.b32.xlu1 %v3143_v23, %s3458_s14  ;;  %568 = vrot.lane.b32.xlu0 %v3607_v24, %s3457_s13 }
  0x34   : > { %471 = vrot.lane.b32.xlu1 %v3121_v25, %s3455_s11  ;;  %423 = vrot.lane.b32.xlu0 %v3614_v26, %s3454_s10 }
  0x38   : > { %665 = vrot.lane.b32.xlu1 %v3151_v6, %s3459_s15  ;;  %617 = vrot.lane.b32.xlu0 %v3620_v27, %s3458_s14 }
  0x3c   : > { %473 = vrot.lane.b32.xlu1 %v3626_v28, %s3455_s11  ;;  %327 = vrot.lane.b32.xlu0 %v3107_v29, %s3453_s9 }
  0x40   : > { %667 = vrot.lane.b32.xlu1 %v3152_v7, %s3459_s15  ;;  %521 = vrot.lane.b32.xlu0 %v3633_v30, %s3456_s12 }
  0x44   : > { %329 = vrot.lane.b32.xlu1 %v3639_v31, %s3453_s9  ;;  %715 = vrot.lane.b32.xlu0 %v3534_v3, %s3460_s16  ;;  %v1056_v3 = vld [vmem:[%s4966_s1 + $0x20] sm:$0xff] }
  0x48   : > { %523 = vrot.lane.b32.xlu1 %v3646_v32, %s3456_s12  ;;  %376 = vrot.lane.b32.xlu0 %v3649_v33, %s3452_s8 }
  0x4c   : > { %717 = vrot.lane.b32.xlu1 %v3105_v8, %s3460_s16  ;;  %570 = vrot.lane.b32.xlu0 %v3656_v34, %s3457_s13  ;;  %v1055_v8 = vld [vmem:[%s4966_s1 + $0x18] sm:$0xff] }
  0x50   : > { %378 = vrot.lane.b32.xlu1 %v3667_v36, %s3452_s8  ;;  %764 = vrot.lane.b32.xlu0 %v3531_v2, %s3461_s17  ;;  %v1057_v2 = vld [vmem:[%s4966_s1 + $0x28] sm:$0xff] }
  0x51   : > { %3326 = vmatprep.subr.mxu0 %v1057_v2 }
  0x52   : > { %3327 = vmatpush3.msra.mxu0 %v1057_v2  ;;  %v3190_v2 = vld [vmem:[%s3524_s30 + $0x1a0] sm:$0xff] }
  0x53   : > { %3328 = vmatprep.subr.mxu0 %v1056_v3 }
  0x54   : > { %572 = vrot.lane.b32.xlu1 %v3674_v37, %s3457_s13  ;;  %425 = vrot.lane.b32.xlu0 %v3677_v38, %s3454_s10 }
  0x55   : > { %3329 = vmatpush3.msra.mxu0 %v1056_v3 }
  0x56   : > { %3330 = vmatprep.subr.mxu0 %v1055_v8 }
  0x57   : > { %3331 = vmatpush3.msra.mxu0 %v1055_v8  ;;  %v3206_v8 = vld [vmem:[%s3524_s30 + $0x1a1] sm:$0xff] }
  0x58   : > { %766 = vrot.lane.b32.xlu1 %v354_v15, %s3461_s17  ;;  %619 = vrot.lane.b32.xlu0 %v3684_v39, %s3458_s14 }
  0x5c   : > { %427 = vrot.lane.b32.xlu1 %v3690_v40, %s3454_s10  ;;  %813 = vrot.lane.b32.xlu0 %v3541_v4, %s3462_s18  ;;  %v3811_v4 = vld [vmem:[%s3524_s30 + $0x180] sm:$0xff] }
  0x60   : > { %621 = vrot.lane.b32.xlu1 %v3697_v41, %s3458_s14  ;;  %475 = vrot.lane.b32.xlu0 %v3700_v42, %s3455_s11 }
  0x64   : > { %815 = vrot.lane.b32.xlu1 %v3113_v21, %s3462_s18  ;;  %669 = vrot.lane.b32.xlu0 %v3556_v10, %s3459_s15  ;;  %v3859_v21 = vld [vmem:[%s3524_s30 + $0x210] sm:$0xff] }
  0x68   : > { %331 = vrot.lane.b32.xlu1 %v3710_v43, %s3453_s9  ;;  %863 = vrot.lane.b32.xlu0 %v3560_v12, %s3463_s19  ;;  %v1054_v12 = vld [vmem:[%s4966_s1 + $0x10] sm:$0xff] }
  0x69   : > { %3332 = vmatprep.subr.mxu0 %v1054_v12 }
  0x6a   : > { %3333 = vmatpush3.msra.mxu0 %v1054_v12 }
  0x6c   : > { %525 = vrot.lane.b32.xlu1 %v3717_v44, %s3456_s12  ;;  %477 = vrot.lane.b32.xlu0 %v3720_v45, %s3455_s11 }
  0x70   : > { %719 = vrot.lane.b32.xlu1 %v3576_v16, %s3460_s16  ;;  %671 = vrot.lane.b32.xlu0 %v3565_v13, %s3459_s15  ;;  %v1053_v13 = vld [vmem:[%s4966_s1 + $0x8] sm:$0xff]  ;;  %v1052_v16 = vld [vmem:[%s4966_s1] sm:$0xff] }
  0x71   : > { %3334 = vmatprep.subr.mxu0 %v1053_v13 }
  0x72   : > { %3335 = vmatpush3.msra.mxu0 %v1053_v13 }
  0x73   : > { %3336 = vmatprep.subr.mxu0 %v1052_v16 }
  0x74   : > { %913 = vrot.lane.b32.xlu1 %v3588_v19, %s3464_s20  ;;  %865 = vrot.lane.b32.xlu0 %v3121_v25, %s3463_s19 }
  0x75   : > { %3337 = vmatpush3.msra.mxu0 %v1052_v16 }
  0x78   : > { %380 = vrot.lane.b32.xlu1 %v3734_v46, %s3452_s8  ;;  %333 = vrot.lane.b32.xlu0 %v3737_v47, %s3453_s9 }
  0x7c   : > { %574 = vrot.lane.b32.xlu1 %v3744_v48, %s3457_s13  ;;  %527 = vrot.lane.b32.xlu0 %v3747_v49, %s3456_s12 }
  0x80   : > { %768 = vrot.lane.b32.xlu1 %v3600_v22, %s3461_s17  ;;  %721 = vrot.lane.b32.xlu0 %v3107_v29, %s3460_s16 }
  0x82   : > { %v369_v50 = vpop.permute.xlu1 %368  ;;  %v320_v51 = vpop.permute.xlu0 %319 }
  0x83   : > { %344 = vst.msk [vmem:[#allocation2] sm:$0xff] %vm343_vm1, %v320_v51 }
  0x84   : > { %962 = vrot.lane.b32.xlu1 %v3607_v24, %s3465_s21  ;;  %915 = vrot.lane.b32.xlu0 %v3633_v30, %s3464_s20  ;;  %393 = vst.msk [vmem:[#allocation2] sm:$0xff] %vm4973_vm2, %v369_v50 }
  0x86   : > { %v371_v54 = vpop.permute.xlu1 %370  ;;  %v322_v55 = vpop.permute.xlu0 %321 }
  0x87   : > { %345 = vst.msk [vmem:[#allocation2 + $0x8] sm:$0xff] %vm343_vm1, %v322_v55 }
  0x88   : > { %429 = vrot.lane.b32.xlu1 %v3763_v52, %s3454_s10  ;;  %382 = vrot.lane.b32.xlu0 %v3766_v53, %s3452_s8  ;;  %394 = vst.msk [vmem:[#allocation2 + $0x8] sm:$0xff] %vm4973_vm2, %v371_v54 }
  0x8a   : > { %v420_v58 = vpop.permute.xlu1 %419  ;;  %v418_v59 = vpop.permute.xlu0 %417 }
  0x8b   : > { %443 = vst.msk [vmem:[#allocation2 + $0x8] sm:$0xff] %vm441_vm3, %v420_v58  ;;  %442 = vst.msk [vmem:[#allocation2] sm:$0xff] %vm441_vm3, %v418_v59 }
  0x8c   : > { %623 = vrot.lane.b32.xlu1 %v3775_v56, %s3458_s14  ;;  %576 = vrot.lane.b32.xlu0 %v3778_v57, %s3457_s13 }
  0x8e   : > { %v324_v60 = vpop.permute.xlu1 %323  ;;  %v468_v61 = vpop.permute.xlu0 %467 }
  0x8f   : > { %346 = vst.msk [vmem:[#allocation2 + $0x10] sm:$0xff] %vm343_vm1, %v324_v60 }
  0x90   : > { %492 = vst.msk [vmem:[#allocation2] sm:$0xff] %vm491_vm4, %v468_v61  ;;  %817 = vrot.lane.b32.xlu1 %v3614_v26, %s3462_s18  ;;  %770 = vrot.lane.b32.xlu0 %v3649_v33, %s3461_s17  ;;  %v3874_v26 = vld [vmem:[%s3524_s30 + $0x220] sm:$0xff] }
  0x92   : > { %v518_v0 = vpop.permute.xlu1 %517  ;;  %v470_v1 = vpop.permute.xlu0 %469 }
  0x93   : > { %542 = vst.msk [vmem:[#allocation2] sm:$0xff] %vm541_vm5, %v518_v0 }
  0x94   : > { %493 = vst.msk [vmem:[#allocation2 + $0x8] sm:$0xff] %vm491_vm4, %v470_v1  ;;  %1011 = vrot.lane.b32.xlu1 %v3620_v27, %s3466_s22  ;;  %964 = vrot.lane.b32.xlu0 %v3656_v34, %s3465_s21 }
  0x96   : > { %v373_v6 = vpop.permute.xlu1 %372  ;;  %v326_v7 = vpop.permute.xlu0 %325 }
  0x97   : > { %395 = vst.msk [vmem:[#allocation2 + $0x10] sm:$0xff] %vm4973_vm2, %v373_v6 }
  0x98   : > { %347 = vst.msk [vmem:[#allocation2 + $0x18] sm:$0xff] %vm343_vm1, %v326_v7  ;;  %479 = vrot.lane.b32.xlu1 %v3811_v4, %s3455_s11  ;;  %431 = vrot.lane.b32.xlu0 %v3814_v5, %s3454_s10 }
  0x9a   : > { %v567_v10 = vpop.permute.xlu1 %566  ;;  %v520_v11 = vpop.permute.xlu0 %519 }
  0x9b   : > { %591 = vst.msk [vmem:[#allocation2] sm:$0xff] %vm590_vm6, %v567_v10 }
  0x9c   : > { %543 = vst.msk [vmem:[#allocation2 + $0x8] sm:$0xff] %vm541_vm5, %v520_v11  ;;  %673 = vrot.lane.b32.xlu1 %v3579_v17, %s3459_s15  ;;  %625 = vrot.lane.b32.xlu0 %v3826_v9, %s3458_s14  ;;  %v3850_v17 = vld [vmem:[%s3524_s30 + $0x190] sm:$0xff] }
  0x9d   : > { %v3214_v11 = vld [vmem:[%s3524_s30 + $0x231] sm:$0xff] }
  0x9e   : > { %v422_v14 = vpop.permute.xlu1 %421  ;;  %v375_v15 = vpop.permute.xlu0 %374 }
  0x9f   : > { %444 = vst.msk [vmem:[#allocation2 + $0x10] sm:$0xff] %vm441_vm3, %v422_v14 }
  0xa0   : > { %396 = vst.msk [vmem:[#allocation2 + $0x18] sm:$0xff] %vm4973_vm2, %v375_v15  ;;  %867 = vrot.lane.b32.xlu1 %v3626_v28, %s3463_s19  ;;  %819 = vrot.lane.b32.xlu0 %v3677_v38, %s3462_s18  ;;  %v3883_v28 = vld [vmem:[%s3524_s30 + $0x181] sm:$0xff] }
  0xa2   : > { %v616_v18 = vpop.permute.xlu1 %615  ;;  %v569_v19 = vpop.permute.xlu0 %568 }
  0xa3   : > { %640 = vst.msk [vmem:[#allocation2] sm:$0xff] %vm639_vm7, %v616_v18 }
  0xa4   : > { %592 = vst.msk [vmem:[#allocation2 + $0x8] sm:$0xff] %vm590_vm6, %v569_v19  ;;  %481 = vrot.lane.b32.xlu1 %v3850_v17, %s3455_s11  ;;  %1013 = vrot.lane.b32.xlu0 %v3684_v39, %s3466_s22  ;;  %v3907_v39 = vld [vmem:[%s3524_s30 + $0x211] sm:$0xff] }
  0xa6   : > { %v472_v22 = vpop.permute.xlu1 %471  ;;  %v424_v23 = vpop.permute.xlu0 %423 }
  0xa7   : > { %494 = vst.msk [vmem:[#allocation2 + $0x10] sm:$0xff] %vm491_vm4, %v472_v22 }
  0xa8   : > { %445 = vst.msk [vmem:[#allocation2 + $0x18] sm:$0xff] %vm441_vm3, %v424_v23  ;;  %675 = vrot.lane.b32.xlu1 %v3591_v20, %s3459_s15  ;;  %529 = vrot.lane.b32.xlu0 %v3859_v21, %s3456_s12 }
  0xaa   : > { %v666_v24 = vpop.permute.xlu1 %665  ;;  %v618_v25 = vpop.permute.xlu0 %617 }
  0xab   : > { %690 = vst.msk [vmem:[#allocation2] sm:$0xff] %vm4974_vm8, %v666_v24 }
  0xac   : > { %641 = vst.msk [vmem:[#allocation2 + $0x8] sm:$0xff] %vm639_vm7, %v618_v25  ;;  %869 = vrot.lane.b32.xlu1 %v3700_v42, %s3463_s19  ;;  %723 = vrot.lane.b32.xlu0 %v3639_v31, %s3460_s16 }
  0xae   : > { %v474_v20 = vpop.permute.xlu1 %473  ;;  %v328_v27 = vpop.permute.xlu0 %327 }
  0xaf   : > { %495 = vst.msk [vmem:[#allocation2 + $0x18] sm:$0xff] %vm491_vm4, %v474_v20 }
  0xb0   : > { %348 = vst.msk [vmem:[#allocation2 + $0x20] sm:$0xff] %vm343_vm1, %v328_v27  ;;  %531 = vrot.lane.b32.xlu1 %v3874_v26, %s3456_s12  ;;  %917 = vrot.lane.b32.xlu0 %v3646_v32, %s3464_s20  ;;  %v3898_v32 = vld [vmem:[%s3524_s30 + $0x191] sm:$0xff] }
  0xb2   : > { %v668_v29 = vpop.permute.xlu1 %667  ;;  %v522_v30 = vpop.permute.xlu0 %521 }
  0xb3   : > { %691 = vst.msk [vmem:[#allocation2 + $0x8] sm:$0xff] %vm4974_vm8, %v668_v29 }
  0xb4   : > { %544 = vst.msk [vmem:[#allocation2 + $0x10] sm:$0xff] %vm541_vm5, %v522_v30  ;;  %725 = vrot.lane.b32.xlu1 %v3710_v43, %s3460_s16  ;;  %578 = vrot.lane.b32.xlu0 %v3883_v28, %s3457_s13 }
  0xb6   : > { %v330_v31 = vpop.permute.xlu1 %329  ;;  %v716_v33 = vpop.permute.xlu0 %715 }
  0xb7   : > { %349 = vst.msk [vmem:[#allocation2 + $0x28] sm:$0xff] %vm343_vm1, %v330_v31 }
  0xb8   : > { %740 = vst.msk [vmem:[#allocation2] sm:$0xff] %vm739_vm9, %v716_v33  ;;  %919 = vrot.lane.b32.xlu1 %v3717_v44, %s3464_s20  ;;  %772 = vrot.lane.b32.xlu0 %v3667_v36, %s3461_s17 }
  0xba   : > { %v524_v34 = vpop.permute.xlu1 %523  ;;  %v377_v38 = vpop.permute.xlu0 %376 }
  0xbb   : > { %545 = vst.msk [vmem:[#allocation2 + $0x18] sm:$0xff] %vm541_vm5, %v524_v34 }
  0xbc   : > { %397 = vst.msk [vmem:[#allocation2 + $0x20] sm:$0xff] %vm4973_vm2, %v377_v38  ;;  %580 = vrot.lane.b32.xlu1 %v3898_v32, %s3457_s13  ;;  %966 = vrot.lane.b32.xlu0 %v3674_v37, %s3465_s21  ;;  %v3922_v37 = vld [vmem:[%s3524_s30 + $0x221] sm:$0xff] }
  0xbe   : > { %v718_v42 = vpop.permute.xlu1 %717  ;;  %v571_v43 = vpop.permute.xlu0 %570 }
  0xbf   : > { %741 = vst.msk [vmem:[#allocation2 + $0x8] sm:$0xff] %vm739_vm9, %v718_v42 }
  0xc0   : > { %593 = vst.msk [vmem:[#allocation2 + $0x10] sm:$0xff] %vm590_vm6, %v571_v43  ;;  %774 = vrot.lane.b32.xlu1 %v3734_v46, %s3461_s17  ;;  %627 = vrot.lane.b32.xlu0 %v3907_v39, %s3458_s14 }
  0xc2   : > { %v379_v36 = vpop.permute.xlu1 %378  ;;  %v765_v44 = vpop.permute.xlu0 %764 }
  0xc3   : > { %398 = vst.msk [vmem:[#allocation2 + $0x28] sm:$0xff] %vm4973_vm2, %v379_v36 }
  0xc4   : > { %789 = vst.msk [vmem:[#allocation2] sm:$0xff] %vm4975_vm10, %v765_v44  ;;  %968 = vrot.lane.b32.xlu1 %v3744_v48, %s3465_s21  ;;  %821 = vrot.lane.b32.xlu0 %v3690_v40, %s3462_s18 }
  0xc6   : > { %v573_v50 = vpop.permute.xlu1 %572  ;;  %v426_v46 = vpop.permute.xlu0 %425 }
  0xc7   : > { %594 = vst.msk [vmem:[#allocation2 + $0x18] sm:$0xff] %vm590_vm6, %v573_v50 }
  0xc8   : > { %446 = vst.msk [vmem:[#allocation2 + $0x20] sm:$0xff] %vm441_vm3, %v426_v46  ;;  %629 = vrot.lane.b32.xlu1 %v3922_v37, %s3458_s14  ;;  %1015 = vrot.lane.b32.xlu0 %v3697_v41, %s3466_s22  ;;  %v3158_v41 = vld [vmem:[%s3524_s30 + $0x80] sm:$0xff] }
  0xca   : > { %v767_v51 = vpop.permute.xlu1 %766  ;;  %v620_v48 = vpop.permute.xlu0 %619 }
  0xcb   : > { %790 = vst.msk [vmem:[#allocation2 + $0x8] sm:$0xff] %vm4975_vm10, %v767_v51 }
  0xcc   : > { %642 = vst.msk [vmem:[#allocation2 + $0x10] sm:$0xff] %vm639_vm7, %v620_v48  ;;  %823 = vrot.lane.b32.xlu1 %v3763_v52, %s3462_s18  ;;  %677 = vrot.lane.b32.xlu0 %v3659_v35, %s3459_s15 }
  0xce   : > { %v428_v40 = vpop.permute.xlu1 %427  ;;  %v814_v54 = vpop.permute.xlu0 %813 }
  0xcf   : > { %447 = vst.msk [vmem:[#allocation2 + $0x28] sm:$0xff] %vm441_vm3, %v428_v40 }
  0xd0   : > { %838 = vst.msk [vmem:[#allocation2] sm:$0xff] %vm837_vm11, %v814_v54  ;;  %1017 = vrot.lane.b32.xlu1 %v3775_v56, %s3466_s22  ;;  %871 = vrot.lane.b32.xlu0 %v3720_v45, %s3463_s19  ;;  %v3166_v45 = vld [vmem:[%s3524_s30 + $0x110] sm:$0xff] }
  0xd2   : > { %v622_v55 = vpop.permute.xlu1 %621  ;;  %v476_v52 = vpop.permute.xlu0 %475 }
  0xd3   : > { %643 = vst.msk [vmem:[#allocation2 + $0x18] sm:$0xff] %vm639_vm7, %v622_v55 }
  0xd4   : > { %496 = vst.msk [vmem:[#allocation2 + $0x20] sm:$0xff] %vm491_vm4, %v476_v52  ;;  %679 = vrot.lane.b32.xlu0 %v3158_v41, %s3459_s15  ;;  %727 = vrot.lane.b32.xlu1 %v3737_v47, %s3460_s16 }
  0xd6   : > { %v816_v35 = vpop.permute.xlu1 %815  ;;  %v670_v58 = vpop.permute.xlu0 %669 }
  0xd7   : > { %839 = vst.msk [vmem:[#allocation2 + $0x8] sm:$0xff] %vm837_vm11, %v816_v35 }
  0xd8   : > { %692 = vst.msk [vmem:[#allocation2 + $0x10] sm:$0xff] %vm4974_vm8, %v670_v58  ;;  %873 = vrot.lane.b32.xlu0 %v3811_v4, %s3463_s19  ;;  %921 = vrot.lane.b32.xlu1 %v3747_v49, %s3464_s20  ;;  %v3174_v49 = vld [vmem:[%s3524_s30 + $0x81] sm:$0xff] }
  0xda   : > { %v332_v56 = vpop.permute.xlu1 %331  ;;  %v864_v59 = vpop.permute.xlu0 %863 }
  0xdb   : > { %350 = vst.msk [vmem:[#allocation2 + $0x30] sm:$0xff] %vm343_vm1, %v332_v56 }
  0xdc   : > { %888 = vst.msk [vmem:[#allocation2] sm:$0xff] %vm887_vm12, %v864_v59  ;;  %729 = vrot.lane.b32.xlu0 %v3166_v45, %s3460_s16  ;;  %776 = vrot.lane.b32.xlu1 %v3766_v53, %s3461_s17 }
  0xde   : > { %v526_v47 = vpop.permute.xlu1 %525  ;;  %v478_v60 = vpop.permute.xlu0 %477 }
  0xdf   : > { %546 = vst.msk [vmem:[#allocation2 + $0x20] sm:$0xff] %vm541_vm5, %v526_v47 }
  0xe0   : > { %497 = vst.msk [vmem:[#allocation2 + $0x28] sm:$0xff] %vm491_vm4, %v478_v60  ;;  %923 = vrot.lane.b32.xlu0 %v3859_v21, %s3464_s20  ;;  %970 = vrot.lane.b32.xlu1 %v3778_v57, %s3465_s21  ;;  %v3182_v57 = vld [vmem:[%s3524_s30 + $0x111] sm:$0xff] }
  0xe2   : > { %v720_v61 = vpop.permute.xlu1 %719  ;;  %v672_v62 = vpop.permute.xlu0 %671 }
  0xe3   : > { %742 = vst.msk [vmem:[#allocation2 + $0x10] sm:$0xff] %vm739_vm9, %v720_v61 }
  0xe4   : > { %693 = vst.msk [vmem:[#allocation2 + $0x18] sm:$0xff] %vm4974_vm8, %v672_v62  ;;  %778 = vrot.lane.b32.xlu0 %v3174_v49, %s3461_s17  ;;  %825 = vrot.lane.b32.xlu1 %v3814_v5, %s3462_s18  ;;  %v3198_v5 = vld [vmem:[%s3524_s30 + $0x230] sm:$0xff] }
  0xe6   : > { %v914_v53 = vpop.permute.xlu1 %913  ;;  %v866_v63 = vpop.permute.xlu0 %865 }
  0xe7   : > { %938 = vst.msk [vmem:[#allocation2] sm:$0xff] %vm937_vm13, %v914_v53 }
  0xe8   : > { %889 = vst.msk [vmem:[#allocation2 + $0x8] sm:$0xff] %vm887_vm12, %v866_v63  ;;  %972 = vrot.lane.b32.xlu0 %v3883_v28, %s3465_s21  ;;  %1019 = vrot.lane.b32.xlu1 %v3826_v9, %s3466_s22 }
  0xea   : > { %v381_v0 = vpop.permute.xlu1 %380  ;;  %v334_v1 = vpop.permute.xlu0 %333 }
  0xeb   : > { %399 = vst.msk [vmem:[#allocation2 + $0x30] sm:$0xff] %vm4973_vm2, %v381_v0  ;;  %v3467_v0 = vmov 0.0  }
  0xec   : > { %351 = vst.msk [vmem:[#allocation2 + $0x38] sm:$0xff] %vm343_vm1, %v334_v1  ;;  %827 = vrot.lane.b32.xlu0 %v3182_v57, %s3462_s18  ;;  %875 = vrot.lane.b32.xlu1 %v3850_v17, %s3463_s19 }
  0xed   : > { %1201 = vst.msk [vmem:[#allocation3 + $0x90] sm:$0xff] %vm293_vm0, %v3467_v0  ;;  %1197 = vst.msk [vmem:[#allocation3] sm:$0xff] %vm293_vm0, %v3467_v0 }
  0xee   : > { %v575_v3 = vpop.permute.xlu1 %574  ;;  %v528_v4 = vpop.permute.xlu0 %527  ;;  %1788 = vst.msk [vmem:[#allocation4] sm:$0xff] %vm293_vm0, %v3467_v0  ;;  %1888 = vst.msk [vmem:[#allocation5] sm:$0xff] %vm293_vm0, %v3467_v0 }
  0xef   : > { %595 = vst.msk [vmem:[#allocation2 + $0x20] sm:$0xff] %vm590_vm6, %v575_v3 }
  0xf0   : > { %547 = vst.msk [vmem:[#allocation2 + $0x28] sm:$0xff] %vm541_vm5, %v528_v4  ;;  %1021 = vrot.lane.b32.xlu0 %v3907_v39, %s3466_s22  ;;  %877 = vrot.lane.b32.xlu1 %v3190_v2, %s3463_s19 }
  0xf1   : > { %1989 = vst.msk [vmem:[#allocation6 + $0x80] sm:$0xff] %vm293_vm0, %v3467_v0  ;;  %2089 = vst.msk [vmem:[#allocation7 + $0x80] sm:$0xff] %vm293_vm0, %v3467_v0 }
  0xf2   : > { %v769_v6 = vpop.permute.xlu1 %768  ;;  %v722_v7 = vpop.permute.xlu0 %721 }
  0xf3   : > { %791 = vst.msk [vmem:[#allocation2 + $0x10] sm:$0xff] %vm4975_vm10, %v769_v6 }
  0xf4   : > { %743 = vst.msk [vmem:[#allocation2 + $0x18] sm:$0xff] %vm739_vm9, %v722_v7  ;;  %925 = vrot.lane.b32.xlu0 %v3874_v26, %s3464_s20  ;;  %927 = vrot.lane.b32.xlu1 %v3198_v5, %s3464_s20 }
  0xf6   : > { %v963_v9 = vpop.permute.xlu1 %962  ;;  %v916_v10 = vpop.permute.xlu0 %915 }
  0xf7   : > { %987 = vst.msk [vmem:[#allocation2] sm:$0xff] %vm986_vm14, %v963_v9 }
  0xf8   : > { %939 = vst.msk [vmem:[#allocation2 + $0x8] sm:$0xff] %vm937_vm13, %v916_v10  ;;  %974 = vrot.lane.b32.xlu0 %v3898_v32, %s3465_s21  ;;  %976 = vrot.lane.b32.xlu1 %v3206_v8, %s3465_s21 }
  0xfa   : > { %v430_v12 = vpop.permute.xlu1 %429  ;;  %v383_v13 = vpop.permute.xlu0 %382 }
  0xfb   : > { %448 = vst.msk [vmem:[#allocation2 + $0x30] sm:$0xff] %vm441_vm3, %v430_v12 }
  0xfc   : > { %400 = vst.msk [vmem:[#allocation2 + $0x38] sm:$0xff] %vm4973_vm2, %v383_v13  ;;  %1023 = vrot.lane.b32.xlu0 %v3922_v37, %s3466_s22  ;;  %1025 = vrot.lane.b32.xlu1 %v3214_v11, %s3466_s22  ;;  %vm4977_vm2 = vcmask 523264  }
  0xfe   : > { %v624_v14 = vpop.permute.xlu1 %623  ;;  %v577_v15 = vpop.permute.xlu0 %576 }
  0xff   : > { %644 = vst.msk [vmem:[#allocation2 + $0x20] sm:$0xff] %vm639_vm7, %v624_v14 }
 0x100   : > { %596 = vst.msk [vmem:[#allocation2 + $0x28] sm:$0xff] %vm590_vm6, %v577_v15 }
 0x102   : > { %v818_v16 = vpop.permute.xlu1 %817  ;;  %v771_v17 = vpop.permute.xlu0 %770 }
 0x103   : > { %840 = vst.msk [vmem:[#allocation2 + $0x10] sm:$0xff] %vm837_vm11, %v818_v16 }
 0x104   : > { %792 = vst.msk [vmem:[#allocation2 + $0x18] sm:$0xff] %vm4975_vm10, %v771_v17 }
 0x106   : > { %v1012_v18 = vpop.permute.xlu1 %1011  ;;  %v965_v19 = vpop.permute.xlu0 %964 }
 0x107   : > { %1036 = vst.msk [vmem:[#allocation2] sm:$0xff] %vm4978_vm15, %v1012_v18 }
 0x108   : > { %988 = vst.msk [vmem:[#allocation2 + $0x8] sm:$0xff] %vm986_vm14, %v965_v19 }
 0x10a   : > { %v480_v21 = vpop.permute.xlu1 %479  ;;  %v432_v22 = vpop.permute.xlu0 %431 }
 0x10b   : > { %498 = vst.msk [vmem:[#allocation2 + $0x30] sm:$0xff] %vm491_vm4, %v480_v21 }
 0x10c   : > { %449 = vst.msk [vmem:[#allocation2 + $0x38] sm:$0xff] %vm441_vm3, %v432_v22 }
 0x10e   : > { %v674_v23 = vpop.permute.xlu1 %673  ;;  %v626_v24 = vpop.permute.xlu0 %625  ;;  %v1044_v25 = vld [vmem:[#allocation2] sm:$0xff] }
 0x10f   : > { %694 = vst.msk [vmem:[#allocation2 + $0x20] sm:$0xff] %vm4974_vm8, %v674_v23  ;;  %3338 = vmatprep.mubr.msk.f32.mxu0 %vm4977_vm2, %v1044_v25  ;;  %v4220_v25 = vld [vmem:[%s4967_s2] ss:$0 sm:$0xff] }
 0x110   : > { %645 = vst.msk [vmem:[#allocation2 + $0x28] sm:$0xff] %vm639_vm7, %v626_v24 }
 0x112   : > { %v868_v26 = vpop.permute.xlu1 %867  ;;  %v820_v20 = vpop.permute.xlu0 %819 }
 0x113   : > { %890 = vst.msk [vmem:[#allocation2 + $0x10] sm:$0xff] %vm887_vm12, %v868_v26 }
 0x114   : > { %841 = vst.msk [vmem:[#allocation2 + $0x18] sm:$0xff] %vm837_vm11, %v820_v20 }
 0x116   : > { %v482_v27 = vpop.permute.xlu1 %481  ;;  %v1014_v28 = vpop.permute.xlu0 %1013 }
 0x117   : > { %499 = vst.msk [vmem:[#allocation2 + $0x38] sm:$0xff] %vm491_vm4, %v482_v27 }
 0x118   : > { %1037 = vst.msk [vmem:[#allocation2 + $0x8] sm:$0xff] %vm4978_vm15, %v1014_v28 }
 0x11a   : > { %v676_v29 = vpop.permute.xlu1 %675  ;;  %v530_v30 = vpop.permute.xlu0 %529 }
 0x11b   : > { %695 = vst.msk [vmem:[#allocation2 + $0x28] sm:$0xff] %vm4974_vm8, %v676_v29 }
 0x11c   : > { %548 = vst.msk [vmem:[#allocation2 + $0x30] sm:$0xff] %vm541_vm5, %v530_v30 }
 0x11e   : > { %v870_v31 = vpop.permute.xlu1 %869  ;;  %v724_v33 = vpop.permute.xlu0 %723 }
 0x11f   : > { %v1045_v32 = vld [vmem:[#allocation2 + $0x8] sm:$0xff]  ;;  %891 = vst.msk [vmem:[#allocation2 + $0x18] sm:$0xff] %vm887_vm12, %v870_v31 }
 0x120   : > { %744 = vst.msk [vmem:[#allocation2 + $0x20] sm:$0xff] %vm739_vm9, %v724_v33  ;;  %3339 = vmatmul.mubr.msk.f32.vlgmr.msra.gmra.mxu0 %vm4977_vm2, %v1045_v32 }
 0x122   : > { %v532_v34 = vpop.permute.xlu1 %531  ;;  %v918_v38 = vpop.permute.xlu0 %917 }
 0x123   : > { %549 = vst.msk [vmem:[#allocation2 + $0x38] sm:$0xff] %vm541_vm5, %v532_v34 }
 0x124   : > { %940 = vst.msk [vmem:[#allocation2 + $0x10] sm:$0xff] %vm937_vm13, %v918_v38 }
 0x126   : > { %v726_v39 = vpop.permute.xlu1 %725  ;;  %v579_v42 = vpop.permute.xlu0 %578 }
 0x127   : > { %745 = vst.msk [vmem:[#allocation2 + $0x28] sm:$0xff] %vm739_vm9, %v726_v39 }
 0x128   : > { %597 = vst.msk [vmem:[#allocation2 + $0x30] sm:$0xff] %vm590_vm6, %v579_v42 }
 0x12a   : > { %v920_v43 = vpop.permute.xlu1 %919  ;;  %v773_v36 = vpop.permute.xlu0 %772 }
 0x12b   : > { %941 = vst.msk [vmem:[#allocation2 + $0x18] sm:$0xff] %vm937_vm13, %v920_v43 }
 0x12c   : > { %793 = vst.msk [vmem:[#allocation2 + $0x20] sm:$0xff] %vm4975_vm10, %v773_v36 }
 0x12e   : > { %v581_v44 = vpop.permute.xlu1 %580  ;;  %v967_v37 = vpop.permute.xlu0 %966 }
 0x12f   : > { %598 = vst.msk [vmem:[#allocation2 + $0x38] sm:$0xff] %vm590_vm6, %v581_v44 }
 0x130   : > { %989 = vst.msk [vmem:[#allocation2 + $0x10] sm:$0xff] %vm986_vm14, %v967_v37 }
 0x132   : > { %v775_v50 = vpop.permute.xlu1 %774  ;;  %v628_v46 = vpop.permute.xlu0 %627 }
 0x133   : > { %794 = vst.msk [vmem:[#allocation2 + $0x28] sm:$0xff] %vm4975_vm10, %v775_v50 }
 0x134   : > { %646 = vst.msk [vmem:[#allocation2 + $0x30] sm:$0xff] %vm639_vm7, %v628_v46 }
 0x136   : > { %v969_v51 = vpop.permute.xlu1 %968  ;;  %v822_v48 = vpop.permute.xlu0 %821 }
 0x137   : > { %990 = vst.msk [vmem:[#allocation2 + $0x18] sm:$0xff] %vm986_vm14, %v969_v51  ;;  %v1646_v51 = vld [vmem:[%s4968_s3 + $0x20] sm:$0xf] }
 0x138   : > { %842 = vst.msk [vmem:[#allocation2 + $0x20] sm:$0xff] %vm837_vm11, %v822_v48  ;;  %v1645_v48 = vld [vmem:[%s4968_s3 + $0x18] sm:$0xff] }
 0x13a   : > { %v630_v40 = vpop.permute.xlu1 %629  ;;  %v1016_v54 = vpop.permute.xlu0 %1015 }
 0x13b   : > { %647 = vst.msk [vmem:[#allocation2 + $0x38] sm:$0xff] %vm639_vm7, %v630_v40 }
 0x13c   : > { %1038 = vst.msk [vmem:[#allocation2 + $0x10] sm:$0xff] %vm4978_vm15, %v1016_v54  ;;  %v1644_v54 = vld [vmem:[%s4968_s3 + $0x10] sm:$0xff] }
 0x13e   : > { %v824_v41 = vpop.permute.xlu1 %823  ;;  %v678_v55 = vpop.permute.xlu0 %677 }
 0x13f   : > { %843 = vst.msk [vmem:[#allocation2 + $0x28] sm:$0xff] %vm837_vm11, %v824_v41  ;;  %v1643_v41 = vld [vmem:[%s4968_s3 + $0x8] sm:$0xff] }
 0x140   : > { %696 = vst.msk [vmem:[#allocation2 + $0x30] sm:$0xff] %vm4974_vm8, %v678_v55  ;;  %v1642_v55 = vld [vmem:[%s4968_s3] sm:$0xff] }
 0x142   : > { %v1018_v52 = vpop.permute.xlu1 %1017  ;;  %v872_v35 = vpop.permute.xlu0 %871 }
 0x143   : > { %v1046_v58 = vld [vmem:[#allocation2 + $0x10] sm:$0xff]  ;;  %1039 = vst.msk [vmem:[#allocation2 + $0x18] sm:$0xff] %vm4978_vm15, %v1018_v52 }
 0x144   : > { %892 = vst.msk [vmem:[#allocation2 + $0x20] sm:$0xff] %vm887_vm12, %v872_v35  ;;  %3341 = vmatprep.mubr.msk.f32.mxu0 %vm4977_vm2, %v1046_v58 }
 0x146   : > { %v680_v45 = vpop.permute.xlu0 %679  ;;  %v728_v56 = vpop.permute.xlu1 %727 }
 0x147   : > { %697 = vst.msk [vmem:[#allocation2 + $0x38] sm:$0xff] %vm4974_vm8, %v680_v45  ;;  %vm1203_vm8 = vcmask 24576  }
 0x148   : > { %746 = vst.msk [vmem:[#allocation2 + $0x30] sm:$0xff] %vm739_vm9, %v728_v56 }
 0x149   : > { %1213 = vst.msk [vmem:[#allocation3 + $0x90] sm:$0x1] %vm1203_vm8, %v3467_v0  ;;  %1205 = vst.msk [vmem:[#allocation3 + $0x10] sm:$0x1] %vm1203_vm8, %v3467_v0 }
 0x14a   : > { %v874_v59 = vpop.permute.xlu0 %873  ;;  %v1047_v47 = vld [vmem:[#allocation2 + $0x18] sm:$0xff]  ;;  %v922_v60 = vpop.permute.xlu1 %921  ;;  %1206 = vst.msk [vmem:[#allocation3 + $0x20] sm:$0x1] %vm1203_vm8, %v3467_v0  ;;  %1207 = vst.msk [vmem:[#allocation3 + $0x30] sm:$0x1] %vm1203_vm8, %v3467_v0 }
 0x14b   : > { %893 = vst.msk [vmem:[#allocation2 + $0x28] sm:$0xff] %vm887_vm12, %v874_v59  ;;  %3342 = vmatmul.mubr.msk.f32.gmra.mxu0 %vm4977_vm2, %v1047_v47 }
 0x14c   : > { %942 = vst.msk [vmem:[#allocation2 + $0x20] sm:$0xff] %vm937_vm13, %v922_v60 }
 0x14d   : > { %1208 = vst.msk [vmem:[#allocation3 + $0x40] sm:$0x1] %vm1203_vm8, %v3467_v0  ;;  %1209 = vst.msk [vmem:[#allocation3 + $0x50] sm:$0x1] %vm1203_vm8, %v3467_v0 }
 0x14e   : > { %v730_v49 = vpop.permute.xlu0 %729  ;;  %v777_v61 = vpop.permute.xlu1 %776  ;;  %1210 = vst.msk [vmem:[#allocation3 + $0x60] sm:$0x1] %vm1203_vm8, %v3467_v0  ;;  %1211 = vst.msk [vmem:[#allocation3 + $0x70] sm:$0x1] %vm1203_vm8, %v3467_v0 }
 0x14f   : > { %747 = vst.msk [vmem:[#allocation2 + $0x38] sm:$0xff] %vm739_vm9, %v730_v49 }
 0x150   : > { %795 = vst.msk [vmem:[#allocation2 + $0x30] sm:$0xff] %vm4975_vm10, %v777_v61  ;;  %v1497_v5 = vld [vmem:[#allocation3 + $0x90] sm:$0xff] }
 0x151   : > { %1212 = vst.msk [vmem:[#allocation3 + $0x80] sm:$0x1] %vm1203_vm8, %v3467_v0  ;;  %1215 = vst.msk [vmem:[#allocation3 + $0x19] sm:$0x1] %vm1203_vm8, %v3467_v0  ;;  %1520 = vrot.lane.b32.xlu1 %v1497_v5, %s3457_s13 }
 0x152   : > { %v924_v62 = vpop.permute.xlu0 %923  ;;  %v971_v53 = vpop.permute.xlu1 %970  ;;  %1216 = vst.msk [vmem:[#allocation3 + $0x29] sm:$0x1] %vm1203_vm8, %v3467_v0  ;;  %1217 = vst.msk [vmem:[#allocation3 + $0x39] sm:$0x1] %vm1203_vm8, %v3467_v0 }
 0x153   : > { %943 = vst.msk [vmem:[#allocation2 + $0x28] sm:$0xff] %vm937_vm13, %v924_v62 }
 0x154   : > { %991 = vst.msk [vmem:[#allocation2 + $0x20] sm:$0xff] %vm986_vm14, %v971_v53 }
 0x155   : > { %1218 = vst.msk [vmem:[#allocation3 + $0x49] sm:$0x1] %vm1203_vm8, %v3467_v0  ;;  %1219 = vst.msk [vmem:[#allocation3 + $0x59] sm:$0x1] %vm1203_vm8, %v3467_v0 }
 0x156   : > { %v779_v63 = vpop.permute.xlu0 %778  ;;  %v826_v57 = vpop.permute.xlu1 %825  ;;  %1220 = vst.msk [vmem:[#allocation3 + $0x69] sm:$0x1] %vm1203_vm8, %v3467_v0  ;;  %1221 = vst.msk [vmem:[#allocation3 + $0x79] sm:$0x1] %vm1203_vm8, %v3467_v0 }
 0x157   : > { %796 = vst.msk [vmem:[#allocation2 + $0x38] sm:$0xff] %vm4975_vm10, %v779_v63  ;;  %vm1198_vm10 = vcmask 25600  }
 0x158   : > { %844 = vst.msk [vmem:[#allocation2 + $0x30] sm:$0xff] %vm837_vm11, %v826_v57 }
 0x159   : > { %1222 = vst.msk [vmem:[#allocation3 + $0x89] sm:$0x1] %vm1203_vm8, %v3467_v0  ;;  %1789 = vst.msk [vmem:[#allocation4 + $0x8] sm:$0x1] %vm1203_vm8, %v3467_v0 }
 0x15a   : > { %v973_v1 = vpop.permute.xlu0 %972  ;;  %v1020_v2 = vpop.permute.xlu1 %1019  ;;  %1791 = vst.msk [vmem:[#allocation4 + $0x10] sm:$0x1] %vm1203_vm8, %v3467_v0  ;;  %1792 = vst.msk [vmem:[#allocation4 + $0x20] sm:$0x1] %vm1203_vm8, %v3467_v0 }
 0x15b   : > { %1793 = vst.msk [vmem:[#allocation4 + $0x30] sm:$0x1] %vm1203_vm8, %v3467_v0  ;;  %1794 = vst.msk [vmem:[#allocation4 + $0x40] sm:$0x1] %vm1203_vm8, %v3467_v0 }
 0x15c   : > { %1795 = vst.msk [vmem:[#allocation4 + $0x50] sm:$0x1] %vm1203_vm8, %v3467_v0  ;;  %1796 = vst.msk [vmem:[#allocation4 + $0x60] sm:$0x1] %vm1203_vm8, %v3467_v0 }
 0x15d   : > { %1797 = vst.msk [vmem:[#allocation4 + $0x70] sm:$0x1] %vm1203_vm8, %v3467_v0  ;;  %1798 = vst.msk [vmem:[#allocation4 + $0x80] sm:$0x1] %vm1203_vm8, %v3467_v0 }
 0x15e   : > { %1889 = vst.msk [vmem:[#allocation5 + $0x8] sm:$0x1] %vm1203_vm8, %v3467_v0  ;;  %1891 = vst.msk [vmem:[#allocation5 + $0x18] sm:$0x1] %vm1203_vm8, %v3467_v0  ;;  %v828_v3 = vpop.permute.xlu0 %827  ;;  %v876_v4 = vpop.permute.xlu1 %875 }
 0x15f   : > { %1892 = vst.msk [vmem:[#allocation5 + $0x28] sm:$0x1] %vm1203_vm8, %v3467_v0  ;;  %1893 = vst.msk [vmem:[#allocation5 + $0x38] sm:$0x1] %vm1203_vm8, %v3467_v0 }
 0x160   : > { %1894 = vst.msk [vmem:[#allocation5 + $0x48] sm:$0x1] %vm1203_vm8, %v3467_v0  ;;  %1895 = vst.msk [vmem:[#allocation5 + $0x58] sm:$0x1] %vm1203_vm8, %v3467_v0 }
 0x161   : > { %1896 = vst.msk [vmem:[#allocation5 + $0x68] sm:$0x1] %vm1203_vm8, %v3467_v0  ;;  %1897 = vst.msk [vmem:[#allocation5 + $0x78] sm:$0x1] %vm1203_vm8, %v3467_v0 }
 0x162   : > { %1898 = vst.msk [vmem:[#allocation5 + $0x88] sm:$0x1] %vm1203_vm8, %v3467_v0  ;;  %1990 = vst.msk [vmem:[#allocation6 + $0x88] sm:$0x1] %vm1203_vm8, %v3467_v0  ;;  %v1022_v7 = vpop.permute.xlu0 %1021  ;;  %v878_v9 = vpop.permute.xlu1 %877 }
 0x163   : > { %1991 = vst.msk [vmem:[#allocation6] sm:$0x1] %vm1203_vm8, %v3467_v0  ;;  %1992 = vst.msk [vmem:[#allocation6 + $0x10] sm:$0x1] %vm1203_vm8, %v3467_v0 }
 0x164   : > { %1993 = vst.msk [vmem:[#allocation6 + $0x20] sm:$0x1] %vm1203_vm8, %v3467_v0  ;;  %1994 = vst.msk [vmem:[#allocation6 + $0x30] sm:$0x1] %vm1203_vm8, %v3467_v0 }
 0x165   : > { %1995 = vst.msk [vmem:[#allocation6 + $0x40] sm:$0x1] %vm1203_vm8, %v3467_v0  ;;  %1996 = vst.msk [vmem:[#allocation6 + $0x50] sm:$0x1] %vm1203_vm8, %v3467_v0 }
 0x166   : > { %1997 = vst.msk [vmem:[#allocation6 + $0x60] sm:$0x1] %vm1203_vm8, %v3467_v0  ;;  %1998 = vst.msk [vmem:[#allocation6 + $0x70] sm:$0x1] %vm1203_vm8, %v3467_v0  ;;  %v926_v12 = vpop.permute.xlu0 %925  ;;  %v928_v13 = vpop.permute.xlu1 %927 }
 0x167   : > { %2090 = vst.msk [vmem:[#allocation7 + $0x88] sm:$0x1] %vm1203_vm8, %v3467_v0  ;;  %2091 = vst.msk [vmem:[#allocation7 + $0x8] sm:$0x1] %vm1203_vm8, %v3467_v0 }
 0x168   : > { %2092 = vst.msk [vmem:[#allocation7 + $0x18] sm:$0x1] %vm1203_vm8, %v3467_v0  ;;  %2093 = vst.msk [vmem:[#allocation7 + $0x28] sm:$0x1] %vm1203_vm8, %v3467_v0 }
 0x169   : > { %2094 = vst.msk [vmem:[#allocation7 + $0x38] sm:$0x1] %vm1203_vm8, %v3467_v0  ;;  %2095 = vst.msk [vmem:[#allocation7 + $0x48] sm:$0x1] %vm1203_vm8, %v3467_v0 }
 0x16a   : > { %2096 = vst.msk [vmem:[#allocation7 + $0x58] sm:$0x1] %vm1203_vm8, %v3467_v0  ;;  %2097 = vst.msk [vmem:[#allocation7 + $0x68] sm:$0x1] %vm1203_vm8, %v3467_v0  ;;  %v975_v15 = vpop.permute.xlu0 %974  ;;  %v977_v16 = vpop.permute.xlu1 %976 }
 0x16b   : > { %2098 = vst.msk [vmem:[#allocation7 + $0x78] sm:$0x1] %vm1203_vm8, %v3467_v0  ;;  %1204 = vst.msk [vmem:[#allocation3] sm:$0x1] %vm1203_vm8, %v3467_v0 }
 0x16c   : > { %1199 = vst.msk [vmem:[#allocation3 + $0x8] sm:$0x3] %vm1198_vm10, %v3467_v0  ;;  %1202 = vst.msk [vmem:[#allocation3 + $0x98] sm:$0x3] %vm1198_vm10, %v3467_v0  ;;  %vm1679_vm10 = vcmask 1043456  }
 0x16d   : > { %1790 = vst.msk [vmem:[#allocation4] sm:$0x1] %vm1203_vm8, %v3467_v0  ;;  %1999 = vst.msk [vmem:[#allocation6 + $0x80] sm:$0x1] %vm1203_vm8, %v3467_v0  ;;  %3350 = vmatprep.subr.msk.mxu1 %vm1679_vm10, %v1646_v51 }
 0x16e   : > { %992 = vst.msk [vmem:[#allocation2 + $0x28] sm:$0xff] %vm986_vm14, %v973_v1  ;;  %v1024_v17 = vpop.permute.xlu0 %1023  ;;  %v1026_v18 = vpop.permute.xlu1 %1025  ;;  %3351 = vmatpush3.msk.msra.mxu1 %vm1679_vm10, %v1646_v51 }
 0x16f   : > { %1040 = vst.msk [vmem:[#allocation2 + $0x20] sm:$0xff] %vm4978_vm15, %v1020_v2  ;;  %1041 = vst.msk [vmem:[#allocation2 + $0x28] sm:$0xff] %vm4978_vm15, %v1022_v7  ;;  %3352 = vmatprep.subr.mxu1 %v1645_v48 }
 0x170   : > { %1214 = vst.msk [vmem:[#allocation3 + $0x9] sm:$0x1] %vm1203_vm8, %v3467_v0  ;;  %1890 = vst.msk [vmem:[#allocation5 + $0x8] sm:$0x1] %vm1203_vm8, %v3467_v0  ;;  %3353 = vmatpush3.msra.mxu1 %v1645_v48 }
 0x171   : > { %2099 = vst.msk [vmem:[#allocation7 + $0x88] sm:$0x1] %vm1203_vm8, %v3467_v0  ;;  %1223 = vst.msk [vmem:[#allocation3 + $0x99] sm:$0x1] %vm1203_vm8, %v3467_v0  ;;  %vm4979_vm8 = vcmask 97344   ;;  %3354 = vmatprep.subr.mxu1 %v1644_v54 }
 0x172   : > { %845 = vst.msk [vmem:[#allocation2 + $0x38] sm:$0xff] %vm837_vm11, %v828_v3  ;;  %v1233_v22 = vld [vmem:[#allocation3] sm:$0xff]  ;;  %3355 = vmatpush3.msra.mxu1 %v1644_v54  ;;  %vm4980_vm10 = vmmov %vm4979_vm8 }
 0x173   : > { %894 = vst.msk [vmem:[#allocation2 + $0x30] sm:$0xff] %vm887_vm12, %v876_v4  ;;  %v1249_v6 = vld [vmem:[#allocation3 + $0x1] sm:$0xff]  ;;  %895 = vst.msk [vmem:[#allocation2 + $0x38] sm:$0xff] %vm887_vm12, %v878_v9  ;;  %v1545_v10 = vld [vmem:[#allocation3 + $0x91] sm:$0xff]  ;;  %3356 = vmatprep.subr.mxu1 %v1643_v41 }
 0x174   : > { %1265 = vrot.lane.b32.xlu0 %v1249_v6, %s3453_s9  ;;  %1568 = vrot.lane.b32.xlu1 %v1545_v10, %s3458_s14  ;;  %944 = vst.msk [vmem:[#allocation2 + $0x30] sm:$0xff] %vm937_vm13, %v926_v12  ;;  %945 = vst.msk [vmem:[#allocation2 + $0x38] sm:$0xff] %vm937_vm13, %v928_v13  ;;  %v3242_v54 = vld [vmem:[%s3524_s30 + $0xa0] sm:$0xff] }
 0x175   : > { %993 = vst.msk [vmem:[#allocation2 + $0x30] sm:$0xff] %vm986_vm14, %v975_v15  ;;  %994 = vst.msk [vmem:[#allocation2 + $0x38] sm:$0xff] %vm986_vm14, %v977_v16  ;;  %3357 = vmatpush3.msra.mxu1 %v1643_v41 }
 0x176   : > { %v1048_v8 = vld [vmem:[#allocation2 + $0x20] sm:$0xff]  ;;  %v1049_v14 = vld [vmem:[#allocation2 + $0x28] sm:$0xff]  ;;  %1042 = vst.msk [vmem:[#allocation2 + $0x30] sm:$0xff] %vm4978_vm15, %v1024_v17  ;;  %1043 = vst.msk [vmem:[#allocation2 + $0x38] sm:$0xff] %vm4978_vm15, %v1026_v18  ;;  %3358 = vmatprep.subr.mxu1 %v1642_v55 }
 0x177   : > { %3344 = vmatprep.mubr.msk.f32.mxu0 %vm4977_vm2, %v1048_v8  ;;  %v1297_v11 = vld [vmem:[#allocation3 + $0x2] sm:$0xff]  ;;  %1241 = vst.msk [vmem:[#allocation2] sm:$0xff] %vm293_vm0, %v1233_v22  ;;  %3359 = vmatpush3.msra.mxu1 %v1642_v55 }
 0x178   : > { %1313 = vrot.lane.b32.xlu0 %v1297_v11, %s3452_s8  ;;  %3345 = vmatmul.mubr.msk.f32.gmra.mxu0 %vm4977_vm2, %v1049_v14  ;;  %v1593_v12 = vld [vmem:[#allocation3 + $0x92] sm:$0xff] }
 0x17d   : > { %v1050_v19 = vld [vmem:[#allocation2 + $0x30] sm:$0xff]  ;;  %v1051_v21 = vld [vmem:[#allocation2 + $0x38] sm:$0xff] }
 0x17e   : > { %3347 = vmatprep.mubr.msk.f32.mxu0 %vm4977_vm2, %v1050_v19 }
 0x17f   : > { %3348 = vmatmul.mubr.msk.f32.gmra.mxu0 %vm4977_vm2, %v1051_v21  ;;  %v3235_v21 = vld [vmem:[%s3524_s30 + $0x21] sm:$0xff] }
 0x1c3   : > { %v4303_v1 = vpop.permute.xlu1 %1520 }
 0x1e0   : > { %v3340_v26 = vpop.f32.mrf.mxu0 }
 0x1e1   : > { %v1164_v20 = vadd.f32 %v3340_v26, %v4220_v25  ;;  %v3245_v26 = vld [vmem:[%s3524_s30 + $0xd0] sm:$0xff] }
 0x1e2   : > { %v1158_v27 = vpop.f32.mrf.mxu0 }
 0x1e3   : > { %1226 = vst.msk [vmem:[#allocation3 + $0x21] sm:$0xff] %vm293_vm0, %v1164_v20  ;;  %v1159_v28 = vadd.f32 %v4220_v25, %v1158_v27  ;;  %v3244_v20 = vld [vmem:[%s3524_s30 + $0xc0] sm:$0xff] }
 0x1e4   : > { %v3237_v27 = vld [vmem:[%s3524_s30 + $0x41] sm:$0xff] }
 0x1e5   : > { %1225 = vst.msk [vmem:[#allocation3 + $0x11] sm:$0xff] %vm293_vm0, %v1159_v28  ;;  %v3252_v28 = vld [vmem:[%s3524_s30 + $0x141] sm:$0xff] }
 0x1e6   : > { %v1266_v23 = vpop.permute.xlu0 %1265  ;;  %v4309_v4 = vpop.permute.xlu1 %1568 }
 0x1e7   : > { %1289 = vst.msk [vmem:[#allocation2] sm:$0xff] %vm343_vm1, %v1266_v23  ;;  %v3236_v23 = vld [vmem:[%s3524_s30 + $0x31] sm:$0xff] }
 0x1ea   : > { %v1314_v24 = vpop.permute.xlu0 %1313  ;;  %v1394_v29 = vld [vmem:[#allocation3 + $0x21] sm:$0xff] }
 0x1eb   : > { %1337 = vst.msk [vmem:[#allocation2] sm:$0xff] %vm4979_vm8, %v1314_v24  ;;  %v1346_v30 = vld [vmem:[#allocation3 + $0x20] sm:$0xff]  ;;  %1411 = vrot.lane.b32.xlu0 %v1394_v29, %s3455_s11  ;;  %v3243_v24 = vld [vmem:[%s3524_s30 + $0xb0] sm:$0xff] }
 0x1ec   : > { %1363 = vrot.lane.b32.xlu1 %v1346_v30, %s3454_s10  ;;  %1243 = vst.msk [vmem:[#allocation2 + $0x10] sm:$0xff] %vm293_vm0, %v1346_v30  ;;  %v1345_v31 = vld [vmem:[#allocation3 + $0x10] sm:$0xff]  ;;  %v1442_v33 = vld [vmem:[#allocation3 + $0x22] sm:$0xff] }
 0x1ed   : > { %1242 = vst.msk [vmem:[#allocation2 + $0x8] sm:$0xff] %vm293_vm0, %v1345_v31  ;;  %v1393_v32 = vld [vmem:[#allocation3 + $0x11] sm:$0xff] }
 0x1ee   : > { %v1298_v34 = vld [vmem:[#allocation3 + $0x12] sm:$0xff] }
 0x1ef   : > { %1459 = vrot.lane.b32.xlu0 %v1442_v33, %s3456_s12 }
 0x1f0   : > { %1269 = vrot.lane.b32.xlu1 %v1394_v29, %s3453_s9 }
 0x1f3   : > { %1361 = vrot.lane.b32.xlu0 %v1345_v31, %s3454_s10  ;;  %v3253_v31 = vld [vmem:[%s3524_s30 + $0x151] sm:$0xff] }
 0x1f4   : > { %1317 = vrot.lane.b32.xlu1 %v1442_v33, %s3452_s8 }
 0x1f7   : > { %1409 = vrot.lane.b32.xlu0 %v1393_v32, %s3455_s11 }
 0x1f8   : > { %1506 = vrot.lane.b32.xlu1 %v1346_v30, %s3457_s13 }
 0x1fc   : > { %1554 = vrot.lane.b32.xlu1 %v1394_v29, %s3458_s14  ;;  %v3238_v29 = vld [vmem:[%s3524_s30 + $0x51] sm:$0xff] }
 0x200   : > { %1602 = vrot.lane.b32.xlu1 %v1442_v33, %s3459_s15 }
 0x204   : > { %1267 = vrot.lane.b32.xlu1 %v1393_v32, %s3453_s9 }
 0x208   : > { %1315 = vrot.lane.b32.xlu1 %v1298_v34, %s3452_s8 }
 0x20b   : > { %v3343_v38 = vpop.f32.mrf.mxu0 }
 0x20c   : > { %1457 = vrot.lane.b32.xlu1 %v1298_v34, %s3456_s12  ;;  %v1174_v39 = vadd.f32 %v3343_v38, %v4220_v25  ;;  %v3247_v34 = vld [vmem:[%s3524_s30 + $0xf0] sm:$0xff]  ;;  %v3246_v38 = vld [vmem:[%s3524_s30 + $0xe0] sm:$0xff] }
 0x20d   : > { %v1168_v42 = vpop.f32.mrf.mxu0 }
 0x20e   : > { %1228 = vst.msk [vmem:[#allocation3 + $0x41] sm:$0xff] %vm293_vm0, %v1174_v39  ;;  %v1169_v43 = vadd.f32 %v4220_v25, %v1168_v42 }
 0x210   : > { %1227 = vst.msk [vmem:[#allocation3 + $0x31] sm:$0xff] %vm293_vm0, %v1169_v43  ;;  %v3239_v43 = vld [vmem:[%s3524_s30 + $0x61] sm:$0xff] }
 0x215   : > { %v1348_v36 = vld [vmem:[#allocation3 + $0x40] sm:$0xff] }
 0x216   : > { %v1396_v44 = vld [vmem:[#allocation3 + $0x41] sm:$0xff]  ;;  %1367 = vrot.lane.b32.xlu0 %v1348_v36, %s3454_s10  ;;  %1245 = vst.msk [vmem:[#allocation2 + $0x20] sm:$0xff] %vm293_vm0, %v1348_v36 }
 0x217   : > { %1415 = vrot.lane.b32.xlu1 %v1396_v44, %s3455_s11  ;;  %v1491_v37 = vld [vmem:[#allocation3 + $0x30] sm:$0xff]  ;;  %v1301_v50 = vld [vmem:[#allocation3 + $0x42] sm:$0xff] }
 0x218   : > { %1244 = vst.msk [vmem:[#allocation2 + $0x18] sm:$0xff] %vm293_vm0, %v1491_v37  ;;  %v1252_v46 = vld [vmem:[#allocation3 + $0x31] sm:$0xff] }
 0x219   : > { %v1300_v40 = vld [vmem:[#allocation3 + $0x32] sm:$0xff] }
 0x21a   : > { %1273 = vrot.lane.b32.xlu0 %v1396_v44, %s3453_s9 }
 0x21b   : > { %1321 = vrot.lane.b32.xlu1 %v1301_v50, %s3452_s8 }
 0x21e   : > { %1463 = vrot.lane.b32.xlu0 %v1301_v50, %s3456_s12 }
 0x21f   : > { %1510 = vrot.lane.b32.xlu1 %v1348_v36, %s3457_s13  ;;  %v3254_v36 = vld [vmem:[%s3524_s30 + $0x161] sm:$0xff] }
 0x222   : > { %1271 = vrot.lane.b32.xlu0 %v1252_v46, %s3453_s9 }
 0x223   : > { %1558 = vrot.lane.b32.xlu1 %v1396_v44, %s3458_s14 }
 0x226   : > { %1319 = vrot.lane.b32.xlu0 %v1300_v40, %s3452_s8 }
 0x227   : > { %1606 = vrot.lane.b32.xlu1 %v1301_v50, %s3459_s15  ;;  %v3248_v50 = vld [vmem:[%s3524_s30 + $0x100] sm:$0xff] }
 0x22a   : > { %1508 = vrot.lane.b32.xlu0 %v1491_v37, %s3457_s13 }
 0x22b   : > { %1365 = vrot.lane.b32.xlu1 %v1491_v37, %s3454_s10 }
 0x22e   : > { %1556 = vrot.lane.b32.xlu0 %v1252_v46, %s3458_s14 }
 0x22f   : > { %1413 = vrot.lane.b32.xlu1 %v1252_v46, %s3455_s11  ;;  %v3255_v46 = vld [vmem:[%s3524_s30 + $0x171] sm:$0xff] }
 0x232   : > { %1461 = vrot.lane.b32.xlu0 %v1300_v40, %s3456_s12 }
 0x233   : > { %1604 = vrot.lane.b32.xlu1 %v1300_v40, %s3459_s15  ;;  %v3240_v40 = vld [vmem:[%s3524_s30 + $0x71] sm:$0xff] }
 0x238   : > { %v3346_v52 = vpop.f32.mrf.mxu0 }
 0x239   : > { %v1184_v35 = vadd.f32 %v3346_v52, %v4220_v25  ;;  %v3256_v52 = vld [vmem:[%s3524_s30 + $0x181] sm:$0xff] }
 0x23a   : > { %v1178_v58 = vpop.f32.mrf.mxu0 }
 0x23b   : > { %1230 = vst.msk [vmem:[#allocation3 + $0x61] sm:$0xff] %vm293_vm0, %v1184_v35  ;;  %v1179_v45 = vadd.f32 %v4220_v25, %v1178_v58  ;;  %v3234_v35 = vld [vmem:[%s3524_s30 + $0x11] sm:$0xff] }
 0x23d   : > { %1229 = vst.msk [vmem:[#allocation3 + $0x51] sm:$0xff] %vm293_vm0, %v1179_v45 }
 0x23f   : > { %v3349_v60 = vpop.f32.mrf.mxu0 }
 0x240   : > { %v1194_v61 = vadd.f32 %v3349_v60, %v4220_v25 }
 0x241   : > { %v1188_v62 = vpop.f32.mrf.mxu0 }
 0x242   : > { %v1350_v56 = vld [vmem:[#allocation3 + $0x60] sm:$0xff]  ;;  %1232 = vst.msk [vmem:[#allocation3 + $0x81] sm:$0xff] %vm293_vm0, %v1194_v61  ;;  %v1189_v53 = vadd.f32 %v4220_v25, %v1188_v62  ;;  %v3251_v61 = vld [vmem:[%s3524_s30 + $0x131] sm:$0xff] }
 0x243   : > { %v1398_v59 = vld [vmem:[#allocation3 + $0x61] sm:$0xff]  ;;  %1371 = vrot.lane.b32.xlu0 %v1350_v56, %s3454_s10  ;;  %1247 = vst.msk [vmem:[#allocation2 + $0x30] sm:$0xff] %vm293_vm0, %v1350_v56 }
 0x244   : > { %1419 = vrot.lane.b32.xlu1 %v1398_v59, %s3455_s11  ;;  %v1493_v47 = vld [vmem:[#allocation3 + $0x50] sm:$0xff]  ;;  %v1303_v49 = vld [vmem:[#allocation3 + $0x62] sm:$0xff]  ;;  %1231 = vst.msk [vmem:[#allocation3 + $0x71] sm:$0xff] %vm293_vm0, %v1189_v53 }
 0x245   : > { %1246 = vst.msk [vmem:[#allocation2 + $0x28] sm:$0xff] %vm293_vm0, %v1493_v47  ;;  %v1254_v63 = vld [vmem:[#allocation3 + $0x51] sm:$0xff] }
 0x246   : > { %v1302_v0 = vld [vmem:[#allocation3 + $0x52] sm:$0xff] }
 0x247   : > { %1277 = vrot.lane.b32.xlu0 %v1398_v59, %s3453_s9 }
 0x248   : > { %1325 = vrot.lane.b32.xlu1 %v1303_v49, %s3452_s8 }
 0x249   : > { %v1352_v2 = vld [vmem:[#allocation3 + $0x80] sm:$0xff] }
 0x24a   : > { %v1448_v3 = vld [vmem:[#allocation3 + $0x82] sm:$0xff] }
 0x24b   : > { %1467 = vrot.lane.b32.xlu0 %v1303_v49, %s3456_s12  ;;  %v1351_v57 = vld [vmem:[#allocation3 + $0x70] sm:$0xff]  ;;  %v1400_v5 = vld [vmem:[#allocation3 + $0x81] sm:$0xff] }
 0x24c   : > { %1514 = vrot.lane.b32.xlu1 %v1350_v56, %s3457_s13  ;;  %1248 = vst.msk [vmem:[#allocation2 + $0x38] sm:$0xff] %vm293_vm0, %v1351_v57  ;;  %v1399_v8 = vld [vmem:[#allocation3 + $0x71] sm:$0xff] }
 0x24d   : > { %v1447_v11 = vld [vmem:[#allocation3 + $0x72] sm:$0xff] }
 0x24e   : > { %v3257_v56 = vld [vmem:[%s3524_s30 + $0x191] sm:$0xff] }
 0x24f   : > { %1275 = vrot.lane.b32.xlu0 %v1254_v63, %s3453_s9 }
 0x250   : > { %1562 = vrot.lane.b32.xlu1 %v1398_v59, %s3458_s14  ;;  %v3250_v59 = vld [vmem:[%s3524_s30 + $0x121] sm:$0xff] }
 0x253   : > { %1323 = vrot.lane.b32.xlu0 %v1302_v0, %s3452_s8 }
 0x254   : > { %1610 = vrot.lane.b32.xlu1 %v1303_v49, %s3459_s15  ;;  %v3249_v49 = vld [vmem:[%s3524_s30 + $0x110] sm:$0xff] }
 0x257   : > { %1512 = vrot.lane.b32.xlu0 %v1493_v47, %s3457_s13 }
 0x258   : > { %1369 = vrot.lane.b32.xlu1 %v1493_v47, %s3454_s10 }
 0x25b   : > { %1560 = vrot.lane.b32.xlu0 %v1254_v63, %s3458_s14 }
 0x25c   : > { %1417 = vrot.lane.b32.xlu1 %v1254_v63, %s3455_s11  ;;  %v2676_v63 = vld [vmem:[#allocation6 + $0x80] sm:$0xff] }
 0x25d   : > { %v1412_v6 = vpop.permute.xlu0 %1411 }
 0x25e   : > { %v1364_v7 = vpop.permute.xlu1 %1363 }
 0x25f   : > { %1465 = vrot.lane.b32.xlu0 %v1302_v0, %s3456_s12 }
 0x260   : > { %1608 = vrot.lane.b32.xlu1 %v1302_v0, %s3459_s15 }
 0x261   : > { %v1460_v9 = vpop.permute.xlu0 %1459 }
 0x262   : > { %v1270_v10 = vpop.permute.xlu1 %1269 }
 0x263   : > { %1375 = vrot.lane.b32.xlu0 %v1352_v2, %s3454_s10  ;;  %1291 = vst.msk [vmem:[#allocation2 + $0x10] sm:$0xff] %vm343_vm1, %v1270_v10  ;;  %v2188_v10 = vld [vmem:[#allocation4 + $0x1] sm:$0xff] }
 0x264   : > { %1471 = vrot.lane.b32.xlu1 %v1448_v3, %s3456_s12 }
 0x265   : > { %v1362_v14 = vpop.permute.xlu0 %1361 }
 0x266   : > { %v1318_v13 = vpop.permute.xlu1 %1317  ;;  %1385 = vst.msk [vmem:[#allocation2] sm:$0xff] %vm441_vm3, %v1362_v14 }
 0x267   : > { %1423 = vrot.lane.b32.xlu0 %v1400_v5, %s3455_s11  ;;  %1339 = vst.msk [vmem:[#allocation2 + $0x10] sm:$0xff] %vm4979_vm8, %v1318_v13  ;;  %vm4981_vm8 = vcmask 294144  }
 0x268   : > { %1373 = vrot.lane.b32.xlu1 %v1351_v57, %s3454_s10 }
 0x269   : > { %v1410_v16 = vpop.permute.xlu0 %1409 }
 0x26a   : > { %v1507_v15 = vpop.permute.xlu1 %1506  ;;  %1433 = vst.msk [vmem:[#allocation2] sm:$0xff] %vm491_vm4, %v1410_v16 }
 0x26b   : > { %1518 = vrot.lane.b32.xlu0 %v1352_v2, %s3457_s13 }
 0x26c   : > { %1421 = vrot.lane.b32.xlu1 %v1399_v8, %s3455_s11 }
 0x26e   : > { %v1555_v17 = vpop.permute.xlu1 %1554 }
 0x26f   : > { %1566 = vrot.lane.b32.xlu0 %v1400_v5, %s3458_s14  ;;  %v2140_v5 = vld [vmem:[#allocation5] sm:$0xff] }
 0x270   : > { %1469 = vrot.lane.b32.xlu1 %v1447_v11, %s3456_s12 }
 0x272   : > { %v1603_v18 = vpop.permute.xlu1 %1602 }
 0x273   : > { %1279 = vrot.lane.b32.xlu0 %v1399_v8, %s3453_s9 }
 0x274   : > { %1616 = vrot.lane.b32.xlu1 %v1593_v12, %s3459_s15 }
 0x276   : > { %v1268_v19 = vpop.permute.xlu1 %1267 }
 0x277   : > { %1327 = vrot.lane.b32.xlu0 %v1447_v11, %s3452_s8  ;;  %1290 = vst.msk [vmem:[#allocation2 + $0x8] sm:$0xff] %vm343_vm1, %v1268_v19 }
 0x278   : > { %1817 = vrot.lane.b32.xlu1 %v3235_v21, %s3454_s10 }
 0x27a   : > { %v1316_v22 = vpop.permute.xlu1 %1315 }
 0x27b   : > { %1516 = vrot.lane.b32.xlu0 %v1351_v57, %s3457_s13  ;;  %1338 = vst.msk [vmem:[#allocation2 + $0x8] sm:$0xff] %vm4980_vm10, %v1316_v22  ;;  %vm1654_vm10 = vcmask 293888   ;;  %v3241_v57 = vld [vmem:[%s3524_s30 + $0x81] sm:$0xff] }
 0x27c   : > { %1386 = vst.msk [vmem:[#allocation2 + $0x8] sm:$0xff] %vm441_vm3, %v1364_v7  ;;  %1819 = vrot.lane.b32.xlu1 %v3236_v23, %s3454_s10 }
 0x27d   : > { %1434 = vst.msk [vmem:[#allocation2 + $0x8] sm:$0xff] %vm491_vm4, %v1412_v6 }
 0x27e   : > { %1482 = vst.msk [vmem:[#allocation2 + $0x8] sm:$0xff] %vm541_vm5, %v1460_v9  ;;  %v1458_v25 = vpop.permute.xlu1 %1457 }
 0x27f   : > { %1564 = vrot.lane.b32.xlu0 %v1399_v8, %s3458_s14  ;;  %1481 = vst.msk [vmem:[#allocation2] sm:$0xff] %vm541_vm5, %v1458_v25 }
 0x280   : > { %1530 = vst.msk [vmem:[#allocation2] sm:$0xff] %vm590_vm6, %v1507_v15  ;;  %1921 = vrot.lane.b32.xlu1 %v3245_v26, %s3452_s8 }
 0x281   : > { %1578 = vst.msk [vmem:[#allocation2] sm:$0xff] %vm639_vm7, %v1555_v17 }
 0x282   : > { %1626 = vst.msk [vmem:[#allocation2] sm:$0xff] %vm4981_vm8, %v1603_v18  ;;  %vm4982_vm8 = vcmask 97344  }
 0x283   : > { %1612 = vrot.lane.b32.xlu0 %v1447_v11, %s3459_s15 }
 0x284   : > { %1821 = vrot.lane.b32.xlu1 %v3237_v27, %s3454_s10 }
 0x287   : > { %1614 = vrot.lane.b32.xlu0 %v1448_v3, %s3459_s15  ;;  %v2725_v3 = vld [vmem:[#allocation7 + $0x80] sm:$0xff] }
 0x288   : > { %1823 = vrot.lane.b32.xlu1 %v3238_v29, %s3454_s10  ;;  %v1368_v33 = vpop.permute.xlu0 %1367 }
 0x289   : > { %v1634_v30 = vld [vmem:[#allocation2] sm:$0xff]  ;;  %v1416_v32 = vpop.permute.xlu1 %1415 }
 0x28a   : > { %3360 = vmatprep.mubr.msk.f32.mxu1 %vm1654_vm10, %v1634_v30 }
 0x28b   : > { %1917 = vrot.lane.b32.xlu0 %v3243_v24, %s3452_s8 }
 0x28c   : > { %1925 = vrot.lane.b32.xlu1 %v3247_v34, %s3452_s8  ;;  %v1274_v39 = vpop.permute.xlu0 %1273 }
 0x28d   : > { %v1322_v42 = vpop.permute.xlu1 %1321  ;;  %1293 = vst.msk [vmem:[#allocation2 + $0x20] sm:$0xff] %vm343_vm1, %v1274_v39 }
 0x28e   : > { %1341 = vst.msk [vmem:[#allocation2 + $0x20] sm:$0xff] %vm4982_vm8, %v1322_v42 }
 0x28f   : > { %1919 = vrot.lane.b32.xlu0 %v3244_v20, %s3452_s8 }
 0x290   : > { %1825 = vrot.lane.b32.xlu1 %v3239_v43, %s3454_s10  ;;  %v1464_v44 = vpop.permute.xlu0 %1463 }
 0x291   : > { %v1511_v37 = vpop.permute.xlu1 %1510 }
 0x293   : > { %2020 = vrot.lane.b32.xlu0 %v3252_v28, %s3453_s9 }
 0x294   : > { %1927 = vrot.lane.b32.xlu1 %v3248_v50, %s3452_s8  ;;  %v1272_v51 = vpop.permute.xlu0 %1271 }
 0x295   : > { %v1559_v48 = vpop.permute.xlu1 %1558  ;;  %1292 = vst.msk [vmem:[#allocation2 + $0x18] sm:$0xff] %vm343_vm1, %v1272_v51 }
 0x297   : > { %2022 = vrot.lane.b32.xlu0 %v3253_v31, %s3453_s9 }
 0x298   : > { %1827 = vrot.lane.b32.xlu1 %v3240_v40, %s3454_s10  ;;  %v1320_v41 = vpop.permute.xlu0 %1319 }
 0x299   : > { %v1607_v55 = vpop.permute.xlu1 %1606  ;;  %1340 = vst.msk [vmem:[#allocation2 + $0x18] sm:$0xff] %vm4982_vm8, %v1320_v41  ;;  %vm4983_vm8 = vcmask 294144  }
 0x29a   : > { %1388 = vst.msk [vmem:[#allocation2 + $0x18] sm:$0xff] %vm441_vm3, %v1368_v33  ;;  %vm4984_vm2 = vmmov %vm4983_vm8 }
 0x29b   : > { %1923 = vrot.lane.b32.xlu0 %v3246_v38, %s3452_s8  ;;  %1436 = vst.msk [vmem:[#allocation2 + $0x18] sm:$0xff] %vm491_vm4, %v1416_v32 }
 0x29c   : > { %2028 = vrot.lane.b32.xlu1 %v3256_v52, %s3453_s9  ;;  %1484 = vst.msk [vmem:[#allocation2 + $0x18] sm:$0xff] %vm541_vm5, %v1464_v44  ;;  %v1509_v58 = vpop.permute.xlu0 %1508  ;;  %v2236_v44 = vld [vmem:[#allocation5 + $0x1] sm:$0xff] }
 0x29d   : > { %v1366_v45 = vpop.permute.xlu1 %1365  ;;  %1531 = vst.msk [vmem:[#allocation2 + $0x8] sm:$0xff] %vm590_vm6, %v1509_v58 }
 0x29e   : > { %1387 = vst.msk [vmem:[#allocation2 + $0x10] sm:$0xff] %vm441_vm3, %v1366_v45 }
 0x29f   : > { %2024 = vrot.lane.b32.xlu0 %v3254_v36, %s3453_s9 }
 0x2a0   : > { %2030 = vrot.lane.b32.xlu1 %v3257_v56, %s3453_s9  ;;  %v1557_v47 = vpop.permute.xlu0 %1556 }
 0x2a1   : > { %v1414_v60 = vpop.permute.xlu1 %1413  ;;  %1579 = vst.msk [vmem:[#allocation2 + $0x8] sm:$0xff] %vm639_vm7, %v1557_v47 }
 0x2a2   : > { %1435 = vst.msk [vmem:[#allocation2 + $0x10] sm:$0xff] %vm491_vm4, %v1414_v60 }
 0x2a3   : > { %2026 = vrot.lane.b32.xlu0 %v3255_v46, %s3453_s9 }
 0x2a4   : > { %1929 = vrot.lane.b32.xlu1 %v3249_v49, %s3452_s8  ;;  %v1462_v62 = vpop.permute.xlu0 %1461 }
 0x2a5   : > { %v1605_v53 = vpop.permute.xlu1 %1604  ;;  %1483 = vst.msk [vmem:[#allocation2 + $0x10] sm:$0xff] %vm541_vm5, %v1462_v62 }
 0x2a6   : > { %1627 = vst.msk [vmem:[#allocation2 + $0x8] sm:$0xff] %vm4983_vm8, %v1605_v53  ;;  %vm4985_vm8 = vcmask 97344   ;;  %v3259_v53 = vld [vmem:[%s3524_s30 + $0x1c0] sm:$0xff] }
 0x2a7   : > { %1915 = vrot.lane.b32.xlu0 %v3242_v54, %s3452_s8  ;;  %1532 = vst.msk [vmem:[#allocation2 + $0x10] sm:$0xff] %vm590_vm6, %v1511_v37  ;;  %v2773_v37 = vld [vmem:[#allocation6 + $0x81] sm:$0xff] }
 0x2a8   : > { %1580 = vst.msk [vmem:[#allocation2 + $0x10] sm:$0xff] %vm639_vm7, %v1559_v48  ;;  %2699 = vrot.lane.b32.xlu1 %v2676_v63, %s3463_s19 }
 0x2a9   : > { %1628 = vst.msk [vmem:[#allocation2 + $0x10] sm:$0xff] %vm4984_vm2, %v1607_v55  ;;  %vm4986_vm2 = vmmov %vm4985_vm8 }
 0x2ab   : > { %1815 = vrot.lane.b32.xlu0 %v3234_v35, %s3454_s10 }
 0x2ac   : > { %2748 = vrot.lane.b32.xlu1 %v2725_v3, %s3464_s20 }
 0x2ad   : > { %v1635_v8 = vld [vmem:[#allocation2 + $0x8] sm:$0xff] }
 0x2ae   : > { %3361 = vmatmul.mubr.msk.f32.vlgmr.msra.gmra.mxu1 %vm1654_vm10, %v1635_v8 }
 0x2af   : > { %2016 = vrot.lane.b32.xlu0 %v3250_v59, %s3453_s9  ;;  %v2124_v59 = vld [vmem:[#allocation4] sm:$0xff] }
 0x2b0   : > { %v1636_v9 = vld [vmem:[#allocation2 + $0x10] sm:$0xff]  ;;  %2796 = vrot.lane.b32.xlu1 %v2773_v37, %s3465_s21  ;;  %2132 = vst.msk [vmem:[#allocation2] sm:$0xff] %vm293_vm0, %v2124_v59 }
 0x2b1   : > { %3363 = vmatprep.mubr.msk.f32.mxu1 %vm1654_vm10, %v1636_v9 }
 0x2b3   : > { %2018 = vrot.lane.b32.xlu0 %v3251_v61, %s3453_s9  ;;  %v4469_v61 = vld [vmem:[%s4969_s4] ss:$0 sm:$0xff] }
 0x2b5   : > { %v1372_v0 = vpop.permute.xlu0 %1371 }
 0x2b6   : > { %v1420_v2 = vpop.permute.xlu1 %1419 }
 0x2b7   : > { %1829 = vrot.lane.b32.xlu0 %v3241_v57, %s3454_s10 }
 0x2b9   : > { %v1278_v6 = vpop.permute.xlu0 %1277 }
 0x2ba   : > { %v1326_v7 = vpop.permute.xlu1 %1325  ;;  %1295 = vst.msk [vmem:[#allocation2 + $0x30] sm:$0xff] %vm343_vm1, %v1278_v6 }
 0x2bb   : > { %1343 = vst.msk [vmem:[#allocation2 + $0x30] sm:$0xff] %vm4985_vm8, %v1326_v7  ;;  %2156 = vrot.lane.b32.xlu0 %v2140_v5, %s3453_s9  ;;  %vm4987_vm8 = vcmask 294144  }
 0x2bd   : > { %v1468_v11 = vpop.permute.xlu0 %1467 }
 0x2be   : > { %v1515_v12 = vpop.permute.xlu1 %1514 }
 0x2bf   : > { %2204 = vrot.lane.b32.xlu0 %v2188_v10, %s3452_s8 }
 0x2c1   : > { %v1276_v13 = vpop.permute.xlu0 %1275 }
 0x2c2   : > { %v1563_v14 = vpop.permute.xlu1 %1562  ;;  %1294 = vst.msk [vmem:[#allocation2 + $0x28] sm:$0xff] %vm343_vm1, %v1276_v13 }
 0x2c3   : > { %2252 = vrot.lane.b32.xlu0 %v2236_v44, %s3454_s10 }
 0x2c5   : > { %v1324_v15 = vpop.permute.xlu0 %1323 }
 0x2c6   : > { %v1611_v16 = vpop.permute.xlu1 %1610  ;;  %1342 = vst.msk [vmem:[#allocation2 + $0x28] sm:$0xff] %vm4986_vm2, %v1324_v15  ;;  %vm4988_vm2 = vmmov %vm4987_vm8 }
 0x2c7   : > { %1390 = vst.msk [vmem:[#allocation2 + $0x28] sm:$0xff] %vm441_vm3, %v1372_v0  ;;  %vm4991_vm15 = vmmov %vm4988_vm2 }
 0x2c8   : > { %1438 = vst.msk [vmem:[#allocation2 + $0x28] sm:$0xff] %vm491_vm4, %v1420_v2  ;;  %v3258_v2 = vld [vmem:[%s3524_s30 + $0x1b0] sm:$0xff] }
 0x2c9   : > { %1486 = vst.msk [vmem:[#allocation2 + $0x28] sm:$0xff] %vm541_vm5, %v1468_v11  ;;  %v1513_v17 = vpop.permute.xlu0 %1512 }
 0x2ca   : > { %v1370_v18 = vpop.permute.xlu1 %1369  ;;  %1533 = vst.msk [vmem:[#allocation2 + $0x18] sm:$0xff] %vm590_vm6, %v1513_v17 }
 0x2cb   : > { %1389 = vst.msk [vmem:[#allocation2 + $0x20] sm:$0xff] %vm441_vm3, %v1370_v18 }
 0x2cd   : > { %v1561_v19 = vpop.permute.xlu0 %1560 }
 0x2ce   : > { %v1418_v21 = vpop.permute.xlu1 %1417  ;;  %1581 = vst.msk [vmem:[#allocation2 + $0x18] sm:$0xff] %vm639_vm7, %v1561_v19  ;;  %v3260_v19 = vld [vmem:[%s3524_s30 + $0x1d0] sm:$0xff] }
 0x2cf   : > { %1437 = vst.msk [vmem:[#allocation2 + $0x20] sm:$0xff] %vm491_vm4, %v1418_v21 }
 0x2d1   : > { %v1466_v22 = vpop.permute.xlu0 %1465 }
 0x2d2   : > { %v1609_v23 = vpop.permute.xlu1 %1608  ;;  %1485 = vst.msk [vmem:[#allocation2 + $0x20] sm:$0xff] %vm541_vm5, %v1466_v22 }
 0x2d3   : > { %1629 = vst.msk [vmem:[#allocation2 + $0x18] sm:$0xff] %vm4987_vm8, %v1609_v23  ;;  %vm4989_vm8 = vcmask 97344  }
 0x2d4   : > { %1534 = vst.msk [vmem:[#allocation2 + $0x20] sm:$0xff] %vm590_vm6, %v1515_v12 }
 0x2d5   : > { %1582 = vst.msk [vmem:[#allocation2 + $0x20] sm:$0xff] %vm639_vm7, %v1563_v14  ;;  %v1376_v24 = vpop.permute.xlu0 %1375 }
 0x2d6   : > { %1630 = vst.msk [vmem:[#allocation2 + $0x20] sm:$0xff] %vm4988_vm2, %v1611_v16  ;;  %v1472_v25 = vpop.permute.xlu1 %1471  ;;  %v3261_v16 = vld [vmem:[%s3524_s30 + $0x1e0] sm:$0xff] }
 0x2d9   : > { %v1424_v26 = vpop.permute.xlu0 %1423 }
 0x2da   : > { %v1374_v20 = vpop.permute.xlu1 %1373  ;;  %v1637_v27 = vld [vmem:[#allocation2 + $0x18] sm:$0xff] }
 0x2db   : > { %1391 = vst.msk [vmem:[#allocation2 + $0x30] sm:$0xff] %vm441_vm3, %v1374_v20  ;;  %3364 = vmatmul.mubr.msk.f32.gmra.mxu1 %vm1654_vm10, %v1637_v27 }
 0x2dd   : > { %v1638_v28 = vld [vmem:[#allocation2 + $0x20] sm:$0xff]  ;;  %v1519_v29 = vpop.permute.xlu0 %1518 }
 0x2de   : > { %v1422_v30 = vpop.permute.xlu1 %1421  ;;  %3366 = vmatprep.mubr.msk.f32.mxu1 %vm1654_vm10, %v1638_v28 }
 0x2df   : > { %1439 = vst.msk [vmem:[#allocation2 + $0x30] sm:$0xff] %vm491_vm4, %v1422_v30 }
 0x2e1   : > { %v1567_v31 = vpop.permute.xlu0 %1566 }
 0x2e2   : > { %v1470_v33 = vpop.permute.xlu1 %1469 }
 0x2e3   : > { %1487 = vst.msk [vmem:[#allocation2 + $0x30] sm:$0xff] %vm541_vm5, %v1470_v33 }
 0x2e4   : > { %1536 = vst.msk [vmem:[#allocation2 + $0x30] sm:$0xff] %vm590_vm6, %v1519_v29 }
 0x2e5   : > { %1584 = vst.msk [vmem:[#allocation2 + $0x30] sm:$0xff] %vm639_vm7, %v1567_v31  ;;  %v1280_v32 = vpop.permute.xlu0 %1279 }
 0x2e6   : > { %1296 = vst.msk [vmem:[#allocation2 + $0x38] sm:$0xff] %vm343_vm1, %v1280_v32  ;;  %v1617_v39 = vpop.permute.xlu1 %1616 }
 0x2e9   : > { %v1328_v34 = vpop.permute.xlu0 %1327 }
 0x2ea   : > { %1344 = vst.msk [vmem:[#allocation2 + $0x38] sm:$0xff] %vm4989_vm8, %v1328_v34  ;;  %vm4990_vm8 = vmmov %vm4988_vm2  ;;  %v1818_v63 = vpop.permute.xlu1 %1817 }
 0x2eb   : > { %1392 = vst.msk [vmem:[#allocation2 + $0x38] sm:$0xff] %vm441_vm3, %v1376_v24 }
 0x2ec   : > { %1440 = vst.msk [vmem:[#allocation2 + $0x38] sm:$0xff] %vm491_vm4, %v1424_v26 }
 0x2ed   : > { %1488 = vst.msk [vmem:[#allocation2 + $0x38] sm:$0xff] %vm541_vm5, %v1472_v25  ;;  %v1517_v38 = vpop.permute.xlu0 %1516 }
 0x2ee   : > { %1537 = vst.msk [vmem:[#allocation2 + $0x38] sm:$0xff] %vm590_vm6, %v4303_v1  ;;  %1535 = vst.msk [vmem:[#allocation2 + $0x28] sm:$0xff] %vm590_vm6, %v1517_v38  ;;  %v1820_v13 = vpop.permute.xlu1 %1819 }
 0x2ef   : > { %1585 = vst.msk [vmem:[#allocation2 + $0x38] sm:$0xff] %vm639_vm7, %v4309_v4 }
 0x2f0   : > { %1633 = vst.msk [vmem:[#allocation2 + $0x38] sm:$0xff] %vm4988_vm2, %v1617_v39  ;;  %v3263_v39 = vld [vmem:[%s3524_s30 + $0x200] sm:$0xff] }
 0x2f1   : > { %v1565_v42 = vpop.permute.xlu0 %1564 }
 0x2f2   : > { %1583 = vst.msk [vmem:[#allocation2 + $0x28] sm:$0xff] %vm639_vm7, %v1565_v42  ;;  %v1922_v14 = vpop.permute.xlu1 %1921 }
 0x2f5   : > { %v1613_v43 = vpop.permute.xlu0 %1612 }
 0x2f6   : > { %1631 = vst.msk [vmem:[#allocation2 + $0x28] sm:$0xff] %vm4990_vm8, %v1613_v43  ;;  %v1822_v24 = vpop.permute.xlu1 %1821 }
 0x2f7   : > { %v1641_v4 = vld [vmem:[#allocation2 + $0x38] sm:$0xff] }
 0x2f9   : > { %v1615_v36 = vpop.permute.xlu0 %1614 }
 0x2fa   : > { %1632 = vst.msk [vmem:[#allocation2 + $0x30] sm:$0xff] %vm4991_vm15, %v1615_v36  ;;  %vm4992_vm15 = vcmask 97344   ;;  %v1824_v28 = vpop.permute.xlu1 %1823  ;;  %v3262_v36 = vld [vmem:[%s3524_s30 + $0x1f0] sm:$0xff] }
 0x2fd   : > { %v1639_v1 = vld [vmem:[#allocation2 + $0x28] sm:$0xff]  ;;  %v1918_v46 = vpop.permute.xlu0 %1917 }
 0x2fe   : > { %3367 = vmatmul.mubr.msk.f32.gmra.mxu1 %vm1654_vm10, %v1639_v1  ;;  %v1926_v31 = vpop.permute.xlu1 %1925 }
 0x301   : > { %v1640_v50 = vld [vmem:[#allocation2 + $0x30] sm:$0xff]  ;;  %v4450_v51 = vpop.permute.xlu0 %1919 }
 0x302   : > { %3369 = vmatprep.mubr.msk.f32.mxu1 %vm1654_vm10, %v1640_v50  ;;  %v1826_v33 = vpop.permute.xlu1 %1825 }
 0x303   : > { %3370 = vmatmul.mubr.msk.f32.gmra.mxu1 %vm1654_vm10, %v1641_v4  ;;  %vm4993_vm10 = vmmov %vm4992_vm15 }
 0x304   : > { %vm4994_vm2 = vmmov %vm4993_vm10 }
 0x305   : > { %v4452_v48 = vpop.permute.xlu0 %2020 }
 0x306   : > { %v1928_v32 = vpop.permute.xlu1 %1927 }
 0x309   : > { %v2023_v40 = vpop.permute.xlu0 %2022 }
 0x30a   : > { %v1828_v34 = vpop.permute.xlu1 %1827 }
 0x30d   : > { %v4454_v54 = vpop.permute.xlu0 %1923 }
 0x30e   : > { %v2029_v50 = vpop.permute.xlu1 %2028 }
 0x311   : > { %v4456_v41 = vpop.permute.xlu0 %2024 }
 0x315   : > { %v4458_v55 = vpop.permute.xlu0 %2026 }
 0x319   : > { %v1916_v52 = vpop.permute.xlu0 %1915 }
 0x31d   : > { %v1816_v35 = vpop.permute.xlu0 %1815 }
 0x321   : > { %v2017_v58 = vpop.permute.xlu0 %2016 }
 0x325   : > { %v2019_v45 = vpop.permute.xlu0 %2018 }
 0x329   : > { %v4460_v56 = vpop.permute.xlu0 %1829 }
 0x32d   : > { %v2157_v47 = vpop.permute.xlu0 %2156 }
 0x32e   : > { %2180 = vst.msk [vmem:[#allocation2] sm:$0xff] %vm343_vm1, %v2157_v47 }
 0x331   : > { %v2205_v60 = vpop.permute.xlu0 %2204 }
 0x332   : > { %2228 = vst.msk [vmem:[#allocation2] sm:$0xff] %vm4992_vm15, %v2205_v60  ;;  %v2031_v60 = vpop.permute.xlu1 %2030  ;;  %vm4995_vm15 = vcmask 359744  }
 0x335   : > { %v2253_v49 = vpop.permute.xlu0 %2252 }
 0x336   : > { %2276 = vst.msk [vmem:[#allocation2] sm:$0xff] %vm441_vm3, %v2253_v49 }
 0x36e   : > { %v3362_v62 = vpop.f32.mrf.mxu1 }
 0x36f   : > { %v1755_v57 = vadd.f32 %v3362_v62, %v4469_v61 }
 0x370   : > { %v1749_v0 = vpop.f32.mrf.mxu1 }
 0x371   : > { %v2109_v3 = vsub.f32 %v1755_v57, %v3259_v53  ;;  %v1840_v5 = vsub.f32 %v1755_v57, %v1818_v63  ;;  %v1750_v6 = vadd.f32 %v4469_v61, %v1749_v0  ;;  %v1940_v7 = vsub.f32 %v1755_v57, %v1918_v46 }
 0x372   : > { %v2041_v9 = vsub.f32 %v1755_v57, %v2019_v45 }
 0x373   : > { %2117 = vst.msk [vmem:[#allocation7 + $0x10] sm:$0xff] %vm293_vm0, %v2109_v3  ;;  %v2108_v8 = vsub.f32 %v1750_v6, %v3258_v2  ;;  %1857 = vrot.lane.b32.xlu1 %v1840_v5, %s3468_s27  ;;  %1957 = vrot.lane.b32.xlu0 %v1940_v7, %s3469_s28  ;;  %v1939_v10 = vsub.f32 %v1750_v6, %v1916_v52 }
 0x374   : > { %v1839_v11 = vsub.f32 %v1750_v6, %v1816_v35  ;;  %v2040_v12 = vsub.f32 %v1750_v6, %v2017_v58  ;;  %v3264_v35 = vld [vmem:[%s3524_s30 + $0x210] sm:$0xff] }
 0x375   : > { %2116 = vst.msk [vmem:[#allocation7] sm:$0xff] %vm293_vm0, %v2108_v8 }
 0x377   : > { %2058 = vrot.lane.b32.xlu0 %v2041_v9, %s3470_s29 }
 0x37a   : > { %v2333_v59 = vld [vmem:[#allocation7 + $0x10] sm:$0xff] }
 0x37b   : > { %1955 = vrot.lane.b32.xlu0 %v1939_v10, %s3469_s28  ;;  %v4514_v62 = vld [vmem:[#allocation7 + $0x11] sm:$0xff] }
 0x37c   : > { %v2332_v5 = vld [vmem:[#allocation7] sm:$0xff] }
 0x37d   : > { %v2428_v7 = vld [vmem:[#allocation7 + $0x1] sm:$0xff] }
 0x37f   : > { %1855 = vrot.lane.b32.xlu0 %v1839_v11, %s3468_s27 }
 0x383   : > { %2056 = vrot.lane.b32.xlu0 %v2040_v12, %s3470_s29 }
 0x39b   : > { %v3365_v15 = vpop.f32.mrf.mxu1 }
 0x39c   : > { %v1765_v17 = vadd.f32 %v3365_v15, %v4469_v61 }
 0x39d   : > { %v1759_v18 = vpop.f32.mrf.mxu1 }
 0x39e   : > { %v2111_v21 = vsub.f32 %v1765_v17, %v3261_v16  ;;  %v1760_v22 = vadd.f32 %v4469_v61, %v1759_v18  ;;  %v1942_v23 = vsub.f32 %v1765_v17, %v1922_v14  ;;  %v2043_v25 = vsub.f32 %v1765_v17, %v2023_v40 }
 0x39f   : > { %v1842_v20 = vsub.f32 %v1765_v17, %v1822_v24 }
 0x3a0   : > { %2119 = vst.msk [vmem:[#allocation7 + $0x30] sm:$0xff] %vm293_vm0, %v2111_v21  ;;  %v2110_v26 = vsub.f32 %v1760_v22, %v3260_v19  ;;  %1961 = vrot.lane.b32.xlu1 %v1942_v23, %s3469_s28  ;;  %2062 = vrot.lane.b32.xlu0 %v2043_v25, %s3470_s29  ;;  %v1941_v27 = vsub.f32 %v1760_v22, %v4450_v51 }
 0x3a1   : > { %v1841_v29 = vsub.f32 %v1760_v22, %v1820_v13  ;;  %v2042_v30 = vsub.f32 %v1760_v22, %v4452_v48  ;;  %v3265_v48 = vld [vmem:[%s3524_s30 + $0x220] sm:$0xff] }
 0x3a2   : > { %2118 = vst.msk [vmem:[#allocation7 + $0x20] sm:$0xff] %vm293_vm0, %v2110_v26 }
 0x3a4   : > { %1861 = vrot.lane.b32.xlu1 %v1842_v20, %s3468_s27  ;;  %1959 = vrot.lane.b32.xlu0 %v1941_v27, %s3469_s28 }
 0x3a7   : > { %v2720_v2 = vld [vmem:[#allocation7 + $0x30] sm:$0xff] }
 0x3a8   : > { %1859 = vrot.lane.b32.xlu1 %v1841_v29, %s3468_s27  ;;  %2060 = vrot.lane.b32.xlu0 %v2042_v30, %s3470_s29  ;;  %v2816_v3 = vld [vmem:[#allocation7 + $0x31] sm:$0xff] }
 0x3a9   : > { %v2334_v11 = vld [vmem:[#allocation7 + $0x20] sm:$0xff] }
 0x3be   : > { %v3368_v38 = vpop.f32.mrf.mxu1 }
 0x3bf   : > { %v1775_v42 = vadd.f32 %v3368_v38, %v4469_v61 }
 0x3c0   : > { %v1769_v43 = vpop.f32.mrf.mxu1 }
 0x3c1   : > { %v2113_v44 = vsub.f32 %v1775_v42, %v3263_v39  ;;  %v1770_v37 = vadd.f32 %v4469_v61, %v1769_v43  ;;  %v1944_v1 = vsub.f32 %v1775_v42, %v1926_v31  ;;  %v2045_v4 = vsub.f32 %v1775_v42, %v4458_v55 }
 0x3c2   : > { %v1844_v58 = vsub.f32 %v1775_v42, %v1826_v33 }
 0x3c3   : > { %2121 = vst.msk [vmem:[#allocation7 + $0x50] sm:$0xff] %vm293_vm0, %v2113_v44  ;;  %v2112_v46 = vsub.f32 %v1770_v37, %v3262_v36  ;;  %v3371_v51 = vpop.f32.mrf.mxu1  ;;  %1965 = vrot.lane.b32.xlu1 %v1944_v1, %s3469_s28  ;;  %2066 = vrot.lane.b32.xlu0 %v2045_v4, %s3470_s29  ;;  %v1843_v49 = vsub.f32 %v1770_v37, %v1824_v28 }
 0x3c4   : > { %v1785_v40 = vadd.f32 %v3371_v51, %v4469_v61  ;;  %v1943_v57 = vsub.f32 %v1770_v37, %v4454_v54  ;;  %v2044_v0 = vsub.f32 %v1770_v37, %v4456_v41 }
 0x3c5   : > { %2120 = vst.msk [vmem:[#allocation7 + $0x40] sm:$0xff] %vm293_vm0, %v2112_v46  ;;  %v1779_v52 = vpop.f32.mrf.mxu1 }
 0x3c6   : > { %v2115_v45 = vsub.f32 %v1785_v40, %v3265_v48  ;;  %v1780_v55 = vadd.f32 %v4469_v61, %v1779_v52  ;;  %v2047_v53 = vsub.f32 %v1785_v40, %v2031_v60  ;;  %v1930_v61 = vpop.permute.xlu1 %1929  ;;  %v1846_v41 = vsub.f32 %v1785_v40, %v4460_v56  ;;  %v4544_v56 = vld [vmem:[#allocation7 + $0x21] sm:$0xff] }
 0x3c7   : > { %1865 = vrot.lane.b32.xlu1 %v1844_v58, %s3468_s27  ;;  %2350 = vrot.lane.b32.xlu0 %v2333_v59, %s3456_s12  ;;  %v1946_v63 = vsub.f32 %v1785_v40, %v1930_v61 }
 0x3c8   : > { %2123 = vst.msk [vmem:[#allocation7 + $0x70] sm:$0xff] %vm293_vm0, %v2115_v45  ;;  %v2114_v47 = vsub.f32 %v1780_v55, %v3264_v35  ;;  %v1945_v6 = vsub.f32 %v1780_v55, %v1928_v32  ;;  %v1845_v8 = vsub.f32 %v1780_v55, %v1828_v34  ;;  %v2046_v9 = vsub.f32 %v1780_v55, %v2029_v50 }
 0x3ca   : > { %2122 = vst.msk [vmem:[#allocation7 + $0x60] sm:$0xff] %vm293_vm0, %v2114_v47  ;;  %v4531_v54 = vpop.permute.xlu1 %2699  ;;  %v2337_v16 = vld [vmem:[#allocation7 + $0x50] sm:$0xff] }
 0x3cb   : > { %1863 = vrot.lane.b32.xlu1 %v1843_v49, %s3468_s27  ;;  %2446 = vrot.lane.b32.xlu0 %v4514_v62, %s3458_s14  ;;  %v2433_v19 = vld [vmem:[#allocation7 + $0x51] sm:$0xff] }
 0x3cc   : > { %v2336_v15 = vld [vmem:[#allocation7 + $0x40] sm:$0xff] }
 0x3cd   : > { %v2432_v18 = vld [vmem:[#allocation7 + $0x41] sm:$0xff] }
 0x3ce   : > { %v4536_v10 = vpop.permute.xlu1 %2748 }
 0x3cf   : > { %2070 = vrot.lane.b32.xlu1 %v2047_v53, %s3470_s29  ;;  %2734 = vrot.lane.b32.xlu0 %v2333_v59, %s3464_s20  ;;  %v2339_v23 = vld [vmem:[#allocation7 + $0x70] sm:$0xff] }
 0x3d0   : > { %v4560_v25 = vld [vmem:[#allocation7 + $0x71] sm:$0xff] }
 0x3d1   : > { %v2338_v20 = vld [vmem:[#allocation7 + $0x60] sm:$0xff] }
 0x3d2   : > { %v4542_v12 = vpop.permute.xlu1 %2796  ;;  %v2434_v28 = vld [vmem:[#allocation7 + $0x61] sm:$0xff] }
 0x3d3   : > { %1969 = vrot.lane.b32.xlu1 %v1946_v63, %s3469_s28  ;;  %1963 = vrot.lane.b32.xlu0 %v1943_v57, %s3469_s28 }
 0x3d7   : > { %2738 = vrot.lane.b32.xlu1 %v2720_v2, %s3464_s20  ;;  %2064 = vrot.lane.b32.xlu0 %v2044_v0, %s3470_s29 }
 0x3db   : > { %2834 = vrot.lane.b32.xlu1 %v2816_v3, %s3466_s22  ;;  %2348 = vrot.lane.b32.xlu0 %v2332_v5, %s3456_s12 }
 0x3df   : > { %1967 = vrot.lane.b32.xlu1 %v1945_v6, %s3469_s28  ;;  %2444 = vrot.lane.b32.xlu0 %v2428_v7, %s3458_s14 }
 0x3e3   : > { %1867 = vrot.lane.b32.xlu1 %v1845_v8, %s3468_s27  ;;  %1869 = vrot.lane.b32.xlu0 %v1846_v41, %s3468_s27 }
 0x3e5   : > { %v1858_v13 = vpop.permute.xlu1 %1857  ;;  %v1958_v14 = vpop.permute.xlu0 %1957 }
 0x3e6   : > { %1881 = vst.msk [vmem:[#allocation4 + $0x21] sm:$0xff] %vm293_vm0, %v1858_v13  ;;  %1981 = vst.msk [vmem:[#allocation5 + $0x20] sm:$0xff] %vm293_vm0, %v1958_v14 }
 0x3e7   : > { %2068 = vrot.lane.b32.xlu1 %v2046_v9, %s3470_s29  ;;  %2354 = vrot.lane.b32.xlu0 %v2720_v2, %s3456_s12 }
 0x3e9   : > { %v2059_v17 = vpop.permute.xlu0 %2058 }
 0x3ea   : > { %2081 = vst.msk [vmem:[#allocation6 + $0x11] sm:$0xff] %vm293_vm0, %v2059_v17 }
 0x3eb   : > { %2352 = vrot.lane.b32.xlu1 %v2334_v11, %s3456_s12  ;;  %2450 = vrot.lane.b32.xlu0 %v2816_v3, %s3458_s14 }
 0x3ed   : > { %v2477_v21 = vld [vmem:[#allocation4 + $0x20] sm:$0xff]  ;;  %v1956_v22 = vpop.permute.xlu0 %1955  ;;  %v2142_v29 = vld [vmem:[#allocation5 + $0x20] sm:$0xff] }
 0x3ee   : > { %2134 = vst.msk [vmem:[#allocation2 + $0x10] sm:$0xff] %vm293_vm0, %v2477_v21  ;;  %1980 = vst.msk [vmem:[#allocation5 + $0x10] sm:$0xff] %vm293_vm0, %v1956_v22  ;;  %v2190_v30 = vld [vmem:[#allocation4 + $0x21] sm:$0xff]  ;;  %v2238_v32 = vld [vmem:[#allocation5 + $0x21] sm:$0xff] }
 0x3ef   : > { %2448 = vrot.lane.b32.xlu1 %v4544_v56, %s3458_s14  ;;  %2736 = vrot.lane.b32.xlu0 %v2334_v11, %s3464_s20 }
 0x3f1   : > { %v1856_v24 = vpop.permute.xlu0 %1855  ;;  %v2285_v39 = vld [vmem:[#allocation6 + $0x10] sm:$0xff] }
 0x3f2   : > { %1880 = vst.msk [vmem:[#allocation4 + $0x11] sm:$0xff] %vm293_vm0, %v1856_v24  ;;  %v2381_v36 = vld [vmem:[#allocation6 + $0x11] sm:$0xff] }
 0x3f3   : > { %2356 = vrot.lane.b32.xlu1 %v2336_v15, %s3456_s12  ;;  %2358 = vrot.lane.b32.xlu0 %v2337_v16, %s3456_s12 }
 0x3f5   : > { %v2057_v26 = vpop.permute.xlu0 %2056  ;;  %v2141_v1 = vld [vmem:[#allocation5 + $0x10] sm:$0xff] }
 0x3f6   : > { %2080 = vst.msk [vmem:[#allocation6 + $0x1] sm:$0xff] %vm293_vm0, %v2057_v26  ;;  %v2237_v50 = vld [vmem:[#allocation5 + $0x11] sm:$0xff] }
 0x3f7   : > { %2452 = vrot.lane.b32.xlu1 %v2432_v18, %s3458_s14  ;;  %2454 = vrot.lane.b32.xlu0 %v2433_v19, %s3458_s14 }
 0x3f9   : > { %v2476_v27 = vld [vmem:[#allocation4 + $0x10] sm:$0xff] }
 0x3fa   : > { %2133 = vst.msk [vmem:[#allocation2 + $0x8] sm:$0xff] %vm293_vm0, %v2476_v27  ;;  %v2189_v4 = vld [vmem:[#allocation4 + $0x11] sm:$0xff] }
 0x3fb   : > { %2362 = vrot.lane.b32.xlu1 %v2339_v23, %s3456_s12  ;;  %2742 = vrot.lane.b32.xlu0 %v2337_v16, %s3464_s20 }
 0x3fd   : > { %v2284_v46 = vld [vmem:[#allocation6] sm:$0xff] }
 0x3fe   : > { %v2380_v51 = vld [vmem:[#allocation6 + $0x1] sm:$0xff] }
 0x3ff   : > { %2458 = vrot.lane.b32.xlu1 %v4560_v25, %s3458_s14  ;;  %2838 = vrot.lane.b32.xlu0 %v2433_v19, %s3466_s22 }
 0x403   : > { %2746 = vrot.lane.b32.xlu1 %v2339_v23, %s3464_s20  ;;  %2740 = vrot.lane.b32.xlu0 %v2336_v15, %s3464_s20 }
 0x407   : > { %2360 = vrot.lane.b32.xlu1 %v2338_v20, %s3456_s12  ;;  %2836 = vrot.lane.b32.xlu0 %v2432_v18, %s3466_s22 }
 0x40b   : > { %2456 = vrot.lane.b32.xlu1 %v2434_v28, %s3458_s14  ;;  %2160 = vrot.lane.b32.xlu0 %v2142_v29, %s3453_s9 }
 0x40f   : > { %2744 = vrot.lane.b32.xlu1 %v2338_v20, %s3464_s20  ;;  %2208 = vrot.lane.b32.xlu0 %v2190_v30, %s3452_s8 }
 0x412   : > { %v1962_v31 = vpop.permute.xlu1 %1961  ;;  %v2063_v33 = vpop.permute.xlu0 %2062 }
 0x413   : > { %1983 = vst.msk [vmem:[#allocation5 + $0x40] sm:$0xff] %vm293_vm0, %v1962_v31  ;;  %2083 = vst.msk [vmem:[#allocation6 + $0x31] sm:$0xff] %vm293_vm0, %v2063_v33  ;;  %2840 = vrot.lane.b32.xlu1 %v2434_v28, %s3466_s22  ;;  %2256 = vrot.lane.b32.xlu0 %v2238_v32, %s3454_s10 }
 0x416   : > { %v1862_v34 = vpop.permute.xlu1 %1861  ;;  %v1960_v38 = vpop.permute.xlu0 %1959 }
 0x417   : > { %1883 = vst.msk [vmem:[#allocation4 + $0x41] sm:$0xff] %vm293_vm0, %v1862_v34  ;;  %1982 = vst.msk [vmem:[#allocation5 + $0x30] sm:$0xff] %vm293_vm0, %v1960_v38  ;;  %2494 = vrot.lane.b32.xlu1 %v2477_v21, %s3459_s15  ;;  %2302 = vrot.lane.b32.xlu0 %v2285_v39, %s3455_s11 }
 0x41a   : > { %v1860_v42 = vpop.permute.xlu1 %1859  ;;  %v2061_v43 = vpop.permute.xlu0 %2060  ;;  %v2144_v52 = vld [vmem:[#allocation5 + $0x40] sm:$0xff] }
 0x41b   : > { %1882 = vst.msk [vmem:[#allocation4 + $0x31] sm:$0xff] %vm293_vm0, %v1860_v42  ;;  %2082 = vst.msk [vmem:[#allocation6 + $0x21] sm:$0xff] %vm293_vm0, %v2061_v43  ;;  %2542 = vrot.lane.b32.xlu1 %v2142_v29, %s3460_s16  ;;  %2398 = vrot.lane.b32.xlu0 %v2381_v36, %s3457_s13  ;;  %v2287_v55 = vld [vmem:[#allocation6 + $0x30] sm:$0xff] }
 0x41c   : > { %v2240_v60 = vld [vmem:[#allocation5 + $0x41] sm:$0xff] }
 0x41d   : > { %v2383_v49 = vld [vmem:[#allocation6 + $0x31] sm:$0xff] }
 0x41e   : > { %v2479_v44 = vld [vmem:[#allocation4 + $0x40] sm:$0xff] }
 0x41f   : > { %2136 = vst.msk [vmem:[#allocation2 + $0x20] sm:$0xff] %vm293_vm0, %v2479_v44  ;;  %2590 = vrot.lane.b32.xlu1 %v2190_v30, %s3461_s17  ;;  %2782 = vrot.lane.b32.xlu0 %v2381_v36, %s3465_s21  ;;  %v2192_v45 = vld [vmem:[#allocation4 + $0x41] sm:$0xff] }
 0x420   : > { %v2143_v6 = vld [vmem:[#allocation5 + $0x30] sm:$0xff] }
 0x421   : > { %v2239_v13 = vld [vmem:[#allocation5 + $0x31] sm:$0xff] }
 0x422   : > { %v4591_v37 = vld [vmem:[#allocation4 + $0x30] sm:$0xff]  ;;  %v2286_v14 = vld [vmem:[#allocation6 + $0x20] sm:$0xff] }
 0x423   : > { %2135 = vst.msk [vmem:[#allocation2 + $0x18] sm:$0xff] %vm293_vm0, %v4591_v37  ;;  %2638 = vrot.lane.b32.xlu1 %v2238_v32, %s3462_s18  ;;  %2158 = vrot.lane.b32.xlu0 %v2141_v1, %s3453_s9  ;;  %v2191_v8 = vld [vmem:[#allocation4 + $0x31] sm:$0xff]  ;;  %v2382_v17 = vld [vmem:[#allocation6 + $0x21] sm:$0xff] }
 0x427   : > { %2685 = vrot.lane.b32.xlu1 %v2285_v39, %s3463_s19  ;;  %2206 = vrot.lane.b32.xlu0 %v2189_v4, %s3452_s8 }
 0x42b   : > { %2540 = vrot.lane.b32.xlu1 %v2141_v1, %s3460_s16  ;;  %2254 = vrot.lane.b32.xlu0 %v2237_v50, %s3454_s10 }
 0x42f   : > { %2588 = vrot.lane.b32.xlu1 %v2189_v4, %s3461_s17  ;;  %2300 = vrot.lane.b32.xlu0 %v2284_v46, %s3455_s11 }
 0x433   : > { %2636 = vrot.lane.b32.xlu1 %v2237_v50, %s3462_s18  ;;  %2396 = vrot.lane.b32.xlu0 %v2380_v51, %s3457_s13  ;;  %v2876_v50 = vld [vmem:[%s4970_s5 + $0x30] sm:$0xff] }
 0x435   : > { %v1966_v48 = vpop.permute.xlu1 %1965  ;;  %v2067_v40 = vpop.permute.xlu0 %2066 }
 0x436   : > { %1985 = vst.msk [vmem:[#allocation5 + $0x60] sm:$0xff] %vm293_vm0, %v1966_v48  ;;  %2085 = vst.msk [vmem:[#allocation6 + $0x51] sm:$0xff] %vm293_vm0, %v2067_v40  ;;  %v2875_v48 = vld [vmem:[%s4970_s5 + $0x28] sm:$0xff] }
 0x437   : > { %2164 = vrot.lane.b32.xlu1 %v2144_v52, %s3453_s9  ;;  %2492 = vrot.lane.b32.xlu0 %v2476_v27, %s3459_s15 }
 0x439   : > { %v1866_v35 = vpop.permute.xlu1 %1865  ;;  %v4609_v58 = vpop.permute.xlu0 %2350 }
 0x43a   : > { %1885 = vst.msk [vmem:[#allocation4 + $0x61] sm:$0xff] %vm293_vm0, %v1866_v35  ;;  %v2874_v35 = vld [vmem:[%s4970_s5 + $0x20] sm:$0xff] }
 0x43b   : > { %2212 = vrot.lane.b32.xlu1 %v2192_v45, %s3452_s8  ;;  %2306 = vrot.lane.b32.xlu0 %v2287_v55, %s3455_s11 }
 0x43d   : > { %v1864_v59 = vpop.permute.xlu1 %1863  ;;  %v4614_v47 = vpop.permute.xlu0 %2446  ;;  %v2289_v23 = vld [vmem:[#allocation6 + $0x50] sm:$0xff] }
 0x43e   : > { %1884 = vst.msk [vmem:[#allocation4 + $0x51] sm:$0xff] %vm293_vm0, %v1864_v59  ;;  %v2385_v27 = vld [vmem:[#allocation6 + $0x51] sm:$0xff] }
 0x43f   : > { %2260 = vrot.lane.b32.xlu1 %v2240_v60, %s3454_s10  ;;  %2402 = vrot.lane.b32.xlu0 %v2383_v49, %s3457_s13  ;;  %v2146_v33 = vld [vmem:[#allocation5 + $0x60] sm:$0xff]  ;;  %v2873_v59 = vld [vmem:[%s4970_s5 + $0x18] sm:$0xff] }
 0x440   : > { %v2242_v43 = vld [vmem:[#allocation5 + $0x61] sm:$0xff] }
 0x441   : > { %v2071_v53 = vpop.permute.xlu1 %2070  ;;  %v4619_v61 = vpop.permute.xlu0 %2734  ;;  %v2481_v63 = vld [vmem:[#allocation4 + $0x60] sm:$0xff] }
 0x442   : > { %2087 = vst.msk [vmem:[#allocation6 + $0x71] sm:$0xff] %vm293_vm0, %v2071_v53  ;;  %2138 = vst.msk [vmem:[#allocation2 + $0x30] sm:$0xff] %vm293_vm0, %v2481_v63  ;;  %v2194_v38 = vld [vmem:[#allocation4 + $0x61] sm:$0xff] }
 0x443   : > { %2689 = vrot.lane.b32.xlu1 %v2287_v55, %s3463_s19  ;;  %2498 = vrot.lane.b32.xlu0 %v2479_v44, %s3459_s15 }
 0x445   : > { %v1970_v57 = vpop.permute.xlu1 %1969  ;;  %v1964_v0 = vpop.permute.xlu0 %1963  ;;  %v4625_v2 = vld [vmem:[#allocation4 + $0x50] sm:$0xff] }
 0x446   : > { %1987 = vst.msk [vmem:[#allocation5 + $0x80] sm:$0xff] %vm293_vm0, %v1970_v57  ;;  %1984 = vst.msk [vmem:[#allocation5 + $0x50] sm:$0xff] %vm293_vm0, %v1964_v0 }
 0x447   : > { %2137 = vst.msk [vmem:[#allocation2 + $0x28] sm:$0xff] %vm293_vm0, %v4625_v2  ;;  %2786 = vrot.lane.b32.xlu1 %v2383_v49, %s3465_s21  ;;  %2546 = vrot.lane.b32.xlu0 %v2144_v52, %s3460_s16 }
 0x449   : > { %v4633_v3 = vpop.permute.xlu1 %2738  ;;  %v2065_v5 = vpop.permute.xlu0 %2064 }
 0x44a   : > { %2084 = vst.msk [vmem:[#allocation6 + $0x41] sm:$0xff] %vm293_vm0, %v2065_v5  ;;  %v2871_v5 = vld [vmem:[%s4970_s5 + $0x8] sm:$0xff] }
 0x44b   : > { %2594 = vrot.lane.b32.xlu0 %v2192_v45, %s3461_s17  ;;  %2162 = vrot.lane.b32.xlu1 %v2143_v6, %s3453_s9  ;;  %v2193_v45 = vld [vmem:[#allocation4 + $0x51] sm:$0xff] }
 0x44d   : > { %v4638_v7 = vpop.permute.xlu1 %2834  ;;  %v4640_v41 = vpop.permute.xlu0 %2348  ;;  %v2145_v46 = vld [vmem:[#allocation5 + $0x50] sm:$0xff] }
 0x44e   : > { %v2241_v53 = vld [vmem:[#allocation5 + $0x51] sm:$0xff] }
 0x44f   : > { %2642 = vrot.lane.b32.xlu0 %v2240_v60, %s3462_s18  ;;  %2210 = vrot.lane.b32.xlu1 %v2191_v8, %s3452_s8 }
 0x451   : > { %v1968_v9 = vpop.permute.xlu1 %1967  ;;  %v4644_v11 = vpop.permute.xlu0 %2444  ;;  %v2288_v51 = vld [vmem:[#allocation6 + $0x40] sm:$0xff] }
 0x452   : > { %1986 = vst.msk [vmem:[#allocation5 + $0x70] sm:$0xff] %vm293_vm0, %v1968_v9  ;;  %v2384_v55 = vld [vmem:[#allocation6 + $0x41] sm:$0xff] }
 0x453   : > { %2258 = vrot.lane.b32.xlu1 %v2239_v13, %s3454_s10  ;;  %2304 = vrot.lane.b32.xlu0 %v2286_v14, %s3455_s11 }
 0x455   : > { %v1868_v15 = vpop.permute.xlu1 %1867  ;;  %v1870_v16 = vpop.permute.xlu0 %1869 }
 0x456   : > { %1886 = vst.msk [vmem:[#allocation4 + $0x71] sm:$0xff] %vm293_vm0, %v1868_v15  ;;  %1887 = vst.msk [vmem:[#allocation4 + $0x81] sm:$0xff] %vm293_vm0, %v1870_v16 }
 0x457   : > { %2400 = vrot.lane.b32.xlu1 %v2382_v17, %s3457_s13  ;;  %2687 = vrot.lane.b32.xlu0 %v2286_v14, %s3463_s19 }
 0x459   : > { %v2069_v18 = vpop.permute.xlu1 %2068  ;;  %v4653_v19 = vpop.permute.xlu0 %2354 }
 0x45a   : > { %2086 = vst.msk [vmem:[#allocation6 + $0x61] sm:$0xff] %vm293_vm0, %v2069_v18  ;;  %v2531_v18 = vld [vmem:[#allocation5 + $0x80] sm:$0xff] }
 0x45b   : > { %2496 = vrot.lane.b32.xlu1 %v4591_v37, %s3459_s15  ;;  %2784 = vrot.lane.b32.xlu0 %v2382_v17, %s3465_s21  ;;  %v2877_v37 = vld [vmem:[%s4970_s5 + $0x38] sm:$0xff]  ;;  %v2291_v17 = vld [vmem:[#allocation6 + $0x70] sm:$0xff] }
 0x45c   : > { %3400 = vmatprep.subr.mxu1 %v2877_v37  ;;  %3372 = vmatprep.subr.mxu0 %v2877_v37 }
 0x45d   : > { %v4659_v21 = vpop.permute.xlu1 %2352  ;;  %v4661_v22 = vpop.permute.xlu0 %2450  ;;  %v4663_v24 = vld [vmem:[#allocation4 + $0x70] sm:$0xff]  ;;  %3408 = vmatpush3.msra.mxu1 %v2877_v37  ;;  %3373 = vmatpush3.msra.mxu0 %v2877_v37  ;;  %v2483_v14 = vld [vmem:[#allocation4 + $0x80] sm:$0xff] }
 0x45e   : > { %2139 = vst.msk [vmem:[#allocation2 + $0x38] sm:$0xff] %vm293_vm0, %v4663_v24  ;;  %3401 = vmatprep.subr.mxu1 %v2876_v50  ;;  %3374 = vmatprep.subr.mxu0 %v2876_v50 }
 0x45f   : > { %2544 = vrot.lane.b32.xlu1 %v2143_v6, %s3460_s16  ;;  %2310 = vrot.lane.b32.xlu0 %v2289_v23, %s3455_s11 }
 0x460   : > { %3409 = vmatpush3.msra.mxu1 %v2876_v50  ;;  %3375 = vmatpush3.msra.mxu0 %v2876_v50  ;;  %v2627_v50 = vld [vmem:[#allocation5 + $0x81] sm:$0xff] }
 0x461   : > { %v4669_v26 = vpop.permute.xlu1 %2448  ;;  %v4671_v20 = vpop.permute.xlu0 %2736  ;;  %3402 = vmatprep.subr.mxu1 %v2875_v48  ;;  %3376 = vmatprep.subr.mxu0 %v2875_v48 }
 0x462   : > { %3410 = vmatpush3.msra.mxu1 %v2875_v48  ;;  %3377 = vmatpush3.msra.mxu0 %v2875_v48  ;;  %v2147_v48 = vld [vmem:[#allocation5 + $0x70] sm:$0xff] }
 0x463   : > { %2592 = vrot.lane.b32.xlu1 %v2191_v8, %s3461_s17  ;;  %2406 = vrot.lane.b32.xlu0 %v2385_v27, %s3457_s13 }
 0x464   : > { %3403 = vmatprep.subr.mxu1 %v2874_v35  ;;  %3378 = vmatprep.subr.mxu0 %v2874_v35 }
 0x465   : > { %v4675_v28 = vpop.permute.xlu1 %2356  ;;  %v4677_v29 = vpop.permute.xlu0 %2358  ;;  %3411 = vmatpush3.msra.mxu1 %v2874_v35  ;;  %3379 = vmatpush3.msra.mxu0 %v2874_v35 }
 0x466   : > { %3404 = vmatprep.subr.mxu1 %v2873_v59  ;;  %3380 = vmatprep.subr.mxu0 %v2873_v59 }
 0x467   : > { %2640 = vrot.lane.b32.xlu1 %v2239_v13, %s3462_s18  ;;  %2502 = vrot.lane.b32.xlu0 %v2481_v63, %s3459_s15  ;;  %v2872_v63 = vld [vmem:[%s4970_s5 + $0x10] sm:$0xff] }
 0x468   : > { %3412 = vmatpush3.msra.mxu1 %v2873_v59  ;;  %3381 = vmatpush3.msra.mxu0 %v2873_v59 }
 0x469   : > { %v4681_v30 = vpop.permute.xlu1 %2452  ;;  %v4683_v31 = vpop.permute.xlu0 %2454  ;;  %3405 = vmatprep.subr.mxu1 %v2872_v63  ;;  %3382 = vmatprep.subr.mxu0 %v2872_v63 }
 0x46a   : > { %3413 = vmatpush3.msra.mxu1 %v2872_v63  ;;  %3383 = vmatpush3.msra.mxu0 %v2872_v63  ;;  %v2386_v63 = vld [vmem:[#allocation6 + $0x61] sm:$0xff] }
 0x46b   : > { %2168 = vrot.lane.b32.xlu1 %v2146_v33, %s3453_s9  ;;  %2550 = vrot.lane.b32.xlu0 %v2146_v33, %s3460_s16  ;;  %v2387_v33 = vld [vmem:[#allocation6 + $0x71] sm:$0xff] }
 0x46c   : > { %3406 = vmatprep.subr.mxu1 %v2871_v5  ;;  %3384 = vmatprep.subr.mxu0 %v2871_v5 }
 0x46d   : > { %v4687_v32 = vpop.permute.xlu1 %2362  ;;  %v4689_v34 = vpop.permute.xlu0 %2742  ;;  %3414 = vmatpush3.msra.mxu1 %v2871_v5  ;;  %3385 = vmatpush3.msra.mxu0 %v2871_v5 }
 0x46f   : > { %2216 = vrot.lane.b32.xlu1 %v2194_v38, %s3452_s8  ;;  %2598 = vrot.lane.b32.xlu0 %v2194_v38, %s3461_s17  ;;  %v2579_v38 = vld [vmem:[#allocation4 + $0x81] sm:$0xff] }
 0x471   : > { %v4693_v39 = vpop.permute.xlu1 %2458  ;;  %v4695_v42 = vpop.permute.xlu0 %2838 }
 0x473   : > { %2264 = vrot.lane.b32.xlu1 %v2242_v43, %s3454_s10  ;;  %2646 = vrot.lane.b32.xlu0 %v2242_v43, %s3462_s18 }
 0x475   : > { %v4699_v36 = vpop.permute.xlu1 %2746  ;;  %v4701_v44 = vpop.permute.xlu0 %2740 }
 0x477   : > { %2693 = vrot.lane.b32.xlu1 %v2289_v23, %s3463_s19  ;;  %2790 = vrot.lane.b32.xlu0 %v2385_v27, %s3465_s21 }
 0x479   : > { %v4708_v1 = vpop.permute.xlu1 %2360  ;;  %v4710_v4 = vpop.permute.xlu0 %2836 }
 0x47b   : > { %2166 = vrot.lane.b32.xlu0 %v2145_v46, %s3453_s9  ;;  %2308 = vrot.lane.b32.xlu1 %v2288_v51, %s3455_s11 }
 0x47d   : > { %v4720_v40 = vpop.permute.xlu1 %2456  ;;  %v2161_v52 = vpop.permute.xlu0 %2160 }
 0x47e   : > { %2182 = vst.msk [vmem:[#allocation2 + $0x10] sm:$0xff] %vm343_vm1, %v2161_v52 }
 0x47f   : > { %2214 = vrot.lane.b32.xlu0 %v2193_v45, %s3452_s8  ;;  %2404 = vrot.lane.b32.xlu1 %v2384_v55, %s3457_s13 }
 0x481   : > { %v4731_v60 = vpop.permute.xlu1 %2744  ;;  %v2209_v49 = vpop.permute.xlu0 %2208 }
 0x482   : > { %2230 = vst.msk [vmem:[#allocation2 + $0x10] sm:$0xff] %vm4993_vm10, %v2209_v49  ;;  %vm4996_vm10 = vmmov %vm4990_vm8  ;;  %v2290_v49 = vld [vmem:[#allocation6 + $0x60] sm:$0xff] }
 0x483   : > { %2262 = vrot.lane.b32.xlu0 %v2241_v53, %s3454_s10  ;;  %2500 = vrot.lane.b32.xlu1 %v4625_v2, %s3459_s15  ;;  %v2870_v2 = vld [vmem:[%s4970_s5] sm:$0xff] }
 0x484   : > { %3407 = vmatprep.subr.mxu1 %v2870_v2  ;;  %3386 = vmatprep.subr.mxu0 %v2870_v2 }
 0x485   : > { %v4740_v57 = vpop.permute.xlu1 %2840  ;;  %v2257_v0 = vpop.permute.xlu0 %2256  ;;  %3415 = vmatpush3.msra.mxu1 %v2870_v2  ;;  %3387 = vmatpush3.msra.mxu0 %v2870_v2 }
 0x486   : > { %2278 = vst.msk [vmem:[#allocation2 + $0x10] sm:$0xff] %vm441_vm3, %v2257_v0 }
 0x487   : > { %2691 = vrot.lane.b32.xlu0 %v2288_v51, %s3463_s19  ;;  %2548 = vrot.lane.b32.xlu1 %v2145_v46, %s3460_s16 }
 0x489   : > { %v2495_v6 = vpop.permute.xlu1 %2494  ;;  %v2303_v8 = vpop.permute.xlu0 %2302 }
 0x48b   : > { %2788 = vrot.lane.b32.xlu0 %v2384_v55, %s3465_s21  ;;  %2596 = vrot.lane.b32.xlu1 %v2193_v45, %s3461_s17  ;;  %v2195_v45 = vld [vmem:[#allocation4 + $0x71] sm:$0xff] }
 0x48d   : > { %v2543_v9 = vpop.permute.xlu1 %2542  ;;  %v2399_v13 = vpop.permute.xlu0 %2398 }
 0x48f   : > { %2644 = vrot.lane.b32.xlu1 %v2241_v53, %s3462_s18  ;;  %2506 = vrot.lane.b32.xlu0 %v2483_v14, %s3459_s15 }
 0x491   : > { %v2591_v15 = vpop.permute.xlu1 %2590  ;;  %v4755_v16 = vpop.permute.xlu0 %2782 }
 0x493   : > { %2314 = vrot.lane.b32.xlu1 %v2291_v17, %s3455_s11  ;;  %2554 = vrot.lane.b32.xlu0 %v2531_v18, %s3460_s16 }
 0x495   : > { %v2639_v23 = vpop.permute.xlu1 %2638  ;;  %v2159_v27 = vpop.permute.xlu0 %2158 }
 0x496   : > { %2181 = vst.msk [vmem:[#allocation2 + $0x8] sm:$0xff] %vm343_vm1, %v2159_v27 }
 0x497   : > { %2410 = vrot.lane.b32.xlu1 %v2387_v33, %s3457_s13  ;;  %2602 = vrot.lane.b32.xlu0 %v2579_v38, %s3461_s17 }
 0x499   : > { %v2686_v43 = vpop.permute.xlu1 %2685  ;;  %v2207_v37 = vpop.permute.xlu0 %2206 }
 0x49a   : > { %2229 = vst.msk [vmem:[#allocation2 + $0x8] sm:$0xff] %vm4994_vm2, %v2207_v37  ;;  %vm4997_vm2 = vmmov %vm4995_vm15 }
 0x49b   : > { %2794 = vrot.lane.b32.xlu1 %v2387_v33, %s3465_s21  ;;  %2650 = vrot.lane.b32.xlu0 %v2627_v50, %s3462_s18 }
 0x49d   : > { %v2541_v46 = vpop.permute.xlu1 %2540  ;;  %v2255_v51 = vpop.permute.xlu0 %2254 }
 0x49e   : > { %2277 = vst.msk [vmem:[#allocation2 + $0x8] sm:$0xff] %vm441_vm3, %v2255_v51 }
 0x49f   : > { %2325 = vst.msk [vmem:[#allocation2 + $0x8] sm:$0xff] %vm491_vm4, %v2303_v8  ;;  %2170 = vrot.lane.b32.xlu1 %v2147_v48, %s3453_s9  ;;  %2697 = vrot.lane.b32.xlu0 %v2291_v17, %s3463_s19 }
 0x4a0   : > { %2373 = vst.msk [vmem:[#allocation2 + $0x8] sm:$0xff] %vm541_vm5, %v4609_v58 }
 0x4a1   : > { %2421 = vst.msk [vmem:[#allocation2 + $0x8] sm:$0xff] %vm590_vm6, %v2399_v13  ;;  %v2589_v52 = vpop.permute.xlu1 %2588  ;;  %v2301_v35 = vpop.permute.xlu0 %2300  ;;  %v2821_v13 = vld [vmem:[#allocation7 + $0x81] sm:$0xff] }
 0x4a2   : > { %2469 = vst.msk [vmem:[#allocation2 + $0x8] sm:$0xff] %vm639_vm7, %v4614_v47  ;;  %v2243_v47 = vld [vmem:[#allocation5 + $0x71] sm:$0xff] }
 0x4a3   : > { %2324 = vst.msk [vmem:[#allocation2] sm:$0xff] %vm491_vm4, %v2301_v35  ;;  %2218 = vrot.lane.b32.xlu1 %v2195_v45, %s3452_s8  ;;  %2552 = vrot.lane.b32.xlu0 %v2147_v48, %s3460_s16  ;;  %s5028_s8 = sadd.s32 4294967295, %s3450_s24  }
 0x4a4   : > { %2517 = vst.msk [vmem:[#allocation2 + $0x8] sm:$0xff] %vm4990_vm8, %v2495_v6  ;;  %vm4998_vm8 = vcmask 97344   ;;  %s3101_s9 = sshll.u32 %s5028_s8, 3 }
 0x4a5   : > { %2372 = vst.msk [vmem:[#allocation2] sm:$0xff] %vm541_vm5, %v4640_v41  ;;  %v2637_v58 = vpop.permute.xlu1 %2636  ;;  %v2397_v55 = vpop.permute.xlu0 %2396  ;;  %p280_p4 = scmp.lt.s32.totalorder %s3101_s9, 15 }
 0x4a6   : > { %2565 = vst.msk [vmem:[#allocation2 + $0x8] sm:$0xff] %vm739_vm9, %v2543_v9 }
 0x4a7   : > { %2613 = vst.msk [vmem:[#allocation2 + $0x8] sm:$0xff] %vm4995_vm15, %v2591_v15  ;;  %2266 = vrot.lane.b32.xlu1 %v2243_v47, %s3454_s10  ;;  %2600 = vrot.lane.b32.xlu0 %v2195_v45, %s3461_s17  ;;  %vm4999_vm15 = vmmov %vm4998_vm8  ;;  %s5032_s9 = smov (!%p280_p4, %s3101_s9), 15 }
 0x4a8   : > { %2661 = vst.msk [vmem:[#allocation2 + $0x8] sm:$0xff] %vm837_vm11, %v2639_v23 }
 0x4a9   : > { %2420 = vst.msk [vmem:[#allocation2] sm:$0xff] %vm590_vm6, %v2397_v55  ;;  %v2165_v41 = vpop.permute.xlu1 %2164  ;;  %v2493_v59 = vpop.permute.xlu0 %2492 }
 0x4aa   : > { %2468 = vst.msk [vmem:[#allocation2] sm:$0xff] %vm639_vm7, %v4644_v11 }
 0x4ab   : > { %2184 = vst.msk [vmem:[#allocation2 + $0x20] sm:$0xff] %vm343_vm1, %v2165_v41  ;;  %2312 = vrot.lane.b32.xlu1 %v2290_v49, %s3455_s11  ;;  %2648 = vrot.lane.b32.xlu0 %v2243_v47, %s3462_s18 }
 0x4ac   : > { %2516 = vst.msk [vmem:[#allocation2] sm:$0xff] %vm4996_vm10, %v2493_v59 }
 0x4ad   : > { %2564 = vst.msk [vmem:[#allocation2] sm:$0xff] %vm739_vm9, %v2541_v46  ;;  %v2213_v11 = vpop.permute.xlu1 %2212  ;;  %v2307_v53 = vpop.permute.xlu0 %2306 }
 0x4ae   : > { %2612 = vst.msk [vmem:[#allocation2] sm:$0xff] %vm4997_vm2, %v2589_v52 }
 0x4af   : > { %2660 = vst.msk [vmem:[#allocation2] sm:$0xff] %vm837_vm11, %v2637_v58  ;;  %2408 = vrot.lane.b32.xlu1 %v2386_v63, %s3457_s13  ;;  %2830 = vrot.lane.b32.xlu0 %v4514_v62, %s3466_s22  ;;  %s3102_s13 = sshll.u32 %s5032_s9, 3 }
 0x4b0   : > { %2709 = vst.msk [vmem:[#allocation2] sm:$0xff] %vm887_vm12, %v2686_v43  ;;  %s4944_s17 = scalar_lea.vmem %s4972_s7, %s3102_s13 }
 0x4b1   : > { %2232 = vst.msk [vmem:[#allocation2 + $0x20] sm:$0xff] %vm4998_vm8, %v2213_v11  ;;  %v2261_v0 = vpop.permute.xlu1 %2260  ;;  %v2403_v5 = vpop.permute.xlu0 %2402  ;;  %vm5000_vm8 = vmmov %vm4996_vm10 }
 0x4b2   : > { %2758 = vst.msk [vmem:[#allocation2] sm:$0xff] %vm937_vm13, %v4619_v61 }
 0x4b3   : > { %2806 = vst.msk [vmem:[#allocation2] sm:$0xff] %vm986_vm14, %v4755_v16  ;;  %2504 = vrot.lane.b32.xlu1 %v4663_v24, %s3459_s15  ;;  %2832 = vrot.lane.b32.xlu0 %v4544_v56, %s3466_s22 }
 0x4b4   : > { %2280 = vst.msk [vmem:[#allocation2 + $0x20] sm:$0xff] %vm441_vm3, %v2261_v0 }
 0x4b5   : > { %v2690_v2 = vpop.permute.xlu1 %2689  ;;  %v2499_v61 = vpop.permute.xlu0 %2498 }
 0x4b7   : > { %2695 = vrot.lane.b32.xlu1 %v2290_v49, %s3463_s19 }
 0x4b9   : > { %v2787_v6 = vpop.permute.xlu1 %2786  ;;  %v2547_v8 = vpop.permute.xlu0 %2546 }
 0x4bb   : > { %2792 = vrot.lane.b32.xlu1 %v2386_v63, %s3465_s21 }
 0x4bd   : > { %v2163_v62 = vpop.permute.xlu1 %2162  ;;  %v2595_v9 = vpop.permute.xlu0 %2594 }
 0x4be   : > { %2183 = vst.msk [vmem:[#allocation2 + $0x18] sm:$0xff] %vm343_vm1, %v2163_v62 }
 0x4bf   : > { %2842 = vrot.lane.b32.xlu1 %v4560_v25, %s3466_s22 }
 0x4c1   : > { %v2211_v24 = vpop.permute.xlu1 %2210  ;;  %v2643_v14 = vpop.permute.xlu0 %2642 }
 0x4c2   : > { %2231 = vst.msk [vmem:[#allocation2 + $0x18] sm:$0xff] %vm4999_vm15, %v2211_v24  ;;  %vm5001_vm15 = vmmov %vm4997_vm2 }
 0x4c3   : > { %2844 = vrot.lane.b32.xlu1 %v2821_v13, %s3466_s22 }
 0x4c5   : > { %v2259_v56 = vpop.permute.xlu1 %2258  ;;  %v2305_v15 = vpop.permute.xlu0 %2304 }
 0x4c6   : > { %2279 = vst.msk [vmem:[#allocation2 + $0x18] sm:$0xff] %vm441_vm3, %v2259_v56 }
 0x4c7   : > { %2326 = vst.msk [vmem:[#allocation2 + $0x10] sm:$0xff] %vm491_vm4, %v2305_v15  ;;  %2327 = vst.msk [vmem:[#allocation2 + $0x18] sm:$0xff] %vm491_vm4, %v2307_v53  ;;  %v3017_v15 = vld [vmem:[#allocation3 + $0x41] sm:$0xff] }
 0x4c8   : > { %2374 = vst.msk [vmem:[#allocation2 + $0x10] sm:$0xff] %vm541_vm5, %v4659_v21  ;;  %2375 = vst.msk [vmem:[#allocation2 + $0x18] sm:$0xff] %vm541_vm5, %v4653_v19 }
 0x4c9   : > { %2423 = vst.msk [vmem:[#allocation2 + $0x18] sm:$0xff] %vm590_vm6, %v2403_v5  ;;  %v2401_v25 = vpop.permute.xlu1 %2400  ;;  %v2688_v16 = vpop.permute.xlu0 %2687 }
 0x4ca   : > { %2471 = vst.msk [vmem:[#allocation2 + $0x18] sm:$0xff] %vm639_vm7, %v4661_v22 }
 0x4cb   : > { %2422 = vst.msk [vmem:[#allocation2 + $0x10] sm:$0xff] %vm590_vm6, %v2401_v25 }
 0x4cc   : > { %2710 = vst.msk [vmem:[#allocation2 + $0x8] sm:$0xff] %vm887_vm12, %v2688_v16 }
 0x4cd   : > { %2519 = vst.msk [vmem:[#allocation2 + $0x18] sm:$0xff] %vm4996_vm10, %v2499_v61  ;;  %v2497_v19 = vpop.permute.xlu1 %2496  ;;  %v2785_v21 = vpop.permute.xlu0 %2784  ;;  %vm5002_vm10 = vcmask 523744  }
 0x4ce   : > { %2470 = vst.msk [vmem:[#allocation2 + $0x10] sm:$0xff] %vm639_vm7, %v4669_v26 }
 0x4cf   : > { %2759 = vst.msk [vmem:[#allocation2 + $0x8] sm:$0xff] %vm937_vm13, %v4671_v20 }
 0x4d0   : > { %2567 = vst.msk [vmem:[#allocation2 + $0x18] sm:$0xff] %vm739_vm9, %v2547_v8 }
 0x4d1   : > { %2615 = vst.msk [vmem:[#allocation2 + $0x18] sm:$0xff] %vm4997_vm2, %v2595_v9  ;;  %v2545_v22 = vpop.permute.xlu1 %2544  ;;  %v2311_v17 = vpop.permute.xlu0 %2310  ;;  %vm5003_vm2 = vcmask 97344  }
 0x4d2   : > { %2663 = vst.msk [vmem:[#allocation2 + $0x18] sm:$0xff] %vm837_vm11, %v2643_v14 }
 0x4d3   : > { %2518 = vst.msk [vmem:[#allocation2 + $0x10] sm:$0xff] %vm5000_vm8, %v2497_v19  ;;  %vm5004_vm8 = vcmask 523264  }
 0x4d4   : > { %2807 = vst.msk [vmem:[#allocation2 + $0x8] sm:$0xff] %vm986_vm14, %v2785_v21  ;;  %v3016_v21 = vld [vmem:[#allocation3 + $0x31] sm:$0xff] }
 0x4d5   : > { %2566 = vst.msk [vmem:[#allocation2 + $0x10] sm:$0xff] %vm739_vm9, %v2545_v22  ;;  %v2593_v26 = vpop.permute.xlu1 %2592  ;;  %v2407_v18 = vpop.permute.xlu0 %2406 }
 0x4d6   : > { %2614 = vst.msk [vmem:[#allocation2 + $0x10] sm:$0xff] %vm5001_vm15, %v2593_v26  ;;  %vm5005_vm15 = vmmov %vm5003_vm2 }
 0x4d9   : > { %v2641_v20 = vpop.permute.xlu1 %2640  ;;  %v2503_v23 = vpop.permute.xlu0 %2502 }
 0x4da   : > { %2662 = vst.msk [vmem:[#allocation2 + $0x10] sm:$0xff] %vm837_vm11, %v2641_v20 }
 0x4db   : > { %2711 = vst.msk [vmem:[#allocation2 + $0x10] sm:$0xff] %vm887_vm12, %v2690_v2 }
 0x4dc   : > { %2760 = vst.msk [vmem:[#allocation2 + $0x10] sm:$0xff] %vm937_vm13, %v4633_v3 }
 0x4dd   : > { %2808 = vst.msk [vmem:[#allocation2 + $0x10] sm:$0xff] %vm986_vm14, %v2787_v6  ;;  %v2169_v27 = vpop.permute.xlu1 %2168  ;;  %v2551_v33 = vpop.permute.xlu0 %2550 }
 0x4de   : > { %2856 = vst.msk [vmem:[#allocation2 + $0x10] sm:$0xff] %vm5002_vm10, %v4638_v7  ;;  %vm5006_vm10 = vcmask 294144  }
 0x4df   : > { %2186 = vst.msk [vmem:[#allocation2 + $0x30] sm:$0xff] %vm343_vm1, %v2169_v27 }
 0x4e1   : > { %v2217_v38 = vpop.permute.xlu1 %2216  ;;  %v2599_v43 = vpop.permute.xlu0 %2598 }
 0x4e2   : > { %2234 = vst.msk [vmem:[#allocation2 + $0x30] sm:$0xff] %vm5003_vm2, %v2217_v38  ;;  %vm5007_vm2 = vmmov %vm5006_vm10 }
 0x4e5   : > { %v2265_v37 = vpop.permute.xlu1 %2264  ;;  %v2647_v50 = vpop.permute.xlu0 %2646  ;;  %v2864_v46 = vld [vmem:[#allocation2 + $0x10] sm:$0xff] }
 0x4e6   : > { %2282 = vst.msk [vmem:[#allocation2 + $0x30] sm:$0xff] %vm441_vm3, %v2265_v37  ;;  %3391 = vmatprep.mubr.msk.f32.mxu1 %vm5004_vm8, %v2864_v46  ;;  %vm5008_vm8 = vcmask 359744  }
 0x4e9   : > { %v2694_v3 = vpop.permute.xlu1 %2693  ;;  %v2791_v51 = vpop.permute.xlu0 %2790 }
 0x4ed   : > { %v2309_v48 = vpop.permute.xlu1 %2308  ;;  %v2167_v52 = vpop.permute.xlu0 %2166 }
 0x4ee   : > { %2328 = vst.msk [vmem:[#allocation2 + $0x20] sm:$0xff] %vm491_vm4, %v2309_v48  ;;  %v3018_v48 = vld [vmem:[#allocation3 + $0x51] sm:$0xff] }
 0x4ef   : > { %2185 = vst.msk [vmem:[#allocation2 + $0x28] sm:$0xff] %vm343_vm1, %v2167_v52 }
 0x4f0   : > { %2376 = vst.msk [vmem:[#allocation2 + $0x20] sm:$0xff] %vm541_vm5, %v4675_v28 }
 0x4f1   : > { %v2405_v7 = vpop.permute.xlu1 %2404  ;;  %v2215_v35 = vpop.permute.xlu0 %2214 }
 0x4f2   : > { %2424 = vst.msk [vmem:[#allocation2 + $0x20] sm:$0xff] %vm590_vm6, %v2405_v7 }
 0x4f3   : > { %2233 = vst.msk [vmem:[#allocation2 + $0x28] sm:$0xff] %vm5005_vm15, %v2215_v35  ;;  %vm5009_vm15 = vmmov %vm5008_vm8 }
 0x4f4   : > { %2472 = vst.msk [vmem:[#allocation2 + $0x20] sm:$0xff] %vm639_vm7, %v4681_v30 }
 0x4f5   : > { %v2501_v45 = vpop.permute.xlu1 %2500  ;;  %v2263_v58 = vpop.permute.xlu0 %2262 }
 0x4f6   : > { %2520 = vst.msk [vmem:[#allocation2 + $0x20] sm:$0xff] %vm5006_vm10, %v2501_v45  ;;  %vm5010_vm10 = vcmask 523744   ;;  %v3021_v45 = vld [vmem:[#allocation3 + $0x81] sm:$0xff] }
 0x4f7   : > { %2281 = vst.msk [vmem:[#allocation2 + $0x28] sm:$0xff] %vm441_vm3, %v2263_v58 }
 0x4f8   : > { %2329 = vst.msk [vmem:[#allocation2 + $0x28] sm:$0xff] %vm491_vm4, %v2311_v17 }
 0x4f9   : > { %2377 = vst.msk [vmem:[#allocation2 + $0x28] sm:$0xff] %vm541_vm5, %v4677_v29  ;;  %v2549_v28 = vpop.permute.xlu1 %2548  ;;  %v2692_v55 = vpop.permute.xlu0 %2691 }
 0x4fa   : > { %2425 = vst.msk [vmem:[#allocation2 + $0x28] sm:$0xff] %vm590_vm6, %v2407_v18  ;;  %v3015_v18 = vld [vmem:[#allocation3 + $0x21] sm:$0xff] }
 0x4fb   : > { %2473 = vst.msk [vmem:[#allocation2 + $0x28] sm:$0xff] %vm639_vm7, %v4683_v31 }
 0x4fc   : > { %2568 = vst.msk [vmem:[#allocation2 + $0x20] sm:$0xff] %vm739_vm9, %v2549_v28 }
 0x4fd   : > { %2712 = vst.msk [vmem:[#allocation2 + $0x18] sm:$0xff] %vm887_vm12, %v2692_v55  ;;  %v2597_v29 = vpop.permute.xlu1 %2596  ;;  %v2789_v30 = vpop.permute.xlu0 %2788 }
 0x4fe   : > { %2521 = vst.msk [vmem:[#allocation2 + $0x28] sm:$0xff] %vm5007_vm2, %v2503_v23  ;;  %vm5011_vm2 = vmmov %vm5010_vm10 }
 0x4ff   : > { %2761 = vst.msk [vmem:[#allocation2 + $0x18] sm:$0xff] %vm937_vm13, %v4701_v44 }
 0x500   : > { %2569 = vst.msk [vmem:[#allocation2 + $0x28] sm:$0xff] %vm739_vm9, %v2551_v33  ;;  %v3014_v33 = vld [vmem:[#allocation3 + $0x11] sm:$0xff] }
 0x501   : > { %2617 = vst.msk [vmem:[#allocation2 + $0x28] sm:$0xff] %vm5008_vm8, %v2599_v43  ;;  %v2645_v31 = vpop.permute.xlu1 %2644  ;;  %v2507_v47 = vpop.permute.xlu0 %2506  ;;  %vm5012_vm8 = vcmask 523264  }
 0x502   : > { %2665 = vst.msk [vmem:[#allocation2 + $0x28] sm:$0xff] %vm837_vm11, %v2647_v50  ;;  %v3019_v50 = vld [vmem:[#allocation3 + $0x61] sm:$0xff] }
 0x503   : > { %2616 = vst.msk [vmem:[#allocation2 + $0x20] sm:$0xff] %vm5009_vm15, %v2597_v29  ;;  %vm5013_vm15 = vmmov %vm5012_vm8  ;;  %v3020_v29 = vld [vmem:[#allocation3 + $0x71] sm:$0xff] }
 0x504   : > { %2809 = vst.msk [vmem:[#allocation2 + $0x18] sm:$0xff] %vm986_vm14, %v2789_v30 }
 0x505   : > { %2857 = vst.msk [vmem:[#allocation2 + $0x18] sm:$0xff] %vm5010_vm10, %v4710_v4  ;;  %v2315_v44 = vpop.permute.xlu1 %2314  ;;  %v2555_v41 = vpop.permute.xlu0 %2554  ;;  %vm5014_vm10 = vcmask 97344  }
 0x506   : > { %2664 = vst.msk [vmem:[#allocation2 + $0x20] sm:$0xff] %vm837_vm11, %v2645_v31 }
 0x507   : > { %2713 = vst.msk [vmem:[#allocation2 + $0x20] sm:$0xff] %vm887_vm12, %v2694_v3 }
 0x508   : > { %2762 = vst.msk [vmem:[#allocation2 + $0x20] sm:$0xff] %vm937_vm13, %v4689_v34 }
 0x509   : > { %2810 = vst.msk [vmem:[#allocation2 + $0x20] sm:$0xff] %vm986_vm14, %v2791_v51  ;;  %v2411_v4 = vpop.permute.xlu1 %2410  ;;  %v2603_v49 = vpop.permute.xlu0 %2602 }
 0x50a   : > { %2858 = vst.msk [vmem:[#allocation2 + $0x20] sm:$0xff] %vm5011_vm2, %v4695_v42 }
 0x50c   : > { %v2865_v59 = vld [vmem:[#allocation2 + $0x18] sm:$0xff] }
 0x50d   : > { %3392 = vmatmul.mubr.msk.f32.vlgmr.msra.gmra.mxu1 %vm5012_vm8, %v2865_v59  ;;  %v2795_v11 = vpop.permute.xlu1 %2794  ;;  %v2651_v53 = vpop.permute.xlu0 %2650 }
 0x511   : > { %v2866_v63 = vld [vmem:[#allocation2 + $0x20] sm:$0xff]  ;;  %v2171_v0 = vpop.permute.xlu1 %2170  ;;  %v2698_v5 = vpop.permute.xlu0 %2697 }
 0x512   : > { %3394 = vmatprep.mubr.msk.f32.mxu1 %vm5013_vm15, %v2866_v63  ;;  %2187 = vst.msk [vmem:[#allocation2 + $0x38] sm:$0xff] %vm343_vm1, %v2171_v0  ;;  %vm5015_vm1 = vcmask 294144  }
 0x515   : > { %v2219_v34 = vpop.permute.xlu1 %2218  ;;  %v2553_v2 = vpop.permute.xlu0 %2552 }
 0x516   : > { %2235 = vst.msk [vmem:[#allocation2 + $0x38] sm:$0xff] %vm5014_vm10, %v2219_v34 }
 0x519   : > { %v2267_v61 = vpop.permute.xlu1 %2266  ;;  %v2601_v42 = vpop.permute.xlu0 %2600 }
 0x51a   : > { %2283 = vst.msk [vmem:[#allocation2 + $0x38] sm:$0xff] %vm441_vm3, %v2267_v61  ;;  %vm5016_vm3 = vcmask 359744  }
 0x51b   : > { %2331 = vst.msk [vmem:[#allocation2 + $0x38] sm:$0xff] %vm491_vm4, %v2315_v44 }
 0x51c   : > { %2379 = vst.msk [vmem:[#allocation2 + $0x38] sm:$0xff] %vm541_vm5, %v4687_v32 }
 0x51d   : > { %2427 = vst.msk [vmem:[#allocation2 + $0x38] sm:$0xff] %vm590_vm6, %v2411_v4  ;;  %v2313_v6 = vpop.permute.xlu1 %2312  ;;  %v2649_v8 = vpop.permute.xlu0 %2648 }
 0x51e   : > { %2475 = vst.msk [vmem:[#allocation2 + $0x38] sm:$0xff] %vm639_vm7, %v4693_v39 }
 0x51f   : > { %2330 = vst.msk [vmem:[#allocation2 + $0x30] sm:$0xff] %vm491_vm4, %v2313_v6  ;;  %vm5017_vm4 = vmmov %vm5015_vm1 }
 0x520   : > { %2523 = vst.msk [vmem:[#allocation2 + $0x38] sm:$0xff] %vm5015_vm1, %v2507_v47 }
 0x521   : > { %2378 = vst.msk [vmem:[#allocation2 + $0x30] sm:$0xff] %vm541_vm5, %v4708_v1  ;;  %v2409_v62 = vpop.permute.xlu1 %2408  ;;  %v2831_v32 = vpop.permute.xlu0 %2830  ;;  %vm5018_vm5 = vmmov %vm5011_vm2 }
 0x522   : > { %2571 = vst.msk [vmem:[#allocation2 + $0x38] sm:$0xff] %vm739_vm9, %v2555_v41 }
 0x523   : > { %2619 = vst.msk [vmem:[#allocation2 + $0x38] sm:$0xff] %vm5016_vm3, %v2603_v49 }
 0x524   : > { %2667 = vst.msk [vmem:[#allocation2 + $0x38] sm:$0xff] %vm837_vm11, %v2651_v53 }
 0x525   : > { %2426 = vst.msk [vmem:[#allocation2 + $0x30] sm:$0xff] %vm590_vm6, %v2409_v62  ;;  %v2505_v39 = vpop.permute.xlu1 %2504  ;;  %v2833_v1 = vpop.permute.xlu0 %2832  ;;  %vm5019_vm6 = vmmov %vm5016_vm3 }
 0x526   : > { %2854 = vst.msk [vmem:[#allocation2] sm:$0xff] %vm5011_vm2, %v2831_v32 }
 0x527   : > { %2716 = vst.msk [vmem:[#allocation2 + $0x38] sm:$0xff] %vm887_vm12, %v4531_v54 }
 0x528   : > { %2474 = vst.msk [vmem:[#allocation2 + $0x30] sm:$0xff] %vm639_vm7, %v4720_v40  ;;  %vm5020_vm7 = vmmov %vm5012_vm8 }
 0x529   : > { %2765 = vst.msk [vmem:[#allocation2 + $0x38] sm:$0xff] %vm937_vm13, %v4536_v10  ;;  %v2696_v54 = vpop.permute.xlu1 %2695  ;;  %vm5024_vm8 = vmmov %vm5011_vm2 }
 0x52a   : > { %2813 = vst.msk [vmem:[#allocation2 + $0x38] sm:$0xff] %vm986_vm14, %v4542_v12  ;;  %vm5026_vm15 = vmmov %vm5020_vm7 }
 0x52b   : > { %2522 = vst.msk [vmem:[#allocation2 + $0x30] sm:$0xff] %vm5017_vm4, %v2505_v39  ;;  %vm5027_vm10 = vmmov %vm5020_vm7 }
 0x52c   : > { %2855 = vst.msk [vmem:[#allocation2 + $0x8] sm:$0xff] %vm5018_vm5, %v2833_v1 }
 0x52d   : > { %2570 = vst.msk [vmem:[#allocation2 + $0x30] sm:$0xff] %vm739_vm9, %v2553_v2  ;;  %v2862_v40 = vld [vmem:[#allocation2] sm:$0xff]  ;;  %v2793_v10 = vpop.permute.xlu1 %2792  ;;  %vm5021_vm9 = vmmov %vm5020_vm7 }
 0x52e   : > { %2618 = vst.msk [vmem:[#allocation2 + $0x30] sm:$0xff] %vm5019_vm6, %v2601_v42  ;;  %3388 = vmatprep.mubr.msk.f32.mxu0 %vm5020_vm7, %v2862_v40 }
 0x52f   : > { %2666 = vst.msk [vmem:[#allocation2 + $0x30] sm:$0xff] %vm837_vm11, %v2649_v8  ;;  %vm5022_vm11 = vmmov %vm5011_vm2 }
 0x530   : > { %2715 = vst.msk [vmem:[#allocation2 + $0x30] sm:$0xff] %vm887_vm12, %v2698_v5  ;;  %2714 = vst.msk [vmem:[#allocation2 + $0x28] sm:$0xff] %vm887_vm12, %v2696_v54 }
 0x531   : > { %2764 = vst.msk [vmem:[#allocation2 + $0x30] sm:$0xff] %vm937_vm13, %v4699_v36  ;;  %2763 = vst.msk [vmem:[#allocation2 + $0x28] sm:$0xff] %vm937_vm13, %v4731_v60  ;;  %v2843_v9 = vpop.permute.xlu1 %2842 }
 0x532   : > { %2812 = vst.msk [vmem:[#allocation2 + $0x30] sm:$0xff] %vm986_vm14, %v2795_v11  ;;  %2811 = vst.msk [vmem:[#allocation2 + $0x28] sm:$0xff] %vm986_vm14, %v2793_v10 }
 0x533   : > { %v2863_v12 = vld [vmem:[#allocation2 + $0x8] sm:$0xff]  ;;  %2859 = vst.msk [vmem:[#allocation2 + $0x28] sm:$0xff] %vm5022_vm11, %v4740_v57  ;;  %vm5023_vm12 = vmmov %vm5011_vm2  ;;  %v3266_v57 = vld [vmem:[%s4971_s6] ss:$0 sm:$0xff] }
 0x534   : > { %3389 = vmatmul.mubr.msk.f32.vlgmr.msra.gmra.mxu0 %vm5021_vm9, %v2863_v12  ;;  %2860 = vst.msk [vmem:[#allocation2 + $0x30] sm:$0xff] %vm5023_vm12, %v2843_v9  ;;  %vm5025_vm13 = vmmov %vm5020_vm7 }
 0x535   : > { %v2845_v13 = vpop.permute.xlu1 %2844 }
 0x536   : > { %2861 = vst.msk [vmem:[#allocation2 + $0x38] sm:$0xff] %vm5024_vm8, %v2845_v13 }
 0x53a   : > { %v2867_v36 = vld [vmem:[#allocation2 + $0x28] sm:$0xff] }
 0x53b   : > { %3395 = vmatmul.mubr.msk.f32.gmra.mxu1 %vm5025_vm13, %v2867_v36  ;;  %v2868_v60 = vld [vmem:[#allocation2 + $0x30] sm:$0xff] }
 0x53c   : > { %3397 = vmatprep.mubr.msk.f32.mxu1 %vm5026_vm15, %v2868_v60 }
 0x53d   : > { %v2869_v24 = vld [vmem:[#allocation2 + $0x38] sm:$0xff] }
 0x53f   : > { %3398 = vmatmul.mubr.msk.f32.gmra.mxu1 %vm5027_vm10, %v2869_v24 }
 0x5cd   : > { %v3393_v14 = vpop.f32.mrf.mxu1 }
 0x5ce   : > { %v2991_v56 = vadd.f32 %v3393_v14, %v3266_v57 }
 0x5cf   : > { %v2985_v25 = vpop.f32.mrf.mxu1 }
 0x5d0   : > { %v3025_v16 = vadd.f32 %v3017_v15, %v2991_v56  ;;  %v2986_v19 = vadd.f32 %v3266_v57, %v2985_v25 }
 0x5d2   : > { %3033 = vst.msk [vmem:[%s4944_s17 + $0x18] sm:$0xff] %vm293_vm0, %v3025_v16  ;;  %v3024_v22 = vadd.f32 %v3016_v21, %v2986_v19 }
 0x5d4   : > { %3032 = vst.msk [vmem:[%s4944_s17 + $0x10] sm:$0xff] %vm293_vm0, %v3024_v22 }
 0x5f4   : > { %v3390_v17 = vpop.f32.mrf.mxu0 }
 0x5f5   : > { %v2981_v26 = vadd.f32 %v3390_v17, %v3266_v57 }
 0x5f6   : > { %v2975_v20 = vpop.f32.mrf.mxu0 }
 0x5f7   : > { %v3023_v23 = vadd.f32 %v3015_v18, %v2981_v26  ;;  %v2976_v27 = vadd.f32 %v3266_v57, %v2975_v20 }
 0x5f9   : > { %3031 = vst.msk [vmem:[%s4944_s17 + $0x8] sm:$0xff] %vm293_vm0, %v3023_v23  ;;  %v3022_v38 = vadd.f32 %v3014_v33, %v2976_v27 }
 0x5fb   : > { %3030 = vst.msk [vmem:[%s4944_s17] sm:$0xff] %vm293_vm0, %v3022_v38  ;;  %v3396_v43 = vpop.f32.mrf.mxu1 }
 0x5fc   : > { %v3001_v37 = vadd.f32 %v3396_v43, %v3266_v57 }
 0x5fd   : > { %v2995_v46 = vpop.f32.mrf.mxu1 }
 0x5fe   : > { %v3027_v3 = vadd.f32 %v3019_v50, %v3001_v37  ;;  %v2996_v51 = vadd.f32 %v3266_v57, %v2995_v46 }
 0x5ff   : > { %v3399_v7 = vpop.f32.mrf.mxu1 }
 0x600   : > { %3035 = vst.msk [vmem:[%s4944_s17 + $0x28] sm:$0xff] %vm293_vm0, %v3027_v3  ;;  %v3026_v52 = vadd.f32 %v3018_v48, %v2996_v51  ;;  %v3011_v35 = vadd.f32 %v3399_v7, %v3266_v57 }
 0x601   : > { %v3005_v58 = vpop.f32.mrf.mxu1 }
 0x602   : > { %3034 = vst.msk [vmem:[%s4944_s17 + $0x20] sm:$0xff] %vm293_vm0, %v3026_v52  ;;  %v3029_v28 = vadd.f32 %v3021_v45, %v3011_v35  ;;  %v3006_v55 = vadd.f32 %v3266_v57, %v3005_v58 }
 0x604   : > { %3037 = vst.msk [vmem:[%s4944_s17 + $0x38] sm:$0xff] %vm293_vm0, %v3029_v28  ;;  %v3028_v30 = vadd.f32 %v3020_v29, %v3006_v55 }
 0x606   : > { %3036 = vst.msk [vmem:[%s4944_s17 + $0x30] sm:$0xff] %vm293_vm0, %v3028_v30 }
 0x607 PF: > { %s17_s24 = sadd.s32 1, %s3450_s24  }
 0x608   : > { %p14_p5 = scmp.ge.s32.totalorder %s17_s24, 4  }
 0x60a   :  { %16 = sbr.rel (!%p14_p5) target bundleno = 1 (0x1), region = 94 }

</bundles_post_ra>
